<compile_context>
chip_gen: v7x
topology: tpu7x:2x2x1
jax: 0.10.0
libtpu: 0.0.40
codegen_flags: <defaults>
</compile_context>

<pallas_src>
import math
from functools import partial

import numpy as np
import jax
import jax.numpy as jnp
from jax.experimental import pallas as pl
from jax.experimental.pallas import tpu as pltpu

_EPS = 1e-5


def _row_tile(m, cap=256):
    """Largest convenient row tile that evenly divides m."""
    for t in (cap, 128, 64, 32, 16, 8):
        if t <= m and m % t == 0:
            return t
    return m


# ----------------------------------------------------------------------------- kernels

def _linear_kernel(x_ref, w_ref, b_ref, o_ref):
    acc = jnp.dot(x_ref[...], w_ref[...], preferred_element_type=jnp.float32)
    o_ref[...] = (acc + b_ref[...]).astype(o_ref.dtype)


def linear(x, w, b):
    """y = x @ w + b.   x: (M, K), w: (K, N), b: (N,)."""
    M, K = x.shape
    N = w.shape[1]
    tm = _row_tile(M)
    return pl.pallas_call(
        _linear_kernel,
        out_shape=jax.ShapeDtypeStruct((M, N), jnp.float32),
        grid_spec=pltpu.PrefetchScalarGridSpec(
            num_scalar_prefetch=0,
            grid=(M // tm,),
            in_specs=[
                pl.BlockSpec((tm, K), lambda i: (i, 0)),
                pl.BlockSpec((K, N), lambda i: (0, 0)),
                pl.BlockSpec((1, N), lambda i: (0, 0)),
            ],
            out_specs=pl.BlockSpec((tm, N), lambda i: (i, 0)),
        ),
        compiler_params=pltpu.CompilerParams(dimension_semantics=("parallel",)),
    )(x, w, b.reshape(1, N))


def _add_ln_kernel(x_ref, r_ref, g_ref, be_ref, o_ref):
    # LayerNorm(x + residual) with single-pass (sum, sum-of-squares) statistics.
    z = x_ref[...] + r_ref[...]
    inv_d = 1.0 / z.shape[-1]
    mean = jnp.sum(z, axis=-1, keepdims=True) * inv_d
    mean_sq = jnp.sum(z * z, axis=-1, keepdims=True) * inv_d
    var = mean_sq - mean * mean
    zn = (z - mean) * jax.lax.rsqrt(var + _EPS)
    o_ref[...] = (zn * g_ref[...] + be_ref[...]).astype(o_ref.dtype)


def add_layernorm(x, res, gamma, beta):
    """LayerNorm(x + res) over the last dim.  x, res: (M, D)."""
    M, D = x.shape
    tm = _row_tile(M)
    return pl.pallas_call(
        _add_ln_kernel,
        out_shape=jax.ShapeDtypeStruct((M, D), jnp.float32),
        grid_spec=pltpu.PrefetchScalarGridSpec(
            num_scalar_prefetch=0,
            grid=(M // tm,),
            in_specs=[
                pl.BlockSpec((tm, D), lambda i: (i, 0)),
                pl.BlockSpec((tm, D), lambda i: (i, 0)),
                pl.BlockSpec((1, D), lambda i: (0, 0)),
                pl.BlockSpec((1, D), lambda i: (0, 0)),
            ],
            out_specs=pl.BlockSpec((tm, D), lambda i: (i, 0)),
        ),
        compiler_params=pltpu.CompilerParams(dimension_semantics=("parallel",)),
    )(x, res, gamma.reshape(1, D), beta.reshape(1, D))


def layernorm(x, gamma, beta):
    return add_layernorm(x, jnp.zeros_like(x), gamma, beta)


def _ffn_addnorm_kernel(x_ref, w1_ref, b1_ref, w2_ref, b2_ref, g_ref, be_ref, o_ref):
    # LayerNorm(x + linear2(relu(linear1(x)))) — dropout is identity in inference.
    x = x_ref[...]
    h = jnp.dot(x, w1_ref[...], preferred_element_type=jnp.float32) + b1_ref[...]
    h = jnp.maximum(h, 0.0)
    y = jnp.dot(h, w2_ref[...], preferred_element_type=jnp.float32) + b2_ref[...]
    z = x + y
    inv_d = 1.0 / z.shape[-1]
    mean = jnp.sum(z, axis=-1, keepdims=True) * inv_d
    mean_sq = jnp.sum(z * z, axis=-1, keepdims=True) * inv_d
    var = mean_sq - mean * mean
    zn = (z - mean) * jax.lax.rsqrt(var + _EPS)
    o_ref[...] = (zn * g_ref[...] + be_ref[...]).astype(o_ref.dtype)


def ffn_addnorm(x, w1, b1, w2, b2, gamma, beta):
    """Fused feed-forward block + residual + LayerNorm.  x: (M, D)."""
    M, D = x.shape
    F = w1.shape[1]
    tm = _row_tile(M)
    return pl.pallas_call(
        _ffn_addnorm_kernel,
        out_shape=jax.ShapeDtypeStruct((M, D), jnp.float32),
        grid_spec=pltpu.PrefetchScalarGridSpec(
            num_scalar_prefetch=0,
            grid=(M // tm,),
            in_specs=[
                pl.BlockSpec((tm, D), lambda i: (i, 0)),
                pl.BlockSpec((D, F), lambda i: (0, 0)),
                pl.BlockSpec((1, F), lambda i: (0, 0)),
                pl.BlockSpec((F, D), lambda i: (0, 0)),
                pl.BlockSpec((1, D), lambda i: (0, 0)),
                pl.BlockSpec((1, D), lambda i: (0, 0)),
                pl.BlockSpec((1, D), lambda i: (0, 0)),
            ],
            out_specs=pl.BlockSpec((tm, D), lambda i: (i, 0)),
        ),
        compiler_params=pltpu.CompilerParams(dimension_semantics=("parallel",)),
    )(x, w1, b1.reshape(1, F), w2, b2.reshape(1, D),
      gamma.reshape(1, D), beta.reshape(1, D))


def _mha_core_kernel(q_ref, k_ref, v_ref, m_ref, o_ref):
    # q: (1, H, Lq, Dh)   k, v: (1, H, Lk, Dh)   m: (Lq, Lk) additive   o: (1, H, Lq, Dh)
    q = q_ref[0]
    k = k_ref[0]
    v = v_ref[0]
    scale = 1.0 / math.sqrt(q.shape[-1])
    s = jnp.einsum("hqd,hkd->hqk", q, k, preferred_element_type=jnp.float32)
    s = s * scale + m_ref[...][None, :, :]
    s = s - jnp.max(s, axis=-1, keepdims=True)
    e = jnp.exp(s)
    p = e / jnp.sum(e, axis=-1, keepdims=True)
    o = jnp.einsum("hqk,hkd->hqd", p, v, preferred_element_type=jnp.float32)
    o_ref[0] = o.astype(o_ref.dtype)


def mha_core(q, k, v, mask):
    """Softmax attention per (batch, head).  q/k/v: (B, H, L, Dh).  Returns (B, H, Lq, Dh)."""
    B, H, Lq, Dh = q.shape
    Lk = k.shape[2]
    return pl.pallas_call(
        _mha_core_kernel,
        out_shape=jax.ShapeDtypeStruct((B, H, Lq, Dh), jnp.float32),
        grid_spec=pltpu.PrefetchScalarGridSpec(
            num_scalar_prefetch=0,
            grid=(B,),
            in_specs=[
                pl.BlockSpec((1, H, Lq, Dh), lambda b: (b, 0, 0, 0)),
                pl.BlockSpec((1, H, Lk, Dh), lambda b: (b, 0, 0, 0)),
                pl.BlockSpec((1, H, Lk, Dh), lambda b: (b, 0, 0, 0)),
                pl.BlockSpec((Lq, Lk), lambda b: (0, 0)),
            ],
            out_specs=pl.BlockSpec((1, H, Lq, Dh), lambda b: (b, 0, 0, 0)),
        ),
        compiler_params=pltpu.CompilerParams(dimension_semantics=("parallel",)),
    )(q, k, v, mask)


# ---------------------------------------------------------------- model orchestration

def multihead_attention(x_q, x_k, x_v, p, mask, nhead):
    """nn.MultiheadAttention forward, seq-first (L, B, E) inputs, dropout = identity."""
    Lq, B, E = x_q.shape
    Lk = x_k.shape[0]
    Dh = E // nhead
    q = linear(x_q.reshape(Lq * B, E), p["wq"], p["bq"])
    k = linear(x_k.reshape(Lk * B, E), p["wk"], p["bk"])
    v = linear(x_v.reshape(Lk * B, E), p["wv"], p["bv"])
    q = q.reshape(Lq, B, nhead, Dh).transpose(1, 2, 0, 3)
    k = k.reshape(Lk, B, nhead, Dh).transpose(1, 2, 0, 3)
    v = v.reshape(Lk, B, nhead, Dh).transpose(1, 2, 0, 3)
    if mask is None:
        mask = jnp.zeros((Lq, Lk), jnp.float32)
    attn = mha_core(q, k, v, mask)                                # (B, H, Lq, Dh)
    attn = attn.transpose(2, 0, 1, 3).reshape(Lq * B, E)          # (Lq, B, E) flattened
    return linear(attn, p["wo"], p["bo"]).reshape(Lq, B, E)


def encoder_layer(src, pos, p, nhead):
    L, B, E = src.shape
    qk = src + pos
    src2 = multihead_attention(qk, qk, src, p["self_attn"], None, nhead)
    src = add_layernorm(src2.reshape(L * B, E), src.reshape(L * B, E),
                        p["ln1_g"], p["ln1_b"])
    src = ffn_addnorm(src, p["w1"], p["b1"], p["w2"], p["b2"],
                      p["ln2_g"], p["ln2_b"])
    return src.reshape(L, B, E)


def decoder_layer(tgt, memory, tgt_mask, pos, query_pos, p, nhead):
    T, B, E = tgt.shape
    qk = tgt + query_pos
    tgt2 = multihead_attention(qk, qk, tgt, p["self_attn"], tgt_mask, nhead)
    tgt = add_layernorm(tgt2.reshape(T * B, E), tgt.reshape(T * B, E),
                        p["ln1_g"], p["ln1_b"]).reshape(T, B, E)
    # TODO(synk): MoChA monotonic/chunkwise alignment (src_attn) source not in spec;
    # approximated with standard multi-head scaled-dot cross-attention over memory.
    tgt2 = multihead_attention(tgt + query_pos, memory + pos, memory,
                               p["src_attn"], None, nhead)
    tgt = add_layernorm(tgt2.reshape(T * B, E), tgt.reshape(T * B, E),
                        p["ln2_g"], p["ln2_b"])
    tgt = ffn_addnorm(tgt, p["w1"], p["b1"], p["w2"], p["b2"],
                      p["ln3_g"], p["ln3_b"])
    return tgt.reshape(T, B, E)


def transformer_monotonic_forward(params, src, tgt, query_embed, pos_embed,
                                  tgt_mask, nhead):
    memory = src
    for p in params["encoder"]:
        memory = encoder_layer(memory, pos_embed, p, nhead)
    # encoder norm is None (normalize_before=False)
    out = tgt
    for p in params["decoder"]:
        out = decoder_layer(out, memory, tgt_mask, pos_embed, query_embed, p, nhead)
    T, B, E = out.shape
    out = layernorm(out.reshape(T * B, E),
                    params["dec_norm_g"], params["dec_norm_b"]).reshape(T, B, E)
    return out


# -------------------------------------------------------------------- pure-JAX reference

def _ref_linear(x, w, b):
    return x @ w + b


def _ref_ln(x, g, b):
    mean = x.mean(-1, keepdims=True)
    var = ((x - mean) ** 2).mean(-1, keepdims=True)
    return (x - mean) / jnp.sqrt(var + _EPS) * g + b


def _ref_mha(x_q, x_k, x_v, p, mask, nhead):
    Lq, B, E = x_q.shape
    Lk = x_k.shape[0]
    Dh = E // nhead
    q = _ref_linear(x_q, p["wq"], p["bq"]).reshape(Lq, B, nhead, Dh).transpose(1, 2, 0, 3)
    k = _ref_linear(x_k, p["wk"], p["bk"]).reshape(Lk, B, nhead, Dh).transpose(1, 2, 0, 3)
    v = _ref_linear(x_v, p["wv"], p["bv"]).reshape(Lk, B, nhead, Dh).transpose(1, 2, 0, 3)
    s = jnp.einsum("bhqd,bhkd->bhqk", q, k) * (1.0 / math.sqrt(Dh))
    if mask is not None:
        s = s + mask
    a = jax.nn.softmax(s, axis=-1)
    o = jnp.einsum("bhqk,bhkd->bhqd", a, v)
    o = o.transpose(2, 0, 1, 3).reshape(Lq, B, E)
    return _ref_linear(o, p["wo"], p["bo"])


def _ref_encoder_layer(src, pos, p, nhead):
    qk = src + pos
    src2 = _ref_mha(qk, qk, src, p["self_attn"], None, nhead)
    src = _ref_ln(src + src2, p["ln1_g"], p["ln1_b"])
    src2 = _ref_linear(jnp.maximum(_ref_linear(src, p["w1"], p["b1"]), 0.0),
                       p["w2"], p["b2"])
    return _ref_ln(src + src2, p["ln2_g"], p["ln2_b"])


def _ref_decoder_layer(tgt, memory, tgt_mask, pos, query_pos, p, nhead):
    qk = tgt + query_pos
    tgt2 = _ref_mha(qk, qk, tgt, p["self_attn"], tgt_mask, nhead)
    tgt = _ref_ln(tgt + tgt2, p["ln1_g"], p["ln1_b"])
    tgt2 = _ref_mha(tgt + query_pos, memory + pos, memory, p["src_attn"], None, nhead)
    tgt = _ref_ln(tgt + tgt2, p["ln2_g"], p["ln2_b"])
    tgt2 = _ref_linear(jnp.maximum(_ref_linear(tgt, p["w1"], p["b1"]), 0.0),
                       p["w2"], p["b2"])
    return _ref_ln(tgt + tgt2, p["ln3_g"], p["ln3_b"])


def ref_forward(params, src, tgt, query_embed, pos_embed, tgt_mask, nhead):
    memory = src
    for p in params["encoder"]:
        memory = _ref_encoder_layer(memory, pos_embed, p, nhead)
    out = tgt
    for p in params["decoder"]:
        out = _ref_decoder_layer(out, memory, tgt_mask, pos_embed, query_embed, p, nhead)
    return _ref_ln(out, params["dec_norm_g"], params["dec_norm_b"])


# ------------------------------------------------------------------------- parameters

def _xavier(key, shape):
    fan_in, fan_out = shape
    a = math.sqrt(6.0 / (fan_in + fan_out))
    return jax.random.uniform(key, shape, jnp.float32, -a, a)


def _ln_params(key, d):
    k1, k2 = jax.random.split(key)
    return (1.0 + 0.05 * jax.random.normal(k1, (d,), jnp.float32),
            0.05 * jax.random.normal(k2, (d,), jnp.float32))


def _mha_params(key, d_model):
    ks = jax.random.split(key, 8)
    return {
        "wq": _xavier(ks[0], (d_model, d_model)),
        "bq": 0.02 * jax.random.normal(ks[1], (d_model,), jnp.float32),
        "wk": _xavier(ks[2], (d_model, d_model)),
        "bk": 0.02 * jax.random.normal(ks[3], (d_model,), jnp.float32),
        "wv": _xavier(ks[4], (d_model, d_model)),
        "bv": 0.02 * jax.random.normal(ks[5], (d_model,), jnp.float32),
        "wo": _xavier(ks[6], (d_model, d_model)),
        "bo": 0.02 * jax.random.normal(ks[7], (d_model,), jnp.float32),
    }


def _encoder_layer_params(key, d_model, dff):
    ks = jax.random.split(key, 7)
    g1, b1 = _ln_params(ks[5], d_model)
    g2, b2 = _ln_params(ks[6], d_model)
    return {
        "self_attn": _mha_params(ks[0], d_model),
        "w1": _xavier(ks[1], (d_model, dff)),
        "b1": 0.02 * jax.random.normal(ks[2], (dff,), jnp.float32),
        "w2": _xavier(ks[3], (dff, d_model)),
        "b2": 0.02 * jax.random.normal(ks[4], (d_model,), jnp.float32),
        "ln1_g": g1, "ln1_b": b1, "ln2_g": g2, "ln2_b": b2,
    }


def _decoder_layer_params(key, d_model, dff):
    ks = jax.random.split(key, 9)
    g1, b1 = _ln_params(ks[6], d_model)
    g2, b2 = _ln_params(ks[7], d_model)
    g3, b3 = _ln_params(ks[8], d_model)
    return {
        "self_attn": _mha_params(ks[0], d_model),
        "src_attn": _mha_params(ks[1], d_model),
        "w1": _xavier(ks[2], (d_model, dff)),
        "b1": 0.02 * jax.random.normal(ks[3], (dff,), jnp.float32),
        "w2": _xavier(ks[4], (dff, d_model)),
        "b2": 0.02 * jax.random.normal(ks[5], (d_model,), jnp.float32),
        "ln1_g": g1, "ln1_b": b1, "ln2_g": g2, "ln2_b": b2, "ln3_g": g3, "ln3_b": b3,
    }


def init_params(key, d_model, dff, n_enc, n_dec):
    keys = jax.random.split(key, n_enc + n_dec + 1)
    gN, bN = _ln_params(keys[-1], d_model)
    return {
        "encoder": [_encoder_layer_params(keys[i], d_model, dff) for i in range(n_enc)],
        "decoder": [_decoder_layer_params(keys[n_enc + i], d_model, dff) for i in range(n_dec)],
        "dec_norm_g": gN,
        "dec_norm_b": bN,
    }


# ------------------------------------------------------------------------------- main

if __name__ == "__main__":
    # Small shapes consistent with the module (d_model kept lane-dense at 128).
    d_model, nhead, dff = 128, 4, 256
    n_enc, n_dec = 2, 2
    B, S, T = 2, 16, 8

    key = jax.random.PRNGKey(0)
    k_par, k_src, k_tgt, k_qe, k_pe = jax.random.split(key, 5)
    params = init_params(k_par, d_model, dff, n_enc, n_dec)

    src = jax.random.normal(k_src, (S, B, d_model), jnp.float32)
    tgt = jax.random.normal(k_tgt, (T, B, d_model), jnp.float32)
    query_embed = jax.random.normal(k_qe, (T, B, d_model), jnp.float32)
    pos_embed = jax.random.normal(k_pe, (S, B, d_model), jnp.float32)
    # Additive causal tgt mask (standard use of tgt_mask in this module).
    tgt_mask = jnp.where(jnp.arange(T)[:, None] >= jnp.arange(T)[None, :],
                         0.0, -1e9).astype(jnp.float32)

    fwd = jax.jit(partial(transformer_monotonic_forward, nhead=nhead))
    out = jax.block_until_ready(fwd(params, src, tgt, query_embed, pos_embed, tgt_mask))

    ref = jax.block_until_ready(
        ref_forward(params, src, tgt, query_embed, pos_embed, tgt_mask, nhead))
    np.testing.assert_allclose(np.asarray(out), np.asarray(ref), rtol=1e-3, atol=1e-3)

    print("KERNEL_OK")
</pallas_src>

<mosaic_0001>
module attributes {stable_mosaic.version = 11 : i64} {
  func.func @_linear_kernel(%arg0: i32, %arg1: memref<32x128xf32, #tpu.memory_space<vmem>>, %arg2: memref<128x128xf32, #tpu.memory_space<vmem>>, %arg3: memref<1x128xf32, #tpu.memory_space<vmem>>, %arg4: memref<32x128xf32, #tpu.memory_space<vmem>>) attributes {dimension_semantics = [#tpu.dimension_semantics<parallel>], iteration_bounds = array<i64: 1>, scalar_prefetch = 0 : i64, scratch_operands = 0 : i64, tpu.core_type = #tpu.core_type<tc>, window_params = [{transform_indices = @transform_0, window_bounds = array<i64: 32, 128>}, {pipeline_mode = #tpu.pipeline_mode<synchronous>, transform_indices = @transform_1, window_bounds = array<i64: 128, 128>}, {pipeline_mode = #tpu.pipeline_mode<synchronous>, transform_indices = @transform_2, window_bounds = array<i64: 1, 128>}, {transform_indices = @transform_3, window_bounds = array<i64: 32, 128>}]} {
    %c0 = arith.constant 0 : index
    %c0_0 = arith.constant 0 : index
    %0 = vector.load %arg1[%c0, %c0_0] : memref<32x128xf32, #tpu.memory_space<vmem>>, vector<32x128xf32>
    %c0_1 = arith.constant 0 : index
    %c0_2 = arith.constant 0 : index
    %1 = vector.load %arg2[%c0_1, %c0_2] : memref<128x128xf32, #tpu.memory_space<vmem>>, vector<128x128xf32>
    %cst = arith.constant dense<0.000000e+00> : vector<32x128xf32>
    %2 = tpu.matmul %0, %1, %cst {dimension_numbers = #tpu.dot_dimension_numbers<[1], [0], [0], [1], [0, 0, 1, 1], [], []>} : vector<32x128xf32>, vector<128x128xf32>, vector<32x128xf32> -> vector<32x128xf32>
    %c0_3 = arith.constant 0 : index
    %c0_4 = arith.constant 0 : index
    %3 = vector.load %arg3[%c0_3, %c0_4] : memref<1x128xf32, #tpu.memory_space<vmem>>, vector<1x128xf32>
    %4 = vector.broadcast %3 : vector<1x128xf32> to vector<32x128xf32>
    %5 = arith.addf %2, %4 : vector<32x128xf32>
    %c0_5 = arith.constant 0 : index
    %c0_6 = arith.constant 0 : index
    %6 = vector.load %arg4[%c0_5, %c0_6] : memref<32x128xf32, #tpu.memory_space<vmem>>, vector<32x128xf32>
    tpu.vector_store %arg4[%c0_5, %c0_6], %5 {strides = array<i32>} : memref<32x128xf32, #tpu.memory_space<vmem>>, vector<32x128xf32>,
    return
  }
  func.func @transform_0(%arg0: i32) -> (i32, i32) {
    %c0_i32 = arith.constant 0 : i32
    %c0_i32_0 = arith.constant 0 : i32
    return %arg0, %c0_i32 : i32, i32
  }
  func.func @transform_1(%arg0: i32) -> (i32, i32) {
    %c0_i32 = arith.constant 0 : i32
    %c0_i32_0 = arith.constant 0 : i32
    %c0_i32_1 = arith.constant 0 : i32
    return %c0_i32, %c0_i32_0 : i32, i32
  }
  func.func @transform_2(%arg0: i32) -> (i32, i32) {
    %c0_i32 = arith.constant 0 : i32
    %c0_i32_0 = arith.constant 0 : i32
    %c0_i32_1 = arith.constant 0 : i32
    return %c0_i32, %c0_i32_0 : i32, i32
  }
  func.func @transform_3(%arg0: i32) -> (i32, i32) {
    %c0_i32 = arith.constant 0 : i32
    %c0_i32_0 = arith.constant 0 : i32
    return %arg0, %c0_i32 : i32, i32
  }
}

module attributes {stable_mosaic.version = 11 : i64} {
  func.func @_mha_core_kernel(%arg0: i32, %arg1: memref<1x4x16x32xf32, #tpu.memory_space<vmem>>, %arg2: memref<1x4x16x32xf32, #tpu.memory_space<vmem>>, %arg3: memref<1x4x16x32xf32, #tpu.memory_space<vmem>>, %arg4: memref<16x16xf32, #tpu.memory_space<vmem>>, %arg5: memref<1x4x16x32xf32, #tpu.memory_space<vmem>>) attributes {dimension_semantics = [#tpu.dimension_semantics<parallel>], iteration_bounds = array<i64: 2>, scalar_prefetch = 0 : i64, scratch_operands = 0 : i64, tpu.core_type = #tpu.core_type<tc>, window_params = [{transform_indices = @transform_0, window_bounds = array<i64: 1, 4, 16, 32>}, {transform_indices = @transform_1, window_bounds = array<i64: 1, 4, 16, 32>}, {transform_indices = @transform_2, window_bounds = array<i64: 1, 4, 16, 32>}, {pipeline_mode = #tpu.pipeline_mode<synchronous>, transform_indices = @transform_3, window_bounds = array<i64: 16, 16>}, {transform_indices = @transform_4, window_bounds = array<i64: 1, 4, 16, 32>}]} {
    %c0 = arith.constant 0 : index
    %c0_0 = arith.constant 0 : index
    %c0_1 = arith.constant 0 : index
    %c0_2 = arith.constant 0 : index
    %0 = vector.load %arg1[%c0, %c0_0, %c0_1, %c0_2] : memref<1x4x16x32xf32, #tpu.memory_space<vmem>>, vector<1x4x16x32xf32>
    %1 = vector.shape_cast %0 : vector<1x4x16x32xf32> to vector<4x16x32xf32>
    %c0_3 = arith.constant 0 : index
    %c0_4 = arith.constant 0 : index
    %c0_5 = arith.constant 0 : index
    %c0_6 = arith.constant 0 : index
    %2 = vector.load %arg2[%c0_3, %c0_4, %c0_5, %c0_6] : memref<1x4x16x32xf32, #tpu.memory_space<vmem>>, vector<1x4x16x32xf32>
    %3 = vector.shape_cast %2 : vector<1x4x16x32xf32> to vector<4x16x32xf32>
    %c0_7 = arith.constant 0 : index
    %c0_8 = arith.constant 0 : index
    %c0_9 = arith.constant 0 : index
    %c0_10 = arith.constant 0 : index
    %4 = vector.load %arg3[%c0_7, %c0_8, %c0_9, %c0_10] : memref<1x4x16x32xf32, #tpu.memory_space<vmem>>, vector<1x4x16x32xf32>
    %5 = vector.shape_cast %4 : vector<1x4x16x32xf32> to vector<4x16x32xf32>
    "tpu.trace_start"() <{level = 10 : i32, message = "hqd,hkd->hqk"}> : () -> ()
    %cst = arith.constant dense<0.000000e+00> : vector<4x16x16xf32>
    %6 = tpu.matmul %1, %3, %cst {dimension_numbers = #tpu.dot_dimension_numbers<[2], [2], [1], [1], [0, 0, 0, 1, 1, 1], [0], [0]>} : vector<4x16x32xf32>, vector<4x16x32xf32>, vector<4x16x16xf32> -> vector<4x16x16xf32>
    "tpu.trace_stop"() : () -> ()
    %cst_11 = arith.constant 0.176776692 : f32
    %7 = vector.broadcast %cst_11 : f32 to vector<4x16x16xf32>
    %8 = arith.mulf %6, %7 : vector<4x16x16xf32>
    %c0_12 = arith.constant 0 : index
    %c0_13 = arith.constant 0 : index
    %9 = vector.load %arg4[%c0_12, %c0_13] : memref<16x16xf32, #tpu.memory_space<vmem>>, vector<16x16xf32>
    %10 = vector.shape_cast %9 : vector<16x16xf32> to vector<1x16x16xf32>
    %11 = vector.broadcast %10 : vector<1x16x16xf32> to vector<4x16x16xf32>
    %12 = arith.addf %8, %11 : vector<4x16x16xf32>
    %cst_14 = arith.constant dense<0xFF800000> : vector<4x16xf32>
    %13 = vector.multi_reduction <maximumf>, %12, %cst_14 [2] : vector<4x16x16xf32> to vector<4x16xf32>
    %14 = vector.shape_cast %13 : vector<4x16xf32> to vector<4x16x1xf32>
    %15 = vector.broadcast %14 : vector<4x16x1xf32> to vector<4x16x16xf32>
    %16 = arith.subf %12, %15 : vector<4x16x16xf32>
    %17 = math.exp %16 : vector<4x16x16xf32>
    %cst_15 = arith.constant dense<0.000000e+00> : vector<4x16xf32>
    %18 = vector.multi_reduction <add>, %17, %cst_15 [2] : vector<4x16x16xf32> to vector<4x16xf32>
    %19 = vector.shape_cast %18 : vector<4x16xf32> to vector<4x16x1xf32>
    %20 = vector.broadcast %19 : vector<4x16x1xf32> to vector<4x16x16xf32>
    %21 = arith.divf %17, %20 : vector<4x16x16xf32>
    "tpu.trace_start"() <{level = 10 : i32, message = "hqk,hkd->hqd"}> : () -> ()
    %cst_16 = arith.constant dense<0.000000e+00> : vector<4x16x32xf32>
    %22 = tpu.matmul %21, %5, %cst_16 {dimension_numbers = #tpu.dot_dimension_numbers<[2], [1], [1], [2], [0, 0, 0, 1, 1, 2], [0], [0]>} : vector<4x16x16xf32>, vector<4x16x32xf32>, vector<4x16x32xf32> -> vector<4x16x32xf32>
    "tpu.trace_stop"() : () -> ()
    %c0_17 = arith.constant 0 : index
    %c0_18 = arith.constant 0 : index
    %c0_19 = arith.constant 0 : index
    %c0_20 = arith.constant 0 : index
    %23 = vector.load %arg5[%c0_17, %c0_18, %c0_19, %c0_20] : memref<1x4x16x32xf32, #tpu.memory_space<vmem>>, vector<1x4x16x32xf32>
    %24 = vector.shape_cast %23 : vector<1x4x16x32xf32> to vector<4x16x32xf32>
    %25 = vector.shape_cast %22 : vector<4x16x32xf32> to vector<1x4x16x32xf32>
    tpu.vector_store %arg5[%c0_17, %c0_18, %c0_19, %c0_20], %25 {strides = array<i32>} : memref<1x4x16x32xf32, #tpu.memory_space<vmem>>, vector<1x4x16x32xf32>,
    return
  }
  func.func @transform_0(%arg0: i32) -> (i32, i32, i32, i32) {
    %c0_i32 = arith.constant 0 : i32
    %c0_i32_0 = arith.constant 0 : i32
    %c0_i32_1 = arith.constant 0 : i32
    %c0_i32_2 = arith.constant 0 : i32
    return %arg0, %c0_i32, %c0_i32_0, %c0_i32_1 : i32, i32, i32, i32
  }
  func.func @transform_1(%arg0: i32) -> (i32, i32, i32, i32) {
    %c0_i32 = arith.constant 0 : i32
    %c0_i32_0 = arith.constant 0 : i32
    %c0_i32_1 = arith.constant 0 : i32
    %c0_i32_2 = arith.constant 0 : i32
    return %arg0, %c0_i32, %c0_i32_0, %c0_i32_1 : i32, i32, i32, i32
  }
  func.func @transform_2(%arg0: i32) -> (i32, i32, i32, i32) {
    %c0_i32 = arith.constant 0 : i32
    %c0_i32_0 = arith.constant 0 : i32
    %c0_i32_1 = arith.constant 0 : i32
    %c0_i32_2 = arith.constant 0 : i32
    return %arg0, %c0_i32, %c0_i32_0, %c0_i32_1 : i32, i32, i32, i32
  }
  func.func @transform_3(%arg0: i32) -> (i32, i32) {
    %c0_i32 = arith.constant 0 : i32
    %c0_i32_0 = arith.constant 0 : i32
    %c0_i32_1 = arith.constant 0 : i32
    return %c0_i32, %c0_i32_0 : i32, i32
  }
  func.func @transform_4(%arg0: i32) -> (i32, i32, i32, i32) {
    %c0_i32 = arith.constant 0 : i32
    %c0_i32_0 = arith.constant 0 : i32
    %c0_i32_1 = arith.constant 0 : i32
    %c0_i32_2 = arith.constant 0 : i32
    return %arg0, %c0_i32, %c0_i32_0, %c0_i32_1 : i32, i32, i32, i32
  }
}

module attributes {stable_mosaic.version = 11 : i64} {
  func.func @_add_ln_kernel(%arg0: i32, %arg1: memref<32x128xf32, #tpu.memory_space<vmem>>, %arg2: memref<32x128xf32, #tpu.memory_space<vmem>>, %arg3: memref<1x128xf32, #tpu.memory_space<vmem>>, %arg4: memref<1x128xf32, #tpu.memory_space<vmem>>, %arg5: memref<32x128xf32, #tpu.memory_space<vmem>>) attributes {dimension_semantics = [#tpu.dimension_semantics<parallel>], iteration_bounds = array<i64: 1>, scalar_prefetch = 0 : i64, scratch_operands = 0 : i64, tpu.core_type = #tpu.core_type<tc>, window_params = [{transform_indices = @transform_0, window_bounds = array<i64: 32, 128>}, {transform_indices = @transform_1, window_bounds = array<i64: 32, 128>}, {pipeline_mode = #tpu.pipeline_mode<synchronous>, transform_indices = @transform_2, window_bounds = array<i64: 1, 128>}, {pipeline_mode = #tpu.pipeline_mode<synchronous>, transform_indices = @transform_3, window_bounds = array<i64: 1, 128>}, {transform_indices = @transform_4, window_bounds = array<i64: 32, 128>}]} {
    %c0 = arith.constant 0 : index
    %c0_0 = arith.constant 0 : index
    %0 = vector.load %arg1[%c0, %c0_0] : memref<32x128xf32, #tpu.memory_space<vmem>>, vector<32x128xf32>
    %c0_1 = arith.constant 0 : index
    %c0_2 = arith.constant 0 : index
    %1 = vector.load %arg2[%c0_1, %c0_2] : memref<32x128xf32, #tpu.memory_space<vmem>>, vector<32x128xf32>
    %2 = arith.addf %0, %1 : vector<32x128xf32>
    %cst = arith.constant dense<0.000000e+00> : vector<32xf32>
    %3 = vector.multi_reduction <add>, %2, %cst [1] : vector<32x128xf32> to vector<32xf32>
    %4 = vector.shape_cast %3 : vector<32xf32> to vector<32x1xf32>
    %cst_3 = arith.constant 7.812500e-03 : f32
    %5 = vector.broadcast %cst_3 : f32 to vector<32x1xf32>
    %6 = arith.mulf %4, %5 : vector<32x1xf32>
    %7 = arith.mulf %2, %2 : vector<32x128xf32>
    %cst_4 = arith.constant dense<0.000000e+00> : vector<32xf32>
    %8 = vector.multi_reduction <add>, %7, %cst_4 [1] : vector<32x128xf32> to vector<32xf32>
    %9 = vector.shape_cast %8 : vector<32xf32> to vector<32x1xf32>
    %cst_5 = arith.constant 7.812500e-03 : f32
    %10 = vector.broadcast %cst_5 : f32 to vector<32x1xf32>
    %11 = arith.mulf %9, %10 : vector<32x1xf32>
    %12 = arith.mulf %6, %6 : vector<32x1xf32>
    %13 = arith.subf %11, %12 : vector<32x1xf32>
    %14 = vector.broadcast %6 : vector<32x1xf32> to vector<32x128xf32>
    %15 = arith.subf %2, %14 : vector<32x128xf32>
    %cst_6 = arith.constant 9.99999974E-6 : f32
    %16 = vector.broadcast %cst_6 : f32 to vector<32x1xf32>
    %17 = arith.addf %13, %16 : vector<32x1xf32>
    %18 = math.rsqrt %17 : vector<32x1xf32>
    %19 = vector.broadcast %18 : vector<32x1xf32> to vector<32x128xf32>
    %20 = arith.mulf %15, %19 : vector<32x128xf32>
    %c0_7 = arith.constant 0 : index
    %c0_8 = arith.constant 0 : index
    %21 = vector.load %arg3[%c0_7, %c0_8] : memref<1x128xf32, #tpu.memory_space<vmem>>, vector<1x128xf32>
    %22 = vector.broadcast %21 : vector<1x128xf32> to vector<32x128xf32>
    %23 = arith.mulf %20, %22 : vector<32x128xf32>
    %c0_9 = arith.constant 0 : index
    %c0_10 = arith.constant 0 : index
    %24 = vector.load %arg4[%c0_9, %c0_10] : memref<1x128xf32, #tpu.memory_space<vmem>>, vector<1x128xf32>
    %25 = vector.broadcast %24 : vector<1x128xf32> to vector<32x128xf32>
    %26 = arith.addf %23, %25 : vector<32x128xf32>
    %c0_11 = arith.constant 0 : index
    %c0_12 = arith.constant 0 : index
    %27 = vector.load %arg5[%c0_11, %c0_12] : memref<32x128xf32, #tpu.memory_space<vmem>>, vector<32x128xf32>
    tpu.vector_store %arg5[%c0_11, %c0_12], %26 {strides = array<i32>} : memref<32x128xf32, #tpu.memory_space<vmem>>, vector<32x128xf32>,
    return
  }
  func.func @transform_0(%arg0: i32) -> (i32, i32) {
    %c0_i32 = arith.constant 0 : i32
    %c0_i32_0 = arith.constant 0 : i32
    return %arg0, %c0_i32 : i32, i32
  }
  func.func @transform_1(%arg0: i32) -> (i32, i32) {
    %c0_i32 = arith.constant 0 : i32
    %c0_i32_0 = arith.constant 0 : i32
    return %arg0, %c0_i32 : i32, i32
  }
  func.func @transform_2(%arg0: i32) -> (i32, i32) {
    %c0_i32 = arith.constant 0 : i32
    %c0_i32_0 = arith.constant 0 : i32
    %c0_i32_1 = arith.constant 0 : i32
    return %c0_i32, %c0_i32_0 : i32, i32
  }
  func.func @transform_3(%arg0: i32) -> (i32, i32) {
    %c0_i32 = arith.constant 0 : i32
    %c0_i32_0 = arith.constant 0 : i32
    %c0_i32_1 = arith.constant 0 : i32
    return %c0_i32, %c0_i32_0 : i32, i32
  }
  func.func @transform_4(%arg0: i32) -> (i32, i32) {
    %c0_i32 = arith.constant 0 : i32
    %c0_i32_0 = arith.constant 0 : i32
    return %arg0, %c0_i32 : i32, i32
  }
}

module attributes {stable_mosaic.version = 11 : i64} {
  func.func @_ffn_addnorm_kernel(%arg0: i32, %arg1: memref<32x128xf32, #tpu.memory_space<vmem>>, %arg2: memref<128x256xf32, #tpu.memory_space<vmem>>, %arg3: memref<1x256xf32, #tpu.memory_space<vmem>>, %arg4: memref<256x128xf32, #tpu.memory_space<vmem>>, %arg5: memref<1x128xf32, #tpu.memory_space<vmem>>, %arg6: memref<1x128xf32, #tpu.memory_space<vmem>>, %arg7: memref<1x128xf32, #tpu.memory_space<vmem>>, %arg8: memref<32x128xf32, #tpu.memory_space<vmem>>) attributes {dimension_semantics = [#tpu.dimension_semantics<parallel>], iteration_bounds = array<i64: 1>, scalar_prefetch = 0 : i64, scratch_operands = 0 : i64, tpu.core_type = #tpu.core_type<tc>, window_params = [{transform_indices = @transform_0, window_bounds = array<i64: 32, 128>}, {pipeline_mode = #tpu.pipeline_mode<synchronous>, transform_indices = @transform_1, window_bounds = array<i64: 128, 256>}, {pipeline_mode = #tpu.pipeline_mode<synchronous>, transform_indices = @transform_2, window_bounds = array<i64: 1, 256>}, {pipeline_mode = #tpu.pipeline_mode<synchronous>, transform_indices = @transform_3, window_bounds = array<i64: 256, 128>}, {pipeline_mode = #tpu.pipeline_mode<synchronous>, transform_indices = @transform_4, window_bounds = array<i64: 1, 128>}, {pipeline_mode = #tpu.pipeline_mode<synchronous>, transform_indices = @transform_5, window_bounds = array<i64: 1, 128>}, {pipeline_mode = #tpu.pipeline_mode<synchronous>, transform_indices = @transform_6, window_bounds = array<i64: 1, 128>}, {transform_indices = @transform_7, window_bounds = array<i64: 32, 128>}]} {
    %c0 = arith.constant 0 : index
    %c0_0 = arith.constant 0 : index
    %0 = vector.load %arg1[%c0, %c0_0] : memref<32x128xf32, #tpu.memory_space<vmem>>, vector<32x128xf32>
    %c0_1 = arith.constant 0 : index
    %c0_2 = arith.constant 0 : index
    %1 = vector.load %arg2[%c0_1, %c0_2] : memref<128x256xf32, #tpu.memory_space<vmem>>, vector<128x256xf32>
    %cst = arith.constant dense<0.000000e+00> : vector<32x256xf32>
    %2 = tpu.matmul %0, %1, %cst {dimension_numbers = #tpu.dot_dimension_numbers<[1], [0], [0], [1], [0, 0, 1, 1], [], []>} : vector<32x128xf32>, vector<128x256xf32>, vector<32x256xf32> -> vector<32x256xf32>
    %c0_3 = arith.constant 0 : index
    %c0_4 = arith.constant 0 : index
    %3 = vector.load %arg3[%c0_3, %c0_4] : memref<1x256xf32, #tpu.memory_space<vmem>>, vector<1x256xf32>
    %4 = vector.broadcast %3 : vector<1x256xf32> to vector<32x256xf32>
    %5 = arith.addf %2, %4 : vector<32x256xf32>
    %cst_5 = arith.constant 0.000000e+00 : f32
    %6 = vector.broadcast %cst_5 : f32 to vector<32x256xf32>
    %7 = arith.maximumf %5, %6 : vector<32x256xf32>
    %c0_6 = arith.constant 0 : index
    %c0_7 = arith.constant 0 : index
    %8 = vector.load %arg4[%c0_6, %c0_7] : memref<256x128xf32, #tpu.memory_space<vmem>>, vector<256x128xf32>
    %cst_8 = arith.constant dense<0.000000e+00> : vector<32x128xf32>
    %9 = tpu.matmul %7, %8, %cst_8 {dimension_numbers = #tpu.dot_dimension_numbers<[1], [0], [0], [1], [0, 0, 1, 1], [], []>} : vector<32x256xf32>, vector<256x128xf32>, vector<32x128xf32> -> vector<32x128xf32>
    %c0_9 = arith.constant 0 : index
    %c0_10 = arith.constant 0 : index
    %10 = vector.load %arg5[%c0_9, %c0_10] : memref<1x128xf32, #tpu.memory_space<vmem>>, vector<1x128xf32>
    %11 = vector.broadcast %10 : vector<1x128xf32> to vector<32x128xf32>
    %12 = arith.addf %9, %11 : vector<32x128xf32>
    %13 = arith.addf %0, %12 : vector<32x128xf32>
    %cst_11 = arith.constant dense<0.000000e+00> : vector<32xf32>
    %14 = vector.multi_reduction <add>, %13, %cst_11 [1] : vector<32x128xf32> to vector<32xf32>
    %15 = vector.shape_cast %14 : vector<32xf32> to vector<32x1xf32>
    %cst_12 = arith.constant 7.812500e-03 : f32
    %16 = vector.broadcast %cst_12 : f32 to vector<32x1xf32>
    %17 = arith.mulf %15, %16 : vector<32x1xf32>
    %18 = arith.mulf %13, %13 : vector<32x128xf32>
    %cst_13 = arith.constant dense<0.000000e+00> : vector<32xf32>
    %19 = vector.multi_reduction <add>, %18, %cst_13 [1] : vector<32x128xf32> to vector<32xf32>
    %20 = vector.shape_cast %19 : vector<32xf32> to vector<32x1xf32>
    %cst_14 = arith.constant 7.812500e-03 : f32
    %21 = vector.broadcast %cst_14 : f32 to vector<32x1xf32>
    %22 = arith.mulf %20, %21 : vector<32x1xf32>
    %23 = arith.mulf %17, %17 : vector<32x1xf32>
    %24 = arith.subf %22, %23 : vector<32x1xf32>
    %25 = vector.broadcast %17 : vector<32x1xf32> to vector<32x128xf32>
    %26 = arith.subf %13, %25 : vector<32x128xf32>
    %cst_15 = arith.constant 9.99999974E-6 : f32
    %27 = vector.broadcast %cst_15 : f32 to vector<32x1xf32>
    %28 = arith.addf %24, %27 : vector<32x1xf32>
    %29 = math.rsqrt %28 : vector<32x1xf32>
    %30 = vector.broadcast %29 : vector<32x1xf32> to vector<32x128xf32>
    %31 = arith.mulf %26, %30 : vector<32x128xf32>
    %c0_16 = arith.constant 0 : index
    %c0_17 = arith.constant 0 : index
    %32 = vector.load %arg6[%c0_16, %c0_17] : memref<1x128xf32, #tpu.memory_space<vmem>>, vector<1x128xf32>
    %33 = vector.broadcast %32 : vector<1x128xf32> to vector<32x128xf32>
    %34 = arith.mulf %31, %33 : vector<32x128xf32>
    %c0_18 = arith.constant 0 : index
    %c0_19 = arith.constant 0 : index
    %35 = vector.load %arg7[%c0_18, %c0_19] : memref<1x128xf32, #tpu.memory_space<vmem>>, vector<1x128xf32>
    %36 = vector.broadcast %35 : vector<1x128xf32> to vector<32x128xf32>
    %37 = arith.addf %34, %36 : vector<32x128xf32>
    %c0_20 = arith.constant 0 : index
    %c0_21 = arith.constant 0 : index
    %38 = vector.load %arg8[%c0_20, %c0_21] : memref<32x128xf32, #tpu.memory_space<vmem>>, vector<32x128xf32>
    tpu.vector_store %arg8[%c0_20, %c0_21], %37 {strides = array<i32>} : memref<32x128xf32, #tpu.memory_space<vmem>>, vector<32x128xf32>,
    return
  }
  func.func @transform_0(%arg0: i32) -> (i32, i32) {
    %c0_i32 = arith.constant 0 : i32
    %c0_i32_0 = arith.constant 0 : i32
    return %arg0, %c0_i32 : i32, i32
  }
  func.func @transform_1(%arg0: i32) -> (i32, i32) {
    %c0_i32 = arith.constant 0 : i32
    %c0_i32_0 = arith.constant 0 : i32
    %c0_i32_1 = arith.constant 0 : i32
    return %c0_i32, %c0_i32_0 : i32, i32
  }
  func.func @transform_2(%arg0: i32) -> (i32, i32) {
    %c0_i32 = arith.constant 0 : i32
    %c0_i32_0 = arith.constant 0 : i32
    %c0_i32_1 = arith.constant 0 : i32
    return %c0_i32, %c0_i32_0 : i32, i32
  }
  func.func @transform_3(%arg0: i32) -> (i32, i32) {
    %c0_i32 = arith.constant 0 : i32
    %c0_i32_0 = arith.constant 0 : i32
    %c0_i32_1 = arith.constant 0 : i32
    return %c0_i32, %c0_i32_0 : i32, i32
  }
  func.func @transform_4(%arg0: i32) -> (i32, i32) {
    %c0_i32 = arith.constant 0 : i32
    %c0_i32_0 = arith.constant 0 : i32
    %c0_i32_1 = arith.constant 0 : i32
    return %c0_i32, %c0_i32_0 : i32, i32
  }
  func.func @transform_5(%arg0: i32) -> (i32, i32) {
    %c0_i32 = arith.constant 0 : i32
    %c0_i32_0 = arith.constant 0 : i32
    %c0_i32_1 = arith.constant 0 : i32
    return %c0_i32, %c0_i32_0 : i32, i32
  }
  func.func @transform_6(%arg0: i32) -> (i32, i32) {
    %c0_i32 = arith.constant 0 : i32
    %c0_i32_0 = arith.constant 0 : i32
    %c0_i32_1 = arith.constant 0 : i32
    return %c0_i32, %c0_i32_0 : i32, i32
  }
  func.func @transform_7(%arg0: i32) -> (i32, i32) {
    %c0_i32 = arith.constant 0 : i32
    %c0_i32_0 = arith.constant 0 : i32
    return %arg0, %c0_i32 : i32, i32
  }
}

module attributes {stable_mosaic.version = 11 : i64} {
  func.func @_linear_kernel(%arg0: i32, %arg1: memref<16x128xf32, #tpu.memory_space<vmem>>, %arg2: memref<128x128xf32, #tpu.memory_space<vmem>>, %arg3: memref<1x128xf32, #tpu.memory_space<vmem>>, %arg4: memref<16x128xf32, #tpu.memory_space<vmem>>) attributes {dimension_semantics = [#tpu.dimension_semantics<parallel>], iteration_bounds = array<i64: 1>, scalar_prefetch = 0 : i64, scratch_operands = 0 : i64, tpu.core_type = #tpu.core_type<tc>, window_params = [{transform_indices = @transform_0, window_bounds = array<i64: 16, 128>}, {pipeline_mode = #tpu.pipeline_mode<synchronous>, transform_indices = @transform_1, window_bounds = array<i64: 128, 128>}, {pipeline_mode = #tpu.pipeline_mode<synchronous>, transform_indices = @transform_2, window_bounds = array<i64: 1, 128>}, {transform_indices = @transform_3, window_bounds = array<i64: 16, 128>}]} {
    %c0 = arith.constant 0 : index
    %c0_0 = arith.constant 0 : index
    %0 = vector.load %arg1[%c0, %c0_0] : memref<16x128xf32, #tpu.memory_space<vmem>>, vector<16x128xf32>
    %c0_1 = arith.constant 0 : index
    %c0_2 = arith.constant 0 : index
    %1 = vector.load %arg2[%c0_1, %c0_2] : memref<128x128xf32, #tpu.memory_space<vmem>>, vector<128x128xf32>
    %cst = arith.constant dense<0.000000e+00> : vector<16x128xf32>
    %2 = tpu.matmul %0, %1, %cst {dimension_numbers = #tpu.dot_dimension_numbers<[1], [0], [0], [1], [0, 0, 1, 1], [], []>} : vector<16x128xf32>, vector<128x128xf32>, vector<16x128xf32> -> vector<16x128xf32>
    %c0_3 = arith.constant 0 : index
    %c0_4 = arith.constant 0 : index
    %3 = vector.load %arg3[%c0_3, %c0_4] : memref<1x128xf32, #tpu.memory_space<vmem>>, vector<1x128xf32>
    %4 = vector.broadcast %3 : vector<1x128xf32> to vector<16x128xf32>
    %5 = arith.addf %2, %4 : vector<16x128xf32>
    %c0_5 = arith.constant 0 : index
    %c0_6 = arith.constant 0 : index
    %6 = vector.load %arg4[%c0_5, %c0_6] : memref<16x128xf32, #tpu.memory_space<vmem>>, vector<16x128xf32>
    tpu.vector_store %arg4[%c0_5, %c0_6], %5 {strides = array<i32>} : memref<16x128xf32, #tpu.memory_space<vmem>>, vector<16x128xf32>,
    return
  }
  func.func @transform_0(%arg0: i32) -> (i32, i32) {
    %c0_i32 = arith.constant 0 : i32
    %c0_i32_0 = arith.constant 0 : i32
    return %arg0, %c0_i32 : i32, i32
  }
  func.func @transform_1(%arg0: i32) -> (i32, i32) {
    %c0_i32 = arith.constant 0 : i32
    %c0_i32_0 = arith.constant 0 : i32
    %c0_i32_1 = arith.constant 0 : i32
    return %c0_i32, %c0_i32_0 : i32, i32
  }
  func.func @transform_2(%arg0: i32) -> (i32, i32) {
    %c0_i32 = arith.constant 0 : i32
    %c0_i32_0 = arith.constant 0 : i32
    %c0_i32_1 = arith.constant 0 : i32
    return %c0_i32, %c0_i32_0 : i32, i32
  }
  func.func @transform_3(%arg0: i32) -> (i32, i32) {
    %c0_i32 = arith.constant 0 : i32
    %c0_i32_0 = arith.constant 0 : i32
    return %arg0, %c0_i32 : i32, i32
  }
}

module attributes {stable_mosaic.version = 11 : i64} {
  func.func @_mha_core_kernel(%arg0: i32, %arg1: memref<1x4x8x32xf32, #tpu.memory_space<vmem>>, %arg2: memref<1x4x8x32xf32, #tpu.memory_space<vmem>>, %arg3: memref<1x4x8x32xf32, #tpu.memory_space<vmem>>, %arg4: memref<8x8xf32, #tpu.memory_space<vmem>>, %arg5: memref<1x4x8x32xf32, #tpu.memory_space<vmem>>) attributes {dimension_semantics = [#tpu.dimension_semantics<parallel>], iteration_bounds = array<i64: 2>, scalar_prefetch = 0 : i64, scratch_operands = 0 : i64, tpu.core_type = #tpu.core_type<tc>, window_params = [{transform_indices = @transform_0, window_bounds = array<i64: 1, 4, 8, 32>}, {transform_indices = @transform_1, window_bounds = array<i64: 1, 4, 8, 32>}, {transform_indices = @transform_2, window_bounds = array<i64: 1, 4, 8, 32>}, {pipeline_mode = #tpu.pipeline_mode<synchronous>, transform_indices = @transform_3, window_bounds = array<i64: 8, 8>}, {transform_indices = @transform_4, window_bounds = array<i64: 1, 4, 8, 32>}]} {
    %c0 = arith.constant 0 : index
    %c0_0 = arith.constant 0 : index
    %c0_1 = arith.constant 0 : index
    %c0_2 = arith.constant 0 : index
    %0 = vector.load %arg1[%c0, %c0_0, %c0_1, %c0_2] : memref<1x4x8x32xf32, #tpu.memory_space<vmem>>, vector<1x4x8x32xf32>
    %1 = vector.shape_cast %0 : vector<1x4x8x32xf32> to vector<4x8x32xf32>
    %c0_3 = arith.constant 0 : index
    %c0_4 = arith.constant 0 : index
    %c0_5 = arith.constant 0 : index
    %c0_6 = arith.constant 0 : index
    %2 = vector.load %arg2[%c0_3, %c0_4, %c0_5, %c0_6] : memref<1x4x8x32xf32, #tpu.memory_space<vmem>>, vector<1x4x8x32xf32>
    %3 = vector.shape_cast %2 : vector<1x4x8x32xf32> to vector<4x8x32xf32>
    %c0_7 = arith.constant 0 : index
    %c0_8 = arith.constant 0 : index
    %c0_9 = arith.constant 0 : index
    %c0_10 = arith.constant 0 : index
    %4 = vector.load %arg3[%c0_7, %c0_8, %c0_9, %c0_10] : memref<1x4x8x32xf32, #tpu.memory_space<vmem>>, vector<1x4x8x32xf32>
    %5 = vector.shape_cast %4 : vector<1x4x8x32xf32> to vector<4x8x32xf32>
    "tpu.trace_start"() <{level = 10 : i32, message = "hqd,hkd->hqk"}> : () -> ()
    %cst = arith.constant dense<0.000000e+00> : vector<4x8x8xf32>
    %6 = tpu.matmul %1, %3, %cst {dimension_numbers = #tpu.dot_dimension_numbers<[2], [2], [1], [1], [0, 0, 0, 1, 1, 1], [0], [0]>} : vector<4x8x32xf32>, vector<4x8x32xf32>, vector<4x8x8xf32> -> vector<4x8x8xf32>
    "tpu.trace_stop"() : () -> ()
    %cst_11 = arith.constant 0.176776692 : f32
    %7 = vector.broadcast %cst_11 : f32 to vector<4x8x8xf32>
    %8 = arith.mulf %6, %7 : vector<4x8x8xf32>
    %c0_12 = arith.constant 0 : index
    %c0_13 = arith.constant 0 : index
    %9 = vector.load %arg4[%c0_12, %c0_13] : memref<8x8xf32, #tpu.memory_space<vmem>>, vector<8x8xf32>
    %10 = vector.shape_cast %9 : vector<8x8xf32> to vector<1x8x8xf32>
    %11 = vector.broadcast %10 : vector<1x8x8xf32> to vector<4x8x8xf32>
    %12 = arith.addf %8, %11 : vector<4x8x8xf32>
    %cst_14 = arith.constant dense<0xFF800000> : vector<4x8xf32>
    %13 = vector.multi_reduction <maximumf>, %12, %cst_14 [2] : vector<4x8x8xf32> to vector<4x8xf32>
    %14 = vector.shape_cast %13 : vector<4x8xf32> to vector<4x8x1xf32>
    %15 = vector.broadcast %14 : vector<4x8x1xf32> to vector<4x8x8xf32>
    %16 = arith.subf %12, %15 : vector<4x8x8xf32>
    %17 = math.exp %16 : vector<4x8x8xf32>
    %cst_15 = arith.constant dense<0.000000e+00> : vector<4x8xf32>
    %18 = vector.multi_reduction <add>, %17, %cst_15 [2] : vector<4x8x8xf32> to vector<4x8xf32>
    %19 = vector.shape_cast %18 : vector<4x8xf32> to vector<4x8x1xf32>
    %20 = vector.broadcast %19 : vector<4x8x1xf32> to vector<4x8x8xf32>
    %21 = arith.divf %17, %20 : vector<4x8x8xf32>
    "tpu.trace_start"() <{level = 10 : i32, message = "hqk,hkd->hqd"}> : () -> ()
    %cst_16 = arith.constant dense<0.000000e+00> : vector<4x8x32xf32>
    %22 = tpu.matmul %21, %5, %cst_16 {dimension_numbers = #tpu.dot_dimension_numbers<[2], [1], [1], [2], [0, 0, 0, 1, 1, 2], [0], [0]>} : vector<4x8x8xf32>, vector<4x8x32xf32>, vector<4x8x32xf32> -> vector<4x8x32xf32>
    "tpu.trace_stop"() : () -> ()
    %c0_17 = arith.constant 0 : index
    %c0_18 = arith.constant 0 : index
    %c0_19 = arith.constant 0 : index
    %c0_20 = arith.constant 0 : index
    %23 = vector.load %arg5[%c0_17, %c0_18, %c0_19, %c0_20] : memref<1x4x8x32xf32, #tpu.memory_space<vmem>>, vector<1x4x8x32xf32>
    %24 = vector.shape_cast %23 : vector<1x4x8x32xf32> to vector<4x8x32xf32>
    %25 = vector.shape_cast %22 : vector<4x8x32xf32> to vector<1x4x8x32xf32>
    tpu.vector_store %arg5[%c0_17, %c0_18, %c0_19, %c0_20], %25 {strides = array<i32>} : memref<1x4x8x32xf32, #tpu.memory_space<vmem>>, vector<1x4x8x32xf32>,
    return
  }
  func.func @transform_0(%arg0: i32) -> (i32, i32, i32, i32) {
    %c0_i32 = arith.constant 0 : i32
    %c0_i32_0 = arith.constant 0 : i32
    %c0_i32_1 = arith.constant 0 : i32
    %c0_i32_2 = arith.constant 0 : i32
    return %arg0, %c0_i32, %c0_i32_0, %c0_i32_1 : i32, i32, i32, i32
  }
  func.func @transform_1(%arg0: i32) -> (i32, i32, i32, i32) {
    %c0_i32 = arith.constant 0 : i32
    %c0_i32_0 = arith.constant 0 : i32
    %c0_i32_1 = arith.constant 0 : i32
    %c0_i32_2 = arith.constant 0 : i32
    return %arg0, %c0_i32, %c0_i32_0, %c0_i32_1 : i32, i32, i32, i32
  }
  func.func @transform_2(%arg0: i32) -> (i32, i32, i32, i32) {
    %c0_i32 = arith.constant 0 : i32
    %c0_i32_0 = arith.constant 0 : i32
    %c0_i32_1 = arith.constant 0 : i32
    %c0_i32_2 = arith.constant 0 : i32
    return %arg0, %c0_i32, %c0_i32_0, %c0_i32_1 : i32, i32, i32, i32
  }
  func.func @transform_3(%arg0: i32) -> (i32, i32) {
    %c0_i32 = arith.constant 0 : i32
    %c0_i32_0 = arith.constant 0 : i32
    %c0_i32_1 = arith.constant 0 : i32
    return %c0_i32, %c0_i32_0 : i32, i32
  }
  func.func @transform_4(%arg0: i32) -> (i32, i32, i32, i32) {
    %c0_i32 = arith.constant 0 : i32
    %c0_i32_0 = arith.constant 0 : i32
    %c0_i32_1 = arith.constant 0 : i32
    %c0_i32_2 = arith.constant 0 : i32
    return %arg0, %c0_i32, %c0_i32_0, %c0_i32_1 : i32, i32, i32, i32
  }
}

module attributes {stable_mosaic.version = 11 : i64} {
  func.func @_add_ln_kernel(%arg0: i32, %arg1: memref<16x128xf32, #tpu.memory_space<vmem>>, %arg2: memref<16x128xf32, #tpu.memory_space<vmem>>, %arg3: memref<1x128xf32, #tpu.memory_space<vmem>>, %arg4: memref<1x128xf32, #tpu.memory_space<vmem>>, %arg5: memref<16x128xf32, #tpu.memory_space<vmem>>) attributes {dimension_semantics = [#tpu.dimension_semantics<parallel>], iteration_bounds = array<i64: 1>, scalar_prefetch = 0 : i64, scratch_operands = 0 : i64, tpu.core_type = #tpu.core_type<tc>, window_params = [{transform_indices = @transform_0, window_bounds = array<i64: 16, 128>}, {transform_indices = @transform_1, window_bounds = array<i64: 16, 128>}, {pipeline_mode = #tpu.pipeline_mode<synchronous>, transform_indices = @transform_2, window_bounds = array<i64: 1, 128>}, {pipeline_mode = #tpu.pipeline_mode<synchronous>, transform_indices = @transform_3, window_bounds = array<i64: 1, 128>}, {transform_indices = @transform_4, window_bounds = array<i64: 16, 128>}]} {
    %c0 = arith.constant 0 : index
    %c0_0 = arith.constant 0 : index
    %0 = vector.load %arg1[%c0, %c0_0] : memref<16x128xf32, #tpu.memory_space<vmem>>, vector<16x128xf32>
    %c0_1 = arith.constant 0 : index
    %c0_2 = arith.constant 0 : index
    %1 = vector.load %arg2[%c0_1, %c0_2] : memref<16x128xf32, #tpu.memory_space<vmem>>, vector<16x128xf32>
    %2 = arith.addf %0, %1 : vector<16x128xf32>
    %cst = arith.constant dense<0.000000e+00> : vector<16xf32>
    %3 = vector.multi_reduction <add>, %2, %cst [1] : vector<16x128xf32> to vector<16xf32>
    %4 = vector.shape_cast %3 : vector<16xf32> to vector<16x1xf32>
    %cst_3 = arith.constant 7.812500e-03 : f32
    %5 = vector.broadcast %cst_3 : f32 to vector<16x1xf32>
    %6 = arith.mulf %4, %5 : vector<16x1xf32>
    %7 = arith.mulf %2, %2 : vector<16x128xf32>
    %cst_4 = arith.constant dense<0.000000e+00> : vector<16xf32>
    %8 = vector.multi_reduction <add>, %7, %cst_4 [1] : vector<16x128xf32> to vector<16xf32>
    %9 = vector.shape_cast %8 : vector<16xf32> to vector<16x1xf32>
    %cst_5 = arith.constant 7.812500e-03 : f32
    %10 = vector.broadcast %cst_5 : f32 to vector<16x1xf32>
    %11 = arith.mulf %9, %10 : vector<16x1xf32>
    %12 = arith.mulf %6, %6 : vector<16x1xf32>
    %13 = arith.subf %11, %12 : vector<16x1xf32>
    %14 = vector.broadcast %6 : vector<16x1xf32> to vector<16x128xf32>
    %15 = arith.subf %2, %14 : vector<16x128xf32>
    %cst_6 = arith.constant 9.99999974E-6 : f32
    %16 = vector.broadcast %cst_6 : f32 to vector<16x1xf32>
    %17 = arith.addf %13, %16 : vector<16x1xf32>
    %18 = math.rsqrt %17 : vector<16x1xf32>
    %19 = vector.broadcast %18 : vector<16x1xf32> to vector<16x128xf32>
    %20 = arith.mulf %15, %19 : vector<16x128xf32>
    %c0_7 = arith.constant 0 : index
    %c0_8 = arith.constant 0 : index
    %21 = vector.load %arg3[%c0_7, %c0_8] : memref<1x128xf32, #tpu.memory_space<vmem>>, vector<1x128xf32>
    %22 = vector.broadcast %21 : vector<1x128xf32> to vector<16x128xf32>
    %23 = arith.mulf %20, %22 : vector<16x128xf32>
    %c0_9 = arith.constant 0 : index
    %c0_10 = arith.constant 0 : index
    %24 = vector.load %arg4[%c0_9, %c0_10] : memref<1x128xf32, #tpu.memory_space<vmem>>, vector<1x128xf32>
    %25 = vector.broadcast %24 : vector<1x128xf32> to vector<16x128xf32>
    %26 = arith.addf %23, %25 : vector<16x128xf32>
    %c0_11 = arith.constant 0 : index
    %c0_12 = arith.constant 0 : index
    %27 = vector.load %arg5[%c0_11, %c0_12] : memref<16x128xf32, #tpu.memory_space<vmem>>, vector<16x128xf32>
    tpu.vector_store %arg5[%c0_11, %c0_12], %26 {strides = array<i32>} : memref<16x128xf32, #tpu.memory_space<vmem>>, vector<16x128xf32>,
    return
  }
  func.func @transform_0(%arg0: i32) -> (i32, i32) {
    %c0_i32 = arith.constant 0 : i32
    %c0_i32_0 = arith.constant 0 : i32
    return %arg0, %c0_i32 : i32, i32
  }
  func.func @transform_1(%arg0: i32) -> (i32, i32) {
    %c0_i32 = arith.constant 0 : i32
    %c0_i32_0 = arith.constant 0 : i32
    return %arg0, %c0_i32 : i32, i32
  }
  func.func @transform_2(%arg0: i32) -> (i32, i32) {
    %c0_i32 = arith.constant 0 : i32
    %c0_i32_0 = arith.constant 0 : i32
    %c0_i32_1 = arith.constant 0 : i32
    return %c0_i32, %c0_i32_0 : i32, i32
  }
  func.func @transform_3(%arg0: i32) -> (i32, i32) {
    %c0_i32 = arith.constant 0 : i32
    %c0_i32_0 = arith.constant 0 : i32
    %c0_i32_1 = arith.constant 0 : i32
    return %c0_i32, %c0_i32_0 : i32, i32
  }
  func.func @transform_4(%arg0: i32) -> (i32, i32) {
    %c0_i32 = arith.constant 0 : i32
    %c0_i32_0 = arith.constant 0 : i32
    return %arg0, %c0_i32 : i32, i32
  }
}

module attributes {stable_mosaic.version = 11 : i64} {
  func.func @_ffn_addnorm_kernel(%arg0: i32, %arg1: memref<16x128xf32, #tpu.memory_space<vmem>>, %arg2: memref<128x256xf32, #tpu.memory_space<vmem>>, %arg3: memref<1x256xf32, #tpu.memory_space<vmem>>, %arg4: memref<256x128xf32, #tpu.memory_space<vmem>>, %arg5: memref<1x128xf32, #tpu.memory_space<vmem>>, %arg6: memref<1x128xf32, #tpu.memory_space<vmem>>, %arg7: memref<1x128xf32, #tpu.memory_space<vmem>>, %arg8: memref<16x128xf32, #tpu.memory_space<vmem>>) attributes {dimension_semantics = [#tpu.dimension_semantics<parallel>], iteration_bounds = array<i64: 1>, scalar_prefetch = 0 : i64, scratch_operands = 0 : i64, tpu.core_type = #tpu.core_type<tc>, window_params = [{transform_indices = @transform_0, window_bounds = array<i64: 16, 128>}, {pipeline_mode = #tpu.pipeline_mode<synchronous>, transform_indices = @transform_1, window_bounds = array<i64: 128, 256>}, {pipeline_mode = #tpu.pipeline_mode<synchronous>, transform_indices = @transform_2, window_bounds = array<i64: 1, 256>}, {pipeline_mode = #tpu.pipeline_mode<synchronous>, transform_indices = @transform_3, window_bounds = array<i64: 256, 128>}, {pipeline_mode = #tpu.pipeline_mode<synchronous>, transform_indices = @transform_4, window_bounds = array<i64: 1, 128>}, {pipeline_mode = #tpu.pipeline_mode<synchronous>, transform_indices = @transform_5, window_bounds = array<i64: 1, 128>}, {pipeline_mode = #tpu.pipeline_mode<synchronous>, transform_indices = @transform_6, window_bounds = array<i64: 1, 128>}, {transform_indices = @transform_7, window_bounds = array<i64: 16, 128>}]} {
    %c0 = arith.constant 0 : index
    %c0_0 = arith.constant 0 : index
    %0 = vector.load %arg1[%c0, %c0_0] : memref<16x128xf32, #tpu.memory_space<vmem>>, vector<16x128xf32>
    %c0_1 = arith.constant 0 : index
    %c0_2 = arith.constant 0 : index
    %1 = vector.load %arg2[%c0_1, %c0_2] : memref<128x256xf32, #tpu.memory_space<vmem>>, vector<128x256xf32>
    %cst = arith.constant dense<0.000000e+00> : vector<16x256xf32>
    %2 = tpu.matmul %0, %1, %cst {dimension_numbers = #tpu.dot_dimension_numbers<[1], [0], [0], [1], [0, 0, 1, 1], [], []>} : vector<16x128xf32>, vector<128x256xf32>, vector<16x256xf32> -> vector<16x256xf32>
    %c0_3 = arith.constant 0 : index
    %c0_4 = arith.constant 0 : index
    %3 = vector.load %arg3[%c0_3, %c0_4] : memref<1x256xf32, #tpu.memory_space<vmem>>, vector<1x256xf32>
    %4 = vector.broadcast %3 : vector<1x256xf32> to vector<16x256xf32>
    %5 = arith.addf %2, %4 : vector<16x256xf32>
    %cst_5 = arith.constant 0.000000e+00 : f32
    %6 = vector.broadcast %cst_5 : f32 to vector<16x256xf32>
    %7 = arith.maximumf %5, %6 : vector<16x256xf32>
    %c0_6 = arith.constant 0 : index
    %c0_7 = arith.constant 0 : index
    %8 = vector.load %arg4[%c0_6, %c0_7] : memref<256x128xf32, #tpu.memory_space<vmem>>, vector<256x128xf32>
    %cst_8 = arith.constant dense<0.000000e+00> : vector<16x128xf32>
    %9 = tpu.matmul %7, %8, %cst_8 {dimension_numbers = #tpu.dot_dimension_numbers<[1], [0], [0], [1], [0, 0, 1, 1], [], []>} : vector<16x256xf32>, vector<256x128xf32>, vector<16x128xf32> -> vector<16x128xf32>
    %c0_9 = arith.constant 0 : index
    %c0_10 = arith.constant 0 : index
    %10 = vector.load %arg5[%c0_9, %c0_10] : memref<1x128xf32, #tpu.memory_space<vmem>>, vector<1x128xf32>
    %11 = vector.broadcast %10 : vector<1x128xf32> to vector<16x128xf32>
    %12 = arith.addf %9, %11 : vector<16x128xf32>
    %13 = arith.addf %0, %12 : vector<16x128xf32>
    %cst_11 = arith.constant dense<0.000000e+00> : vector<16xf32>
    %14 = vector.multi_reduction <add>, %13, %cst_11 [1] : vector<16x128xf32> to vector<16xf32>
    %15 = vector.shape_cast %14 : vector<16xf32> to vector<16x1xf32>
    %cst_12 = arith.constant 7.812500e-03 : f32
    %16 = vector.broadcast %cst_12 : f32 to vector<16x1xf32>
    %17 = arith.mulf %15, %16 : vector<16x1xf32>
    %18 = arith.mulf %13, %13 : vector<16x128xf32>
    %cst_13 = arith.constant dense<0.000000e+00> : vector<16xf32>
    %19 = vector.multi_reduction <add>, %18, %cst_13 [1] : vector<16x128xf32> to vector<16xf32>
    %20 = vector.shape_cast %19 : vector<16xf32> to vector<16x1xf32>
    %cst_14 = arith.constant 7.812500e-03 : f32
    %21 = vector.broadcast %cst_14 : f32 to vector<16x1xf32>
    %22 = arith.mulf %20, %21 : vector<16x1xf32>
    %23 = arith.mulf %17, %17 : vector<16x1xf32>
    %24 = arith.subf %22, %23 : vector<16x1xf32>
    %25 = vector.broadcast %17 : vector<16x1xf32> to vector<16x128xf32>
    %26 = arith.subf %13, %25 : vector<16x128xf32>
    %cst_15 = arith.constant 9.99999974E-6 : f32
    %27 = vector.broadcast %cst_15 : f32 to vector<16x1xf32>
    %28 = arith.addf %24, %27 : vector<16x1xf32>
    %29 = math.rsqrt %28 : vector<16x1xf32>
    %30 = vector.broadcast %29 : vector<16x1xf32> to vector<16x128xf32>
    %31 = arith.mulf %26, %30 : vector<16x128xf32>
    %c0_16 = arith.constant 0 : index
    %c0_17 = arith.constant 0 : index
    %32 = vector.load %arg6[%c0_16, %c0_17] : memref<1x128xf32, #tpu.memory_space<vmem>>, vector<1x128xf32>
    %33 = vector.broadcast %32 : vector<1x128xf32> to vector<16x128xf32>
    %34 = arith.mulf %31, %33 : vector<16x128xf32>
    %c0_18 = arith.constant 0 : index
    %c0_19 = arith.constant 0 : index
    %35 = vector.load %arg7[%c0_18, %c0_19] : memref<1x128xf32, #tpu.memory_space<vmem>>, vector<1x128xf32>
    %36 = vector.broadcast %35 : vector<1x128xf32> to vector<16x128xf32>
    %37 = arith.addf %34, %36 : vector<16x128xf32>
    %c0_20 = arith.constant 0 : index
    %c0_21 = arith.constant 0 : index
    %38 = vector.load %arg8[%c0_20, %c0_21] : memref<16x128xf32, #tpu.memory_space<vmem>>, vector<16x128xf32>
    tpu.vector_store %arg8[%c0_20, %c0_21], %37 {strides = array<i32>} : memref<16x128xf32, #tpu.memory_space<vmem>>, vector<16x128xf32>,
    return
  }
  func.func @transform_0(%arg0: i32) -> (i32, i32) {
    %c0_i32 = arith.constant 0 : i32
    %c0_i32_0 = arith.constant 0 : i32
    return %arg0, %c0_i32 : i32, i32
  }
  func.func @transform_1(%arg0: i32) -> (i32, i32) {
    %c0_i32 = arith.constant 0 : i32
    %c0_i32_0 = arith.constant 0 : i32
    %c0_i32_1 = arith.constant 0 : i32
    return %c0_i32, %c0_i32_0 : i32, i32
  }
  func.func @transform_2(%arg0: i32) -> (i32, i32) {
    %c0_i32 = arith.constant 0 : i32
    %c0_i32_0 = arith.constant 0 : i32
    %c0_i32_1 = arith.constant 0 : i32
    return %c0_i32, %c0_i32_0 : i32, i32
  }
  func.func @transform_3(%arg0: i32) -> (i32, i32) {
    %c0_i32 = arith.constant 0 : i32
    %c0_i32_0 = arith.constant 0 : i32
    %c0_i32_1 = arith.constant 0 : i32
    return %c0_i32, %c0_i32_0 : i32, i32
  }
  func.func @transform_4(%arg0: i32) -> (i32, i32) {
    %c0_i32 = arith.constant 0 : i32
    %c0_i32_0 = arith.constant 0 : i32
    %c0_i32_1 = arith.constant 0 : i32
    return %c0_i32, %c0_i32_0 : i32, i32
  }
  func.func @transform_5(%arg0: i32) -> (i32, i32) {
    %c0_i32 = arith.constant 0 : i32
    %c0_i32_0 = arith.constant 0 : i32
    %c0_i32_1 = arith.constant 0 : i32
    return %c0_i32, %c0_i32_0 : i32, i32
  }
  func.func @transform_6(%arg0: i32) -> (i32, i32) {
    %c0_i32 = arith.constant 0 : i32
    %c0_i32_0 = arith.constant 0 : i32
    %c0_i32_1 = arith.constant 0 : i32
    return %c0_i32, %c0_i32_0 : i32, i32
  }
  func.func @transform_7(%arg0: i32) -> (i32, i32) {
    %c0_i32 = arith.constant 0 : i32
    %c0_i32_0 = arith.constant 0 : i32
    return %arg0, %c0_i32 : i32, i32
  }
}

module attributes {stable_mosaic.version = 11 : i64} {
  func.func @_mha_core_kernel(%arg0: i32, %arg1: memref<1x4x8x32xf32, #tpu.memory_space<vmem>>, %arg2: memref<1x4x16x32xf32, #tpu.memory_space<vmem>>, %arg3: memref<1x4x16x32xf32, #tpu.memory_space<vmem>>, %arg4: memref<8x16xf32, #tpu.memory_space<vmem>>, %arg5: memref<1x4x8x32xf32, #tpu.memory_space<vmem>>) attributes {dimension_semantics = [#tpu.dimension_semantics<parallel>], iteration_bounds = array<i64: 2>, scalar_prefetch = 0 : i64, scratch_operands = 0 : i64, tpu.core_type = #tpu.core_type<tc>, window_params = [{transform_indices = @transform_0, window_bounds = array<i64: 1, 4, 8, 32>}, {transform_indices = @transform_1, window_bounds = array<i64: 1, 4, 16, 32>}, {transform_indices = @transform_2, window_bounds = array<i64: 1, 4, 16, 32>}, {pipeline_mode = #tpu.pipeline_mode<synchronous>, transform_indices = @transform_3, window_bounds = array<i64: 8, 16>}, {transform_indices = @transform_4, window_bounds = array<i64: 1, 4, 8, 32>}]} {
    %c0 = arith.constant 0 : index
    %c0_0 = arith.constant 0 : index
    %c0_1 = arith.constant 0 : index
    %c0_2 = arith.constant 0 : index
    %0 = vector.load %arg1[%c0, %c0_0, %c0_1, %c0_2] : memref<1x4x8x32xf32, #tpu.memory_space<vmem>>, vector<1x4x8x32xf32>
    %1 = vector.shape_cast %0 : vector<1x4x8x32xf32> to vector<4x8x32xf32>
    %c0_3 = arith.constant 0 : index
    %c0_4 = arith.constant 0 : index
    %c0_5 = arith.constant 0 : index
    %c0_6 = arith.constant 0 : index
    %2 = vector.load %arg2[%c0_3, %c0_4, %c0_5, %c0_6] : memref<1x4x16x32xf32, #tpu.memory_space<vmem>>, vector<1x4x16x32xf32>
    %3 = vector.shape_cast %2 : vector<1x4x16x32xf32> to vector<4x16x32xf32>
    %c0_7 = arith.constant 0 : index
    %c0_8 = arith.constant 0 : index
    %c0_9 = arith.constant 0 : index
    %c0_10 = arith.constant 0 : index
    %4 = vector.load %arg3[%c0_7, %c0_8, %c0_9, %c0_10] : memref<1x4x16x32xf32, #tpu.memory_space<vmem>>, vector<1x4x16x32xf32>
    %5 = vector.shape_cast %4 : vector<1x4x16x32xf32> to vector<4x16x32xf32>
    "tpu.trace_start"() <{level = 10 : i32, message = "hqd,hkd->hqk"}> : () -> ()
    %cst = arith.constant dense<0.000000e+00> : vector<4x8x16xf32>
    %6 = tpu.matmul %1, %3, %cst {dimension_numbers = #tpu.dot_dimension_numbers<[2], [2], [1], [1], [0, 0, 0, 1, 1, 1], [0], [0]>} : vector<4x8x32xf32>, vector<4x16x32xf32>, vector<4x8x16xf32> -> vector<4x8x16xf32>
    "tpu.trace_stop"() : () -> ()
    %cst_11 = arith.constant 0.176776692 : f32
    %7 = vector.broadcast %cst_11 : f32 to vector<4x8x16xf32>
    %8 = arith.mulf %6, %7 : vector<4x8x16xf32>
    %c0_12 = arith.constant 0 : index
    %c0_13 = arith.constant 0 : index
    %9 = vector.load %arg4[%c0_12, %c0_13] : memref<8x16xf32, #tpu.memory_space<vmem>>, vector<8x16xf32>
    %10 = vector.shape_cast %9 : vector<8x16xf32> to vector<1x8x16xf32>
    %11 = vector.broadcast %10 : vector<1x8x16xf32> to vector<4x8x16xf32>
    %12 = arith.addf %8, %11 : vector<4x8x16xf32>
    %cst_14 = arith.constant dense<0xFF800000> : vector<4x8xf32>
    %13 = vector.multi_reduction <maximumf>, %12, %cst_14 [2] : vector<4x8x16xf32> to vector<4x8xf32>
    %14 = vector.shape_cast %13 : vector<4x8xf32> to vector<4x8x1xf32>
    %15 = vector.broadcast %14 : vector<4x8x1xf32> to vector<4x8x16xf32>
    %16 = arith.subf %12, %15 : vector<4x8x16xf32>
    %17 = math.exp %16 : vector<4x8x16xf32>
    %cst_15 = arith.constant dense<0.000000e+00> : vector<4x8xf32>
    %18 = vector.multi_reduction <add>, %17, %cst_15 [2] : vector<4x8x16xf32> to vector<4x8xf32>
    %19 = vector.shape_cast %18 : vector<4x8xf32> to vector<4x8x1xf32>
    %20 = vector.broadcast %19 : vector<4x8x1xf32> to vector<4x8x16xf32>
    %21 = arith.divf %17, %20 : vector<4x8x16xf32>
    "tpu.trace_start"() <{level = 10 : i32, message = "hqk,hkd->hqd"}> : () -> ()
    %cst_16 = arith.constant dense<0.000000e+00> : vector<4x8x32xf32>
    %22 = tpu.matmul %21, %5, %cst_16 {dimension_numbers = #tpu.dot_dimension_numbers<[2], [1], [1], [2], [0, 0, 0, 1, 1, 2], [0], [0]>} : vector<4x8x16xf32>, vector<4x16x32xf32>, vector<4x8x32xf32> -> vector<4x8x32xf32>
    "tpu.trace_stop"() : () -> ()
    %c0_17 = arith.constant 0 : index
    %c0_18 = arith.constant 0 : index
    %c0_19 = arith.constant 0 : index
    %c0_20 = arith.constant 0 : index
    %23 = vector.load %arg5[%c0_17, %c0_18, %c0_19, %c0_20] : memref<1x4x8x32xf32, #tpu.memory_space<vmem>>, vector<1x4x8x32xf32>
    %24 = vector.shape_cast %23 : vector<1x4x8x32xf32> to vector<4x8x32xf32>
    %25 = vector.shape_cast %22 : vector<4x8x32xf32> to vector<1x4x8x32xf32>
    tpu.vector_store %arg5[%c0_17, %c0_18, %c0_19, %c0_20], %25 {strides = array<i32>} : memref<1x4x8x32xf32, #tpu.memory_space<vmem>>, vector<1x4x8x32xf32>,
    return
  }
  func.func @transform_0(%arg0: i32) -> (i32, i32, i32, i32) {
    %c0_i32 = arith.constant 0 : i32
    %c0_i32_0 = arith.constant 0 : i32
    %c0_i32_1 = arith.constant 0 : i32
    %c0_i32_2 = arith.constant 0 : i32
    return %arg0, %c0_i32, %c0_i32_0, %c0_i32_1 : i32, i32, i32, i32
  }
  func.func @transform_1(%arg0: i32) -> (i32, i32, i32, i32) {
    %c0_i32 = arith.constant 0 : i32
    %c0_i32_0 = arith.constant 0 : i32
    %c0_i32_1 = arith.constant 0 : i32
    %c0_i32_2 = arith.constant 0 : i32
    return %arg0, %c0_i32, %c0_i32_0, %c0_i32_1 : i32, i32, i32, i32
  }
  func.func @transform_2(%arg0: i32) -> (i32, i32, i32, i32) {
    %c0_i32 = arith.constant 0 : i32
    %c0_i32_0 = arith.constant 0 : i32
    %c0_i32_1 = arith.constant 0 : i32
    %c0_i32_2 = arith.constant 0 : i32
    return %arg0, %c0_i32, %c0_i32_0, %c0_i32_1 : i32, i32, i32, i32
  }
  func.func @transform_3(%arg0: i32) -> (i32, i32) {
    %c0_i32 = arith.constant 0 : i32
    %c0_i32_0 = arith.constant 0 : i32
    %c0_i32_1 = arith.constant 0 : i32
    return %c0_i32, %c0_i32_0 : i32, i32
  }
  func.func @transform_4(%arg0: i32) -> (i32, i32, i32, i32) {
    %c0_i32 = arith.constant 0 : i32
    %c0_i32_0 = arith.constant 0 : i32
    %c0_i32_1 = arith.constant 0 : i32
    %c0_i32_2 = arith.constant 0 : i32
    return %arg0, %c0_i32, %c0_i32_0, %c0_i32_1 : i32, i32, i32, i32
  }
}

module attributes {stable_mosaic.version = 11 : i64} {
  func.func @_add_ln_kernel(%arg0: i32, %arg1: memref<16x128xf32, #tpu.memory_space<vmem>>, %arg2: memref<16x128xf32, #tpu.memory_space<vmem>>, %arg3: memref<1x128xf32, #tpu.memory_space<vmem>>, %arg4: memref<1x128xf32, #tpu.memory_space<vmem>>, %arg5: memref<16x128xf32, #tpu.memory_space<vmem>>) attributes {dimension_semantics = [#tpu.dimension_semantics<parallel>], iteration_bounds = array<i64: 1>, scalar_prefetch = 0 : i64, scratch_operands = 0 : i64, tpu.core_type = #tpu.core_type<tc>, window_params = [{transform_indices = @transform_0, window_bounds = array<i64: 16, 128>}, {transform_indices = @transform_1, window_bounds = array<i64: 16, 128>}, {pipeline_mode = #tpu.pipeline_mode<synchronous>, transform_indices = @transform_2, window_bounds = array<i64: 1, 128>}, {pipeline_mode = #tpu.pipeline_mode<synchronous>, transform_indices = @transform_3, window_bounds = array<i64: 1, 128>}, {transform_indices = @transform_4, window_bounds = array<i64: 16, 128>}]} {
    %c0 = arith.constant 0 : index
    %c0_0 = arith.constant 0 : index
    %0 = vector.load %arg1[%c0, %c0_0] : memref<16x128xf32, #tpu.memory_space<vmem>>, vector<16x128xf32>
    %c0_1 = arith.constant 0 : index
    %c0_2 = arith.constant 0 : index
    %1 = vector.load %arg2[%c0_1, %c0_2] : memref<16x128xf32, #tpu.memory_space<vmem>>, vector<16x128xf32>
    %2 = arith.addf %0, %1 : vector<16x128xf32>
    %cst = arith.constant dense<0.000000e+00> : vector<16xf32>
    %3 = vector.multi_reduction <add>, %2, %cst [1] : vector<16x128xf32> to vector<16xf32>
    %4 = vector.shape_cast %3 : vector<16xf32> to vector<16x1xf32>
    %cst_3 = arith.constant 7.812500e-03 : f32
    %5 = vector.broadcast %cst_3 : f32 to vector<16x1xf32>
    %6 = arith.mulf %4, %5 : vector<16x1xf32>
    %7 = arith.mulf %2, %2 : vector<16x128xf32>
    %cst_4 = arith.constant dense<0.000000e+00> : vector<16xf32>
    %8 = vector.multi_reduction <add>, %7, %cst_4 [1] : vector<16x128xf32> to vector<16xf32>
    %9 = vector.shape_cast %8 : vector<16xf32> to vector<16x1xf32>
    %cst_5 = arith.constant 7.812500e-03 : f32
    %10 = vector.broadcast %cst_5 : f32 to vector<16x1xf32>
    %11 = arith.mulf %9, %10 : vector<16x1xf32>
    %12 = arith.mulf %6, %6 : vector<16x1xf32>
    %13 = arith.subf %11, %12 : vector<16x1xf32>
    %14 = vector.broadcast %6 : vector<16x1xf32> to vector<16x128xf32>
    %15 = arith.subf %2, %14 : vector<16x128xf32>
    %cst_6 = arith.constant 9.99999974E-6 : f32
    %16 = vector.broadcast %cst_6 : f32 to vector<16x1xf32>
    %17 = arith.addf %13, %16 : vector<16x1xf32>
    %18 = math.rsqrt %17 : vector<16x1xf32>
    %19 = vector.broadcast %18 : vector<16x1xf32> to vector<16x128xf32>
    %20 = arith.mulf %15, %19 : vector<16x128xf32>
    %c0_7 = arith.constant 0 : index
    %c0_8 = arith.constant 0 : index
    %21 = vector.load %arg3[%c0_7, %c0_8] : memref<1x128xf32, #tpu.memory_space<vmem>>, vector<1x128xf32>
    %22 = vector.broadcast %21 : vector<1x128xf32> to vector<16x128xf32>
    %23 = arith.mulf %20, %22 : vector<16x128xf32>
    %c0_9 = arith.constant 0 : index
    %c0_10 = arith.constant 0 : index
    %24 = vector.load %arg4[%c0_9, %c0_10] : memref<1x128xf32, #tpu.memory_space<vmem>>, vector<1x128xf32>
    %25 = vector.broadcast %24 : vector<1x128xf32> to vector<16x128xf32>
    %26 = arith.addf %23, %25 : vector<16x128xf32>
    %c0_11 = arith.constant 0 : index
    %c0_12 = arith.constant 0 : index
    %27 = vector.load %arg5[%c0_11, %c0_12] : memref<16x128xf32, #tpu.memory_space<vmem>>, vector<16x128xf32>
    tpu.vector_store %arg5[%c0_11, %c0_12], %26 {strides = array<i32>} : memref<16x128xf32, #tpu.memory_space<vmem>>, vector<16x128xf32>,
    return
  }
  func.func @transform_0(%arg0: i32) -> (i32, i32) {
    %c0_i32 = arith.constant 0 : i32
    %c0_i32_0 = arith.constant 0 : i32
    return %arg0, %c0_i32 : i32, i32
  }
  func.func @transform_1(%arg0: i32) -> (i32, i32) {
    %c0_i32 = arith.constant 0 : i32
    %c0_i32_0 = arith.constant 0 : i32
    return %arg0, %c0_i32 : i32, i32
  }
  func.func @transform_2(%arg0: i32) -> (i32, i32) {
    %c0_i32 = arith.constant 0 : i32
    %c0_i32_0 = arith.constant 0 : i32
    %c0_i32_1 = arith.constant 0 : i32
    return %c0_i32, %c0_i32_0 : i32, i32
  }
  func.func @transform_3(%arg0: i32) -> (i32, i32) {
    %c0_i32 = arith.constant 0 : i32
    %c0_i32_0 = arith.constant 0 : i32
    %c0_i32_1 = arith.constant 0 : i32
    return %c0_i32, %c0_i32_0 : i32, i32
  }
  func.func @transform_4(%arg0: i32) -> (i32, i32) {
    %c0_i32 = arith.constant 0 : i32
    %c0_i32_0 = arith.constant 0 : i32
    return %arg0, %c0_i32 : i32, i32
  }
}

</mosaic_0001>

<bundles_post_ra>
// kernel: transformer_monotonic_forward.42
= control target key start
LH: loop header
LB: loop body
LE: loop exit
PB: predicated region body
PF: predicated region fallthrough
CT: control target
= control target key end

     0   :  { %s336_s1 = inlined_call_operand.vmem [shape: f32[128,128], index: 1, kind: input, shape index: {}]   ;;  %s337_s0 = inlined_call_operand.vmem [shape: f32[32,128], index: 0, kind: input, shape index: {}]   ;;  %s338_s2 = inlined_call_operand.vmem [shape: f32[1,128], index: 2, kind: input, shape index: {}]   ;;  %s339_s3 = inlined_call_operand.vmem [shape: f32[32,128], index: 3, kind: output, shape index: {}]  }
   0x1   :  { %v18_v0 = vld [vmem:[%s336_s1] sm:$0xff]  ;;  %v19_v1 = vld [vmem:[%s336_s1 + $0x8] sm:$0xff]  ;;  %v20_v2 = vld [vmem:[%s336_s1 + $0x10] sm:$0xff] }
   0x2   :  { %v193_v3 = vpack.c.bf16 %v19_v1, %v18_v0  ;;  %v21_v4 = vld [vmem:[%s336_s1 + $0x18] sm:$0xff]  ;;  %v22_v6 = vld [vmem:[%s336_s1 + $0x20] sm:$0xff]  ;;  %v23_v7 = vld [vmem:[%s336_s1 + $0x28] sm:$0xff] }
   0x3   :  { %v197_v5 = vpack.c.bf16 %v21_v4, %v20_v2  ;;  %v201_v8 = vpack.c.bf16 %v23_v7, %v22_v6  ;;  %v14_v9 = vld [vmem:[%s337_s0] sm:$0xff]  ;;  %v16_v10 = vld [vmem:[%s337_s0 + $0x10] sm:$0xff]  ;;  %v25_v12 = vld [vmem:[%s336_s1 + $0x38] sm:$0xff] }
   0x4   :  { %194 = vmatprep.subr.bf16.mxu0 %v193_v3  ;;  %225 = vmatprep.subr.bf16.mxu1 %v193_v3  ;;  %v24_v11 = vld [vmem:[%s336_s1 + $0x30] sm:$0xff]  ;;  %v26_v14 = vld [vmem:[%s336_s1 + $0x40] sm:$0xff]  ;;  %v27_v15 = vld [vmem:[%s336_s1 + $0x48] sm:$0xff] }
   0x5   :  { %196 = vmatpush3.bf16.msra.mxu0 %v193_v3  ;;  %233 = vmatpush3.bf16.msra.mxu1 %v193_v3  ;;  %v205_v13 = vpack.c.bf16 %v25_v12, %v24_v11  ;;  %v209_v16 = vpack.c.bf16 %v27_v15, %v26_v14  ;;  %v28_v17 = vld [vmem:[%s336_s1 + $0x50] sm:$0xff]  ;;  %v29_v18 = vld [vmem:[%s336_s1 + $0x58] sm:$0xff]  ;;  %v30_v20 = vld [vmem:[%s336_s1 + $0x60] sm:$0xff] }
   0x6   :  { %198 = vmatprep.subr.bf16.mxu0 %v197_v5  ;;  %226 = vmatprep.subr.bf16.mxu1 %v197_v5  ;;  %v213_v19 = vpack.c.bf16 %v29_v18, %v28_v17  ;;  %v31_v21 = vld [vmem:[%s336_s1 + $0x68] sm:$0xff]  ;;  %v32_v23 = vld [vmem:[%s336_s1 + $0x70] sm:$0xff]  ;;  %v33_v24 = vld [vmem:[%s336_s1 + $0x78] sm:$0xff] }
   0x7   :  { %187 = vmatprep.mubr.f32.mxu0 %v14_v9  ;;  %190 = vmatprep.mubr.f32.mxu1 %v16_v10  ;;  %v217_v22 = vpack.c.bf16 %v31_v21, %v30_v20  ;;  %v221_v25 = vpack.c.bf16 %v33_v24, %v32_v23  ;;  %v15_v26 = vld [vmem:[%s337_s0 + $0x8] sm:$0xff]  ;;  %v17_v27 = vld [vmem:[%s337_s0 + $0x18] sm:$0xff]  ;;  %v134_v28 = vld [vmem:[%s338_s2] ss:$0 sm:$0xff] }
   0x9   :  { %200 = vmatpush3.bf16.msra.mxu0 %v197_v5  ;;  %234 = vmatpush3.bf16.msra.mxu1 %v197_v5 }
   0xa   :  { %202 = vmatprep.subr.bf16.mxu0 %v201_v8  ;;  %227 = vmatprep.subr.bf16.mxu1 %v201_v8 }
   0xd   :  { %204 = vmatpush3.bf16.msra.mxu0 %v201_v8  ;;  %235 = vmatpush3.bf16.msra.mxu1 %v201_v8 }
   0xe   :  { %206 = vmatprep.subr.bf16.mxu0 %v205_v13  ;;  %228 = vmatprep.subr.bf16.mxu1 %v205_v13 }
  0x11   :  { %208 = vmatpush3.bf16.msra.mxu0 %v205_v13  ;;  %236 = vmatpush3.bf16.msra.mxu1 %v205_v13 }
  0x12   :  { %210 = vmatprep.subr.bf16.mxu0 %v209_v16  ;;  %229 = vmatprep.subr.bf16.mxu1 %v209_v16 }
  0x15   :  { %212 = vmatpush3.bf16.msra.mxu0 %v209_v16  ;;  %237 = vmatpush3.bf16.msra.mxu1 %v209_v16 }
  0x16   :  { %214 = vmatprep.subr.bf16.mxu0 %v213_v19  ;;  %230 = vmatprep.subr.bf16.mxu1 %v213_v19 }
  0x19   :  { %216 = vmatpush3.bf16.msra.mxu0 %v213_v19  ;;  %238 = vmatpush3.bf16.msra.mxu1 %v213_v19 }
  0x1a   :  { %218 = vmatprep.subr.bf16.mxu0 %v217_v22  ;;  %231 = vmatprep.subr.bf16.mxu1 %v217_v22 }
  0x1d   :  { %220 = vmatpush3.bf16.msra.mxu0 %v217_v22  ;;  %239 = vmatpush3.bf16.msra.mxu1 %v217_v22 }
  0x1e   :  { %222 = vmatprep.subr.bf16.mxu0 %v221_v25  ;;  %232 = vmatprep.subr.bf16.mxu1 %v221_v25 }
  0x21   :  { %224 = vmatpush3.bf16.msra.mxu0 %v221_v25  ;;  %240 = vmatpush3.bf16.msra.mxu1 %v221_v25 }
  0x24   :  { %188 = vmatmul.mubr.f32.vlgmr.msra.gmra.mrb[0].mxu0 %v15_v26  ;;  %191 = vmatmul.mubr.f32.vlgmr.msra.gmra.mrb[0].mxu1 %v17_v27 }
  0xf7   :  { %v189_v29 = vpop.f32.mrb[0].mxu0  ;;  %v192_v30 = vpop.f32.mrb[0].mxu1 }
  0xf8   :  { %v113_v31 = vadd.f32 %v189_v29, %v134_v28  ;;  %v123_v32 = vadd.f32 %v192_v30, %v134_v28  ;;  %v107_v33 = vpop.f32.mrb[1].mxu0  ;;  %v117_v34 = vpop.f32.mrb[1].mxu1 }
  0xf9   :  { %v108_v35 = vadd.f32 %v134_v28, %v107_v33  ;;  %v118_v36 = vadd.f32 %v134_v28, %v117_v34 }
  0xfa   :  { %127 = vst [vmem:[%s339_s3 + $0x8] sm:$0xff] %v113_v31  ;;  %129 = vst [vmem:[%s339_s3 + $0x18] sm:$0xff] %v123_v32 }
  0xfb   :  { %126 = vst [vmem:[%s339_s3] sm:$0xff] %v108_v35  ;;  %128 = vst [vmem:[%s339_s3 + $0x10] sm:$0xff] %v118_v36 }

// kernel: transformer_monotonic_forward.46
= control target key start
LH: loop header
LB: loop body
LE: loop exit
PB: predicated region body
PF: predicated region fallthrough
CT: control target
= control target key end

     0   :  { %s200_s0 = inlined_call_operand.vmem [shape: f32[32,128], index: 0, kind: input, shape index: {}]   ;;  %s201_s1 = inlined_call_operand.vmem [shape: f32[32,128], index: 1, kind: input, shape index: {}]   ;;  %s202_s2 = inlined_call_operand.vmem [shape: f32[1,128], index: 2, kind: input, shape index: {}]   ;;  %s203_s3 = inlined_call_operand.vmem [shape: f32[1,128], index: 3, kind: input, shape index: {}]   ;;  %s204_s4 = inlined_call_operand.vmem [shape: f32[32,128], index: 4, kind: output, shape index: {}]  }
   0x1   :  { %v19_v0 = vld [vmem:[%s200_s0 + $0x10] sm:$0xff]  ;;  %v17_v2 = vld [vmem:[%s200_s0] sm:$0xff]  ;;  %v20_v5 = vld [vmem:[%s200_s0 + $0x18] sm:$0xff] }
   0x2   :  { %v23_v1 = vld [vmem:[%s201_s1 + $0x10] sm:$0xff]  ;;  %v21_v4 = vld [vmem:[%s201_s1] sm:$0xff]  ;;  %v24_v6 = vld [vmem:[%s201_s1 + $0x18] sm:$0xff] }
   0x3   :  { %v155_v3 = vadd.f32 %v23_v1, %v19_v0  ;;  %v25_v7 = vadd.f32 %v21_v4, %v17_v2  ;;  %v18_v8 = vld [vmem:[%s200_s0 + $0x8] sm:$0xff]  ;;  %v173_v10 = vadd.f32 %v24_v6, %v20_v5  ;;  %v111_v47 = vld [vmem:[%s202_s2] ss:$0 sm:$0xff] }
   0x4   :  { %v22_v9 = vld [vmem:[%s201_s1 + $0x8] sm:$0xff]  ;;  %v112_v50 = vld [vmem:[%s203_s3] ss:$0 sm:$0xff] }
   0x5   :  { %33 = vadd.xlane.f32.xlu1 %v155_v3  ;;  %29 = vadd.xlane.f32.xlu0 %v25_v7  ;;  %v26_v11 = vadd.f32 %v22_v9, %v18_v8  ;;  %v41_v13 = vmul.f32 %v25_v7, %v25_v7  ;;  %v44_v14 = vmul.f32 %v173_v10, %v173_v10 }
   0x6   :  { %v43_v15 = vmul.f32 %v155_v3, %v155_v3 }
   0x7   :  { %v42_v12 = vmul.f32 %v26_v11, %v26_v11 }
   0x9   :  { %35 = vadd.xlane.f32.xlu1 %v173_v10  ;;  %31 = vadd.xlane.f32.xlu0 %v26_v11 }
   0xd   :  { %47 = vadd.xlane.f32.xlu1 %v42_v12  ;;  %45 = vadd.xlane.f32.xlu0 %v41_v13 }
  0x11   :  { %51 = vadd.xlane.f32.xlu1 %v44_v14  ;;  %49 = vadd.xlane.f32.xlu0 %v43_v15 }
  0x92   :  { %v34_v16 = vpop.xlane.xlu1 %33  ;;  %v30_v17 = vpop.xlane.xlu0 %29 }
  0x93   :  { %v37_v20 = vmul.f32 0.0078125, %v30_v17  ;;  %v39_v27 = vmul.f32 0.0078125, %v34_v16 }
  0x95   :  { %v57_v28 = vmul.f32 %v37_v20, %v37_v20  ;;  %v59_v37 = vmul.f32 %v39_v27, %v39_v27  ;;  %v65_v46 = vsub.f32 %v25_v7, %v37_v20  ;;  %v67_v55 = vsub.f32 %v155_v3, %v39_v27 }
  0x96   :  { %v36_v18 = vpop.xlane.xlu1 %35  ;;  %v32_v19 = vpop.xlane.xlu0 %31 }
  0x97   :  { %v38_v21 = vmul.f32 0.0078125, %v32_v19  ;;  %v40_v23 = vmul.f32 0.0078125, %v36_v18 }
  0x99   :  { %v58_v24 = vmul.f32 %v38_v21, %v38_v21  ;;  %v60_v33 = vmul.f32 %v40_v23, %v40_v23  ;;  %v66_v44 = vsub.f32 %v26_v11, %v38_v21  ;;  %v68_v52 = vsub.f32 %v173_v10, %v40_v23 }
  0x9a   :  { %v48_v22 = vpop.xlane.xlu1 %47  ;;  %v46_v26 = vpop.xlane.xlu0 %45 }
  0x9b   :  { %v54_v25 = vmul.f32 0.0078125, %v48_v22  ;;  %v53_v29 = vmul.f32 0.0078125, %v46_v26 }
  0x9d   :  { %v62_v30 = vsub.f32 %v54_v25, %v58_v24  ;;  %v61_v31 = vsub.f32 %v53_v29, %v57_v28 }
  0x9e   :  { %v52_v32 = vpop.xlane.xlu1 %51  ;;  %v50_v36 = vpop.xlane.xlu0 %49 }
  0x9f   :  { %v70_v34 = vadd.f32 1e-05, %v62_v30  ;;  %v56_v35 = vmul.f32 0.0078125, %v52_v32  ;;  %v69_v38 = vadd.f32 1e-05, %v61_v31  ;;  %v55_v39 = vmul.f32 0.0078125, %v50_v36 }
  0xa1   :  { %113 = vrsqrt.f32 %v70_v34  ;;  %v64_v40 = vsub.f32 %v56_v35, %v60_v33  ;;  %v63_v41 = vsub.f32 %v55_v39, %v59_v37 }
  0xa2   :  { %115 = vrsqrt.f32 %v69_v38 }
  0xa3   :  { %v72_v42 = vadd.f32 1e-05, %v64_v40  ;;  %v71_v43 = vadd.f32 1e-05, %v63_v41 }
  0xa5   :  { %117 = vrsqrt.f32 %v72_v42 }
  0xa6   :  { %119 = vrsqrt.f32 %v71_v43 }
  0xab   :  { %v114_v45 = vpop.eup %113 }
  0xac   :  { %v116_v48 = vpop.eup %115  ;;  %v78_v49 = vmul.f32 %v114_v45, %v66_v44 }
  0xad   :  { %v77_v51 = vmul.f32 %v116_v48, %v65_v46 }
  0xae   :  { %v89_v53 = vmul.f32 %v111_v47, %v78_v49 }
  0xaf   :  { %v118_v54 = vpop.eup %117  ;;  %v88_v56 = vmul.f32 %v111_v47, %v77_v51 }
  0xb0   :  { %v120_v57 = vpop.eup %119  ;;  %v100_v58 = vadd.f32 %v112_v50, %v89_v53  ;;  %v80_v59 = vmul.f32 %v118_v54, %v68_v52 }
  0xb1   :  { %v99_v60 = vadd.f32 %v112_v50, %v88_v56  ;;  %v79_v61 = vmul.f32 %v120_v57, %v67_v55 }
  0xb2   :  { %104 = vst [vmem:[%s204_s4 + $0x8] sm:$0xff] %v100_v58  ;;  %v91_v62 = vmul.f32 %v111_v47, %v80_v59 }
  0xb3   :  { %103 = vst [vmem:[%s204_s4] sm:$0xff] %v99_v60  ;;  %v90_v63 = vmul.f32 %v111_v47, %v79_v61 }
  0xb4   :  { %v102_v0 = vadd.f32 %v112_v50, %v91_v62 }
  0xb5   :  { %v101_v1 = vadd.f32 %v112_v50, %v90_v63 }
  0xb6   :  { %106 = vst [vmem:[%s204_s4 + $0x18] sm:$0xff] %v102_v0 }
  0xb7   :  { %105 = vst [vmem:[%s204_s4 + $0x10] sm:$0xff] %v101_v1 }

// kernel: transformer_monotonic_forward.44
= control target key start
LH: loop header
LB: loop body
LE: loop exit
PB: predicated region body
PF: predicated region fallthrough
CT: control target
= control target key end

     0   :  { %s1373_s15 = smov 0   ;;  %s1500_s0 = inlined_call_operand.vmem [shape: f32[2,4,16,32], index: 0, kind: input, shape index: {}]   ;;  %s1501_s1 = inlined_call_operand.vmem [shape: f32[2,4,16,32], index: 1, kind: input, shape index: {}]   ;;  %s1502_s2 = inlined_call_operand.vmem [shape: f32[2,4,16,32], index: 2, kind: input, shape index: {}]   ;;  %s1503_s3 = inlined_call_operand.vmem [shape: f32[16,16], index: 3, kind: input, shape index: {}]   ;;  %s1504_s4 = inlined_call_operand.vmem [shape: f32[2,4,16,32], index: 4, kind: output, shape index: {}]  }
   0x1 LB: > { %s1129_s16 = sadd.s32 4294967295, %s1346_s15   ;;  %p1133_p0 = scmp.ge.s32.totalorder %s1346_s15, 1  ;;  %s1346_s15 = sphi %s1373_s15, %s14_s15  }
   0x2   : > { %p182_p1 = scmp.lt.s32.totalorder %s1346_s15, 3 }
   0x4   : > { %p183_p2 = pnand %p1133_p0, %p182_p1 }
   0x5   : > { %p218_p3 = scmp.lt.s32.totalorder (!%p183_p2), %s1129_s16, 1  ;;  %vm262_vm0 = vcmask (!%p183_p2), 261120   ;;  %v620_v22 = vld [vmem:[%s1503_s3 + $0x8] sm:$0xff] (!%p183_p2)  ;;  %v619_v26 = vld [vmem:[%s1503_s3] sm:$0xff] (!%p183_p2)  ;;  %vm629_vm2 = vcmask (!%p183_p2), 130048  }
   0x6   : > { %186 = sbr.rel (%p183_p2) target bundleno = 787 (0x313), region = 36  ;;  %vm1389_vm1 = vmpackc.low (!%p183_p2), %vm262_vm0, %vm262_vm0 }
   0xd   : > { %s1508_s16 = smov (!%p218_p3, %s1129_s16), 1 }
   0xe   : > { %s1381_s17 = sshll.u32 %s1508_s16, 6 }
   0xf   : > { %s227_s20 = scalar_lea.vmem %s1501_s1, %s1381_s17  ;;  %s1397_s23 = scalar_lea.vmem %s1500_s0, %s1381_s17 }
  0x10   : > { %v246_v1 = vld [vmem:[%s227_s20] sm:$0xff]  ;;  %v247_v2 = vld [vmem:[%s227_s20 + $0x8] sm:$0xff]  ;;  %v248_v3 = vld [vmem:[%s227_s20 + $0x10] sm:$0xff]  ;;  %s232_s30 = scalar_lea.vmem %s1502_s2, %s1381_s17  ;;  %s237_s7 = scalar_lea.vmem %s1504_s4, %s1381_s17 }
  0x11   : > { %v1260_v4 = vpack.c.bf16 %v247_v2, %v246_v1  ;;  %v249_v5 = vld [vmem:[%s227_s20 + $0x18] sm:$0xff]  ;;  %v238_v6 = vld [vmem:[%s1397_s23] sm:$0xff]  ;;  %v240_v8 = vld [vmem:[%s1397_s23 + $0x10] sm:$0xff] }
  0x12   : > { %v1266_v7 = vpack.c.bf16 %v249_v5, %v248_v3  ;;  %1208 = vmatprep.mubr.msk.f32.mxu0 %vm262_vm0, %v238_v6  ;;  %v250_v9 = vld [vmem:[%s227_s20 + $0x20] sm:$0xff]  ;;  %v251_v10 = vld [vmem:[%s227_s20 + $0x28] sm:$0xff]  ;;  %1215 = vmatprep.mubr.msk.f32.mxu1 %vm262_vm0, %v240_v8  ;;  %v252_v12 = vld [vmem:[%s227_s20 + $0x30] sm:$0xff] }
  0x13   : > { %1262 = vmatprep.subr.msk.bf16.mxu0 %vm1389_vm1, %v1260_v4  ;;  %v1272_v11 = vpack.c.bf16 %v251_v10, %v250_v9  ;;  %v253_v13 = vld [vmem:[%s227_s20 + $0x38] sm:$0xff]  ;;  %v239_v15 = vld [vmem:[%s1397_s23 + $0x8] sm:$0xff]  ;;  %v242_v17 = vld [vmem:[%s1397_s23 + $0x20] sm:$0xff] }
  0x14   : > { %1268 = vmatprep.subr.msk.bf16.mxu1 %vm1389_vm1, %v1266_v7  ;;  %1265 = vmatpush3.bf16.xpose.msk.msra.mxu0 %vm1389_vm1, %v1260_v4  ;;  %v1278_v14 = vpack.c.bf16 %v253_v13, %v252_v12  ;;  %v241_v16 = vld [vmem:[%s1397_s23 + $0x18] sm:$0xff]  ;;  %v244_v18 = vld [vmem:[%s1397_s23 + $0x30] sm:$0xff]  ;;  %v243_v19 = vld [vmem:[%s1397_s23 + $0x28] sm:$0xff] }
  0x15   : > { %1271 = vmatpush3.bf16.xpose.msk.msra.mxu1 %vm1389_vm1, %v1266_v7  ;;  %1274 = vmatprep.subr.msk.bf16.mxu0 %vm1389_vm1, %v1272_v11  ;;  %v245_v20 = vld [vmem:[%s1397_s23 + $0x38] sm:$0xff] }
  0x16   : > { %1280 = vmatprep.subr.msk.bf16.mxu1 %vm1389_vm1, %v1278_v14 }
  0x1b   : > { %1209 = vmatmul.mubr.msk.f32.vlgmr.msra.gmra.mrb[0].mxu0 %vm262_vm0, %v239_v15 }
  0x1c   : > { %1216 = vmatmul.mubr.msk.f32.vlgmr.msra.gmra.mrb[0].mxu1 %vm262_vm0, %v241_v16  ;;  %1277 = vmatpush3.bf16.xpose.msk.msra.mxu0 %vm1389_vm1, %v1272_v11 }
  0x1d   : > { %1283 = vmatpush3.bf16.xpose.msk.msra.mxu1 %vm1389_vm1, %v1278_v14  ;;  %1222 = vmatprep.mubr.msk.f32.mxu0 %vm262_vm0, %v242_v17 }
  0x1e   : > { %1229 = vmatprep.mubr.msk.f32.mxu1 %vm262_vm0, %v244_v18 }
  0x23   : > { %1223 = vmatmul.mubr.msk.f32.vlgmr.msra.gmra.mrb[2].mxu0 %vm262_vm0, %v243_v19 }
  0x24   : > { %1230 = vmatmul.mubr.msk.f32.vlgmr.msra.gmra.mrb[2].mxu1 %vm262_vm0, %v245_v20 }
  0xee   : > { %v1210_v21 = vpop.f32.mrb[0].mxu0 }
  0xef   : > { %v612_v23 = vmul.f32 0.17677669, %v1210_v21  ;;  %v341_v24 = vpop.f32.mrb[1].mxu0  ;;  %v1217_v25 = vpop.f32.mrb[0].mxu1 }
  0xf0   : > { %v611_v27 = vmul.f32 0.17677669, %v341_v24  ;;  %v614_v28 = vmul.f32 0.17677669, %v1217_v25  ;;  %v428_v29 = vpop.f32.mrb[1].mxu1 }
  0xf1   : > { %v613_v30 = vmul.f32 0.17677669, %v428_v29  ;;  %v622_v31 = vadd.f32 %v620_v22, %v612_v23 }
  0xf2   : > { %v621_v32 = vadd.f32 %v619_v26, %v611_v27  ;;  %v624_v33 = vadd.f32 %v620_v22, %v614_v28 }
  0xf3   : > { %v633_v34 = vsel %vm629_vm2, %v622_v31, -inf  ;;  %v623_v35 = vadd.f32 %v619_v26, %v613_v30 }
  0xf4   : > { %634 = vmax.xlane.f32.xlu1 %v633_v34  ;;  %v630_v36 = vsel %vm629_vm2, %v621_v32, -inf  ;;  %v639_v37 = vsel %vm629_vm2, %v624_v33, -inf  ;;  %v256_v34 = vld [vmem:[%s232_s30 + $0x10] sm:$0xff] }
  0xf5   : > { %631 = vmax.xlane.f32.xlu0 %v630_v36  ;;  %v636_v39 = vsel %vm629_vm2, %v623_v35, -inf }
  0xf6   : > { %v1224_v38 = vpop.f32.mrb[2].mxu0 }
  0xf7   : > { %v1231_v40 = vpop.f32.mrb[2].mxu1  ;;  %v515_v41 = vpop.f32.mrb[3].mxu0  ;;  %v616_v42 = vmul.f32 0.17677669, %v1224_v38  ;;  %v259_v38 = vld [vmem:[%s232_s30 + $0x28] sm:$0xff] }
  0xf8   : > { %v615_v43 = vmul.f32 0.17677669, %v515_v41  ;;  %v602_v44 = vpop.f32.mrb[3].mxu1  ;;  %640 = vmax.xlane.f32.xlu1 %v639_v37  ;;  %v618_v45 = vmul.f32 0.17677669, %v1231_v40  ;;  %v258_v37 = vld [vmem:[%s232_s30 + $0x20] sm:$0xff] }
  0xf9   : > { %v617_v46 = vmul.f32 0.17677669, %v602_v44  ;;  %637 = vmax.xlane.f32.xlu0 %v636_v39  ;;  %v626_v50 = vadd.f32 %v620_v22, %v616_v42  ;;  %v1292_v39 = vpack.c.bf16 %v259_v38, %v258_v37  ;;  %v260_v40 = vld [vmem:[%s232_s30 + $0x30] sm:$0xff]  ;;  %v261_v41 = vld [vmem:[%s232_s30 + $0x38] sm:$0xff] }
  0xfa   : > { %v625_v47 = vadd.f32 %v619_v26, %v615_v43  ;;  %v628_v52 = vadd.f32 %v620_v22, %v618_v45  ;;  %v1296_v42 = vpack.c.bf16 %v261_v41, %v260_v40 }
  0xfb   : > { %v627_v48 = vadd.f32 %v619_v26, %v617_v46  ;;  %v645_v53 = vsel %vm629_vm2, %v626_v50, -inf }
  0xfc   : > { %v642_v49 = vsel %vm629_vm2, %v625_v47, -inf  ;;  %v651_v54 = vsel %vm629_vm2, %v628_v52, -inf }
  0xfd   : > { %v648_v51 = vsel %vm629_vm2, %v627_v48, -inf  ;;  %643 = vmax.xlane.f32.xlu0 %v642_v49 }
  0xfe   : > { %649 = vmax.xlane.f32.xlu1 %v648_v51 }
 0x101   : > { %646 = vmax.xlane.f32.xlu0 %v645_v53 }
 0x102   : > { %652 = vmax.xlane.f32.xlu1 %v651_v54 }
 0x181   : > { %v635_v55 = vpop.xlane.xlu1 %634 }
 0x182   : > { %v655_v56 = vsub.f32 %v622_v31, %v635_v55  ;;  %v632_v57 = vpop.xlane.xlu0 %631  ;;  %v254_v31 = vld [vmem:[%s232_s30] sm:$0xff] }
 0x183   : > { %v654_v58 = vsub.f32 %v621_v32, %v632_v57  ;;  %v255_v32 = vld [vmem:[%s232_s30 + $0x8] sm:$0xff] }
 0x184   : > { %v664_v59 = vmul.f32 1.442695, %v655_v56 }
 0x185   : > { %v662_v60 = vmul.f32 1.442695, %v654_v58  ;;  %v641_v61 = vpop.xlane.xlu1 %640 }
 0x186   : > { %1308 = vpow2.f32 %v664_v59  ;;  %v657_v62 = vsub.f32 %v624_v33, %v641_v61  ;;  %v638_v63 = vpop.xlane.xlu0 %637  ;;  %v1284_v33 = vpack.c.bf16 %v255_v32, %v254_v31 }
 0x187   : > { %v656_v0 = vsub.f32 %v623_v35, %v638_v63  ;;  %1310 = vpow2.f32 %v662_v60  ;;  %v257_v35 = vld [vmem:[%s232_s30 + $0x18] sm:$0xff] }
 0x188   : > { %v668_v1 = vmul.f32 1.442695, %v657_v62  ;;  %1285 = vmatprep.subr.bf16.mxu0 %v1284_v33  ;;  %v1288_v36 = vpack.c.bf16 %v257_v35, %v256_v34 }
 0x189   : > { %v666_v2 = vmul.f32 1.442695, %v656_v0  ;;  %1287 = vmatpush3.bf16.msra.mxu0 %v1284_v33 }
 0x18a   : > { %1312 = vpow2.f32 %v668_v1  ;;  %v644_v3 = vpop.xlane.xlu0 %643  ;;  %1289 = vmatprep.subr.bf16.mxu1 %v1288_v36  ;;  %1293 = vmatprep.subr.bf16.mxu0 %v1292_v39 }
 0x18b   : > { %v650_v4 = vpop.xlane.xlu1 %649  ;;  %v658_v5 = vsub.f32 %v625_v47, %v644_v3  ;;  %1314 = vpow2.f32 %v666_v2  ;;  %1291 = vmatpush3.bf16.msra.mxu1 %v1288_v36 }
 0x18c   : > { %v660_v6 = vsub.f32 %v627_v48, %v650_v4  ;;  %1297 = vmatprep.subr.bf16.mxu1 %v1296_v42 }
 0x18d   : > { %v670_v7 = vmul.f32 1.442695, %v658_v5 }
 0x18e   : > { %v674_v8 = vmul.f32 1.442695, %v660_v6  ;;  %v647_v9 = vpop.xlane.xlu0 %646 }
 0x18f   : > { %1316 = vpow2.f32 %v670_v7  ;;  %v653_v10 = vpop.xlane.xlu1 %652  ;;  %v659_v11 = vsub.f32 %v626_v50, %v647_v9 }
 0x190   : > { %v1445_v12 = vpop.eup %1308  ;;  %1318 = vpow2.f32 %v674_v8  ;;  %v661_v13 = vsub.f32 %v628_v52, %v653_v10 }
 0x191   : > { %v672_v14 = vmul.f32 1.442695, %v659_v11  ;;  %v681_v15 = vsel %vm629_vm2, %v1445_v12, 0.0  ;;  %v1311_v16 = vpop.eup %1310 }
 0x192   : > { %v676_v17 = vmul.f32 1.442695, %v661_v13  ;;  %682 = vadd.xlane.f32.xlu0 %v681_v15  ;;  %v678_v20 = vsel %vm629_vm2, %v1311_v16, 0.0 }
 0x193   : > { %1320 = vpow2.f32 %v672_v14 }
 0x194   : > { %v1449_v18 = vpop.eup %1312  ;;  %1322 = vpow2.f32 %v676_v17 }
 0x195   : > { %v687_v19 = vsel %vm629_vm2, %v1449_v18, 0.0  ;;  %v1315_v21 = vpop.eup %1314 }
 0x196   : > { %688 = vadd.xlane.f32.xlu1 %v687_v19  ;;  %679 = vadd.xlane.f32.xlu0 %v678_v20  ;;  %v684_v23 = vsel %vm629_vm2, %v1315_v21, 0.0 }
 0x199   : > { %v1317_v22 = vpop.eup %1316 }
 0x19a   : > { %v1455_v24 = vpop.eup %1318  ;;  %685 = vadd.xlane.f32.xlu1 %v684_v23  ;;  %v690_v25 = vsel %vm629_vm2, %v1317_v22, 0.0 }
 0x19b   : > { %691 = vadd.xlane.f32.xlu0 %v690_v25  ;;  %v696_v27 = vsel %vm629_vm2, %v1455_v24, 0.0 }
 0x19d   : > { %v1458_v26 = vpop.eup %1320 }
 0x19e   : > { %v1462_v28 = vpop.eup %1322  ;;  %697 = vadd.xlane.f32.xlu1 %v696_v27  ;;  %v693_v29 = vsel %vm629_vm2, %v1458_v26, 0.0 }
 0x19f   : > { %694 = vadd.xlane.f32.xlu0 %v693_v29  ;;  %v699_v30 = vsel %vm629_vm2, %v1462_v28, 0.0 }
 0x1a2   : > { %700 = vadd.xlane.f32.xlu1 %v699_v30 }
 0x21f   : > { %v683_v43 = vpop.xlane.xlu0 %682 }
 0x220   : > { %1324 = vrcp.f32 %v683_v43 }
 0x223   : > { %v689_v44 = vpop.xlane.xlu1 %688  ;;  %v680_v45 = vpop.xlane.xlu0 %679 }
 0x224   : > { %1326 = vrcp.f32 %v680_v45 }
 0x225   : > { %1328 = vrcp.f32 %v689_v44 }
 0x227   : > { %v686_v46 = vpop.xlane.xlu1 %685 }
 0x228   : > { %1330 = vrcp.f32 %v686_v46  ;;  %v692_v47 = vpop.xlane.xlu0 %691 }
 0x229   : > { %1332 = vrcp.f32 %v692_v47 }
 0x22a   : > { %v1325_v50 = vpop.eup %1324 }
 0x22b   : > { %v698_v48 = vpop.xlane.xlu1 %697  ;;  %v705_v55 = vmul.f32 %v1325_v50, %v1445_v12 }
 0x22c   : > { %1334 = vrcp.f32 %v698_v48  ;;  %v695_v49 = vpop.xlane.xlu0 %694 }
 0x22d   : > { %1336 = vrcp.f32 %v695_v49 }
 0x22e   : > { %v1327_v51 = vpop.eup %1326 }
 0x22f   : > { %v701_v52 = vpop.xlane.xlu1 %700  ;;  %v703_v53 = vmul.f32 %v1327_v51, %v1311_v16  ;;  %v1329_v54 = vpop.eup %1328 }
 0x230   : > { %1338 = vrcp.f32 %v701_v52  ;;  %v709_v59 = vmul.f32 %v1329_v54, %v1449_v18 }
 0x231   : > { %1236 = vmatprep.mubr.msk.f32.mxu0 %vm629_vm2, %v703_v53 }
 0x232   : > { %v1331_v56 = vpop.eup %1330  ;;  %1237 = vmatmul.mubr.msk.f32.vlgmr.msra.gmra.mrb[4].mxu0 %vm629_vm2, %v705_v55 }
 0x233   : > { %v1333_v57 = vpop.eup %1332  ;;  %v707_v58 = vmul.f32 %v1331_v56, %v1315_v21  ;;  %1295 = vmatpush3.bf16.msra.mxu0 %v1292_v39 }
 0x234   : > { %v711_v60 = vmul.f32 %v1333_v57, %v1317_v22 }
 0x235   : > { %1243 = vmatprep.mubr.msk.f32.mxu1 %vm629_vm2, %v707_v58 }
 0x236   : > { %v1335_v61 = vpop.eup %1334  ;;  %1244 = vmatmul.mubr.msk.f32.vlgmr.msra.gmra.mrb[4].mxu1 %vm629_vm2, %v709_v59  ;;  %1250 = vmatprep.mubr.msk.f32.mxu0 %vm629_vm2, %v711_v60 }
 0x237   : > { %v1337_v62 = vpop.eup %1336  ;;  %1299 = vmatpush3.bf16.msra.mxu1 %v1296_v42  ;;  %v715_v63 = vmul.f32 %v1335_v61, %v1455_v24 }
 0x238   : > { %v713_v0 = vmul.f32 %v1337_v62, %v1458_v26 }
 0x239   : > { %1257 = vmatprep.mubr.msk.f32.mxu1 %vm629_vm2, %v715_v63 }
 0x23a   : > { %v1339_v1 = vpop.eup %1338  ;;  %1251 = vmatmul.mubr.msk.f32.vlgmr.msra.gmra.mrb[6].mxu0 %vm629_vm2, %v713_v0 }
 0x23b   : > { %v717_v2 = vmul.f32 %v1339_v1, %v1462_v28 }
 0x23d   : > { %1258 = vmatmul.mubr.msk.f32.vlgmr.msra.gmra.mrb[6].mxu1 %vm629_vm2, %v717_v2 }
 0x305   : > { %v1238_v3 = vpop.f32.mrb[4].mxu0 }
 0x306   : > { %1043 = vst.msk [vmem:[%s237_s7 + $0x8] sm:$0xff] %vm262_vm0, %v1238_v3  ;;  %v790_v4 = vpop.f32.mrb[5].mxu0 }
 0x307   : > { %1042 = vst.msk [vmem:[%s237_s7] sm:$0xff] %vm262_vm0, %v790_v4 }
 0x309   : > { %v1245_v5 = vpop.f32.mrb[4].mxu1 }
 0x30a   : > { %1045 = vst.msk [vmem:[%s237_s7 + $0x18] sm:$0xff] %vm262_vm0, %v1245_v5  ;;  %v871_v6 = vpop.f32.mrb[5].mxu1 }
 0x30b   : > { %1044 = vst.msk [vmem:[%s237_s7 + $0x10] sm:$0xff] %vm262_vm0, %v871_v6 }
 0x30d   : > { %v1252_v7 = vpop.f32.mrb[6].mxu0 }
 0x30e   : > { %1047 = vst.msk [vmem:[%s237_s7 + $0x28] sm:$0xff] %vm262_vm0, %v1252_v7  ;;  %v952_v8 = vpop.f32.mrb[7].mxu0 }
 0x30f   : > { %1046 = vst.msk [vmem:[%s237_s7 + $0x20] sm:$0xff] %vm262_vm0, %v952_v8 }
 0x310   : > { %v1259_v9 = vpop.f32.mrb[6].mxu1 }
 0x311   : > { %1049 = vst.msk [vmem:[%s237_s7 + $0x38] sm:$0xff] %vm262_vm0, %v1259_v9  ;;  %v1033_v10 = vpop.f32.mrb[7].mxu1 }
 0x312   : > { %1048 = vst.msk [vmem:[%s237_s7 + $0x30] sm:$0xff] %vm262_vm0, %v1033_v10 }
 0x313 PF: > { %s14_s15 = sadd.s32 1, %s1346_s15  }
 0x314   : > { %p11_p4 = scmp.ge.s32.totalorder %s14_s15, 4  }
 0x316   :  { %13 = sbr.rel (!%p11_p4) target bundleno = 1 (0x1), region = 72 }

// kernel: transformer_monotonic_forward.56
= control target key start
LH: loop header
LB: loop body
LE: loop exit
PB: predicated region body
PF: predicated region fallthrough
CT: control target
= control target key end

     0   :  { %s289_s1 = inlined_call_operand.vmem [shape: f32[128,128], index: 1, kind: input, shape index: {}]   ;;  %s290_s0 = inlined_call_operand.vmem [shape: f32[16,128], index: 0, kind: input, shape index: {}]   ;;  %s291_s2 = inlined_call_operand.vmem [shape: f32[1,128], index: 2, kind: input, shape index: {}]   ;;  %s292_s3 = inlined_call_operand.vmem [shape: f32[16,128], index: 3, kind: output, shape index: {}]  }
   0x1   :  { %v16_v0 = vld [vmem:[%s289_s1] sm:$0xff]  ;;  %v17_v1 = vld [vmem:[%s289_s1 + $0x8] sm:$0xff]  ;;  %v18_v2 = vld [vmem:[%s289_s1 + $0x10] sm:$0xff] }
   0x2   :  { %v174_v3 = vpack.c.bf16 %v17_v1, %v16_v0  ;;  %v19_v4 = vld [vmem:[%s289_s1 + $0x18] sm:$0xff]  ;;  %v20_v6 = vld [vmem:[%s289_s1 + $0x20] sm:$0xff]  ;;  %v21_v7 = vld [vmem:[%s289_s1 + $0x28] sm:$0xff] }
   0x3   :  { %v178_v5 = vpack.c.bf16 %v19_v4, %v18_v2  ;;  %v182_v8 = vpack.c.bf16 %v21_v7, %v20_v6  ;;  %v14_v9 = vld [vmem:[%s290_s0] sm:$0xff]  ;;  %v22_v10 = vld [vmem:[%s289_s1 + $0x30] sm:$0xff]  ;;  %v23_v11 = vld [vmem:[%s289_s1 + $0x38] sm:$0xff] }
   0x4   :  { %175 = vmatprep.subr.bf16.mxu0 %v174_v3  ;;  %171 = vmatprep.mubr.f32.mxu0 %v14_v9  ;;  %v186_v12 = vpack.c.bf16 %v23_v11, %v22_v10  ;;  %v24_v13 = vld [vmem:[%s289_s1 + $0x40] sm:$0xff]  ;;  %v25_v14 = vld [vmem:[%s289_s1 + $0x48] sm:$0xff]  ;;  %v26_v16 = vld [vmem:[%s289_s1 + $0x50] sm:$0xff] }
   0x5   :  { %177 = vmatpush3.bf16.msra.mxu0 %v174_v3  ;;  %v190_v15 = vpack.c.bf16 %v25_v14, %v24_v13  ;;  %v27_v17 = vld [vmem:[%s289_s1 + $0x58] sm:$0xff]  ;;  %v28_v19 = vld [vmem:[%s289_s1 + $0x60] sm:$0xff]  ;;  %v29_v20 = vld [vmem:[%s289_s1 + $0x68] sm:$0xff] }
   0x6   :  { %179 = vmatprep.subr.bf16.mxu0 %v178_v5  ;;  %v194_v18 = vpack.c.bf16 %v27_v17, %v26_v16  ;;  %v198_v21 = vpack.c.bf16 %v29_v20, %v28_v19  ;;  %v30_v22 = vld [vmem:[%s289_s1 + $0x70] sm:$0xff]  ;;  %v31_v23 = vld [vmem:[%s289_s1 + $0x78] sm:$0xff]  ;;  %v15_v25 = vld [vmem:[%s290_s0 + $0x8] sm:$0xff] }
   0x7   :  { %v202_v24 = vpack.c.bf16 %v31_v23, %v30_v22  ;;  %v120_v26 = vld [vmem:[%s291_s2] ss:$0 sm:$0xff] }
   0x9   :  { %181 = vmatpush3.bf16.msra.mxu0 %v178_v5 }
   0xa   :  { %183 = vmatprep.subr.bf16.mxu0 %v182_v8 }
   0xd   :  { %185 = vmatpush3.bf16.msra.mxu0 %v182_v8 }
   0xe   :  { %187 = vmatprep.subr.bf16.mxu0 %v186_v12 }
  0x11   :  { %189 = vmatpush3.bf16.msra.mxu0 %v186_v12 }
  0x12   :  { %191 = vmatprep.subr.bf16.mxu0 %v190_v15 }
  0x15   :  { %193 = vmatpush3.bf16.msra.mxu0 %v190_v15 }
  0x16   :  { %195 = vmatprep.subr.bf16.mxu0 %v194_v18 }
  0x19   :  { %197 = vmatpush3.bf16.msra.mxu0 %v194_v18 }
  0x1a   :  { %199 = vmatprep.subr.bf16.mxu0 %v198_v21 }
  0x1d   :  { %201 = vmatpush3.bf16.msra.mxu0 %v198_v21 }
  0x1e   :  { %203 = vmatprep.subr.bf16.mxu0 %v202_v24 }
  0x21   :  { %205 = vmatpush3.bf16.msra.mxu0 %v202_v24 }
  0x24   :  { %172 = vmatmul.mubr.f32.vlgmr.msra.gmra.mrb[0].mxu0 %v15_v25 }
  0xf7   :  { %v173_v27 = vpop.f32.mrb[0].mxu0 }
  0xf8   :  { %v111_v28 = vadd.f32 %v173_v27, %v120_v26  ;;  %v105_v29 = vpop.f32.mrb[1].mxu0 }
  0xf9   :  { %v106_v30 = vadd.f32 %v120_v26, %v105_v29 }
  0xfa   :  { %115 = vst [vmem:[%s292_s3 + $0x8] sm:$0xff] %v111_v28 }
  0xfb   :  { %114 = vst [vmem:[%s292_s3] sm:$0xff] %v106_v30 }

// kernel: transformer_monotonic_forward.47
= control target key start
LH: loop header
LB: loop body
LE: loop exit
PB: predicated region body
PF: predicated region fallthrough
CT: control target
= control target key end

     0   :  { %v501_v3 = vmov 0.0   ;;  %s796_s1 = inlined_call_operand.vmem [shape: f32[128,256], index: 1, kind: input, shape index: {}]   ;;  %s797_s3 = inlined_call_operand.vmem [shape: f32[256,128], index: 3, kind: input, shape index: {}]   ;;  %s798_s0 = inlined_call_operand.vmem [shape: f32[32,128], index: 0, kind: input, shape index: {}]   ;;  %s799_s2 = inlined_call_operand.vmem [shape: f32[1,256], index: 2, kind: input, shape index: {}]   ;;  %s800_s4 = inlined_call_operand.vmem [shape: f32[1,128], index: 4, kind: input, shape index: {}]   ;;  %s801_s5 = inlined_call_operand.vmem [shape: f32[1,128], index: 5, kind: input, shape index: {}]   ;;  %s802_s6 = inlined_call_operand.vmem [shape: f32[1,128], index: 6, kind: input, shape index: {}]   ;;  %s803_s7 = inlined_call_operand.vmem [shape: f32[32,128], index: 7, kind: output, shape index: {}]  }
   0x1   :  { %v31_v0 = vld [vmem:[%s796_s1 + $0x8] sm:$0xff]  ;;  %v33_v1 = vld [vmem:[%s796_s1 + $0x18] sm:$0xff]  ;;  %v30_v2 = vld [vmem:[%s796_s1] sm:$0xff]  ;;  %138 = vmatprep.mubr.f32.mxu0 %v501_v3 }
   0x2   :  { %v428_v4 = vpack.c.bf16 %v33_v1, %v31_v0  ;;  %v32_v5 = vld [vmem:[%s796_s1 + $0x10] sm:$0xff]  ;;  %v35_v6 = vld [vmem:[%s796_s1 + $0x28] sm:$0xff]  ;;  %v37_v7 = vld [vmem:[%s796_s1 + $0x38] sm:$0xff] }
   0x3   :  { %v430_v8 = vpack.c.bf16 %v32_v5, %v30_v2  ;;  %v432_v9 = vpack.c.bf16 %v37_v7, %v35_v6  ;;  %v34_v10 = vld [vmem:[%s796_s1 + $0x20] sm:$0xff]  ;;  %v36_v11 = vld [vmem:[%s796_s1 + $0x30] sm:$0xff]  ;;  %v39_v12 = vld [vmem:[%s796_s1 + $0x48] sm:$0xff] }
   0x4   :  { %429 = vmatprep.subr.bf16.mxu0 %v428_v4  ;;  %v41_v13 = vld [vmem:[%s796_s1 + $0x58] sm:$0xff]  ;;  %v434_v14 = vpack.c.bf16 %v36_v11, %v34_v10  ;;  %v38_v16 = vld [vmem:[%s796_s1 + $0x40] sm:$0xff]  ;;  %v40_v17 = vld [vmem:[%s796_s1 + $0x50] sm:$0xff] }
   0x5   :  { %431 = vmatpush1.bf16.msra.mxu0 %v430_v8  ;;  %v436_v15 = vpack.c.bf16 %v41_v13, %v39_v12  ;;  %v43_v18 = vld [vmem:[%s796_s1 + $0x68] sm:$0xff]  ;;  %v45_v19 = vld [vmem:[%s796_s1 + $0x78] sm:$0xff]  ;;  %v438_v20 = vpack.c.bf16 %v40_v17, %v38_v16  ;;  %v42_v22 = vld [vmem:[%s796_s1 + $0x60] sm:$0xff] }
   0x6   :  { %433 = vmatprep.subr.bf16.mxu0 %v432_v9  ;;  %v440_v21 = vpack.c.bf16 %v45_v19, %v43_v18  ;;  %v44_v23 = vld [vmem:[%s796_s1 + $0x70] sm:$0xff]  ;;  %v47_v24 = vld [vmem:[%s796_s1 + $0x88] sm:$0xff]  ;;  %v49_v25 = vld [vmem:[%s796_s1 + $0x98] sm:$0xff] }
   0x7   :  { %v46_v26 = vld [vmem:[%s796_s1 + $0x80] sm:$0xff]  ;;  %v48_v27 = vld [vmem:[%s796_s1 + $0x90] sm:$0xff]  ;;  %v442_v28 = vpack.c.bf16 %v44_v23, %v42_v22  ;;  %v51_v29 = vld [vmem:[%s796_s1 + $0xa8] sm:$0xff]  ;;  %v444_v34 = vpack.c.bf16 %v49_v25, %v47_v24 }
   0x8   :  { %v53_v30 = vld [vmem:[%s796_s1 + $0xb8] sm:$0xff]  ;;  %v187_v31 = vld [vmem:[%s797_s3 + $0x80] sm:$0xff]  ;;  %v188_v32 = vld [vmem:[%s797_s3 + $0x88] sm:$0xff]  ;;  %v446_v45 = vpack.c.bf16 %v48_v27, %v46_v26 }
   0x9   :  { %435 = vmatpush1.bf16.msra.mxu0 %v434_v14  ;;  %v171_v33 = vld [vmem:[%s797_s3] sm:$0xff]  ;;  %v460_v35 = vpack.c.bf16 %v188_v32, %v187_v31  ;;  %v172_v36 = vld [vmem:[%s797_s3 + $0x8] sm:$0xff]  ;;  %v189_v37 = vld [vmem:[%s797_s3 + $0x90] sm:$0xff]  ;;  %v448_v49 = vpack.c.bf16 %v53_v30, %v51_v29 }
   0xa   :  { %437 = vmatprep.subr.bf16.mxu0 %v436_v15  ;;  %v190_v38 = vld [vmem:[%s797_s3 + $0x98] sm:$0xff]  ;;  %v462_v39 = vpack.c.bf16 %v172_v36, %v171_v33  ;;  %v173_v41 = vld [vmem:[%s797_s3 + $0x10] sm:$0xff]  ;;  %v191_v43 = vld [vmem:[%s797_s3 + $0xa0] sm:$0xff] }
   0xb   :  { %v464_v40 = vpack.c.bf16 %v190_v38, %v189_v37  ;;  %v174_v42 = vld [vmem:[%s797_s3 + $0x18] sm:$0xff]  ;;  %461 = vmatprep.subr.bf16.mxu1 %v460_v35  ;;  %v192_v44 = vld [vmem:[%s797_s3 + $0xa8] sm:$0xff]  ;;  %v50_v46 = vld [vmem:[%s796_s1 + $0xa0] sm:$0xff]  ;;  %v64_v37 = vlaneseq }
   0xc   :  { %v52_v47 = vld [vmem:[%s796_s1 + $0xb0] sm:$0xff]  ;;  %463 = vmatpush3.bf16.msra.mxu1 %v462_v39  ;;  %v466_v48 = vpack.c.bf16 %v174_v42, %v173_v41  ;;  %v55_v50 = vld [vmem:[%s796_s1 + $0xc8] sm:$0xff]  ;;  %v468_v51 = vpack.c.bf16 %v192_v44, %v191_v43  ;;  %v175_v52 = vld [vmem:[%s797_s3 + $0x20] sm:$0xff] }
   0xd   :  { %439 = vmatpush1.bf16.msra.mxu0 %v438_v20  ;;  %465 = vmatprep.subr.bf16.mxu1 %v464_v40  ;;  %v176_v53 = vld [vmem:[%s797_s3 + $0x28] sm:$0xff]  ;;  %v57_v54 = vld [vmem:[%s796_s1 + $0xd8] sm:$0xff]  ;;  %v193_v55 = vld [vmem:[%s797_s3 + $0xb0] sm:$0xff]  ;;  %v450_v57 = vpack.c.bf16 %v52_v47, %v50_v46  ;;  %v65_v38 = vshrl.u32 %v64_v37, 7 }
   0xe   :  { %441 = vmatprep.subr.bf16.mxu0 %v440_v21  ;;  %v194_v56 = vld [vmem:[%s797_s3 + $0xb8] sm:$0xff]  ;;  %v54_v58 = vld [vmem:[%s796_s1 + $0xc0] sm:$0xff]  ;;  %v56_v59 = vld [vmem:[%s796_s1 + $0xd0] sm:$0xff]  ;;  %v470_v60 = vpack.c.bf16 %v176_v53, %v175_v52  ;;  %v452_v61 = vpack.c.bf16 %v57_v54, %v55_v50 }
   0xf   :  { %v59_v62 = vld [vmem:[%s796_s1 + $0xe8] sm:$0xff]  ;;  %v472_v63 = vpack.c.bf16 %v194_v56, %v193_v55  ;;  %v177_v0 = vld [vmem:[%s797_s3 + $0x30] sm:$0xff]  ;;  %v178_v1 = vld [vmem:[%s797_s3 + $0x38] sm:$0xff]  ;;  %v454_v6 = vpack.c.bf16 %v56_v59, %v54_v58  ;;  %v66_v39 = vsub.s32 0, %v65_v38  ;;  %v70_v41 = vsub.s32 1, %v65_v38 }
  0x10   :  { %467 = vmatpush3.bf16.msra.mxu1 %v466_v48  ;;  %v61_v2 = vld [vmem:[%s796_s1 + $0xf8] sm:$0xff]  ;;  %v195_v4 = vld [vmem:[%s797_s3 + $0xc0] sm:$0xff]  ;;  %v196_v5 = vld [vmem:[%s797_s3 + $0xc8] sm:$0xff]  ;;  %v474_v8 = vpack.c.bf16 %v178_v1, %v177_v0 }
  0x11   :  { %443 = vmatpush1.bf16.msra.mxu0 %v442_v28  ;;  %469 = vmatprep.subr.bf16.mxu1 %v468_v51  ;;  %v58_v7 = vld [vmem:[%s796_s1 + $0xe0] sm:$0xff]  ;;  %v456_v9 = vpack.c.bf16 %v61_v2, %v59_v62  ;;  %v60_v10 = vld [vmem:[%s796_s1 + $0xf0] sm:$0xff]  ;;  %v476_v11 = vpack.c.bf16 %v196_v5, %v195_v4  ;;  %v180_v13 = vld [vmem:[%s797_s3 + $0x48] sm:$0xff] }
  0x12   :  { %445 = vmatprep.subr.bf16.mxu0 %v444_v34  ;;  %v179_v12 = vld [vmem:[%s797_s3 + $0x40] sm:$0xff]  ;;  %v197_v14 = vld [vmem:[%s797_s3 + $0xd0] sm:$0xff]  ;;  %v198_v15 = vld [vmem:[%s797_s3 + $0xd8] sm:$0xff]  ;;  %v458_v16 = vpack.c.bf16 %v60_v10, %v58_v7 }
  0x13   :  { %v478_v17 = vpack.c.bf16 %v180_v13, %v179_v12  ;;  %v480_v18 = vpack.c.bf16 %v198_v15, %v197_v14  ;;  %v181_v19 = vld [vmem:[%s797_s3 + $0x50] sm:$0xff]  ;;  %v182_v20 = vld [vmem:[%s797_s3 + $0x58] sm:$0xff]  ;;  %v199_v21 = vld [vmem:[%s797_s3 + $0xe0] sm:$0xff] }
  0x14   :  { %471 = vmatpush3.bf16.msra.mxu1 %v470_v60  ;;  %v200_v22 = vld [vmem:[%s797_s3 + $0xe8] sm:$0xff]  ;;  %v720_v23 = vld [vmem:[%s798_s0] sm:$0xff]  ;;  %v482_v24 = vpack.c.bf16 %v182_v20, %v181_v19  ;;  %v734_v27 = vld [vmem:[%s798_s0 + $0x10] sm:$0xff] }
  0x15   :  { %447 = vmatpush1.bf16.msra.mxu0 %v446_v45  ;;  %473 = vmatprep.subr.bf16.mxu1 %v472_v63  ;;  %v484_v25 = vpack.c.bf16 %v200_v22, %v199_v21  ;;  %v727_v26 = vld [vmem:[%s798_s0 + $0x8] sm:$0xff]  ;;  %v741_v28 = vld [vmem:[%s798_s0 + $0x18] sm:$0xff]  ;;  %v183_v29 = vld [vmem:[%s797_s3 + $0x60] sm:$0xff] }
  0x16   :  { %449 = vmatprep.subr.bf16.mxu0 %v448_v49  ;;  %v184_v30 = vld [vmem:[%s797_s3 + $0x68] sm:$0xff]  ;;  %v202_v32 = vld [vmem:[%s797_s3 + $0xf8] sm:$0xff]  ;;  %v185_v34 = vld [vmem:[%s797_s3 + $0x70] sm:$0xff] }
  0x17   :  { %v486_v31 = vpack.c.bf16 %v184_v30, %v183_v29  ;;  %v186_v35 = vld [vmem:[%s797_s3 + $0x78] sm:$0xff]  ;;  %v62_v40 = vld [vmem:[%s799_s2] sm:$0x3] }
  0x18   :  { %475 = vmatpush3.bf16.msra.mxu1 %v474_v8  ;;  %v490_v36 = vpack.c.bf16 %v186_v35, %v185_v34  ;;  %v67_v42 = vrot.slane %v62_v40, %v66_v39  ;;  %v71_v43 = vrot.slane %v62_v40, %v70_v41 }
  0x19   :  { %451 = vmatpush1.bf16.msra.mxu0 %v450_v57  ;;  %477 = vmatprep.subr.bf16.mxu1 %v476_v11 }
  0x1a   :  { %453 = vmatprep.subr.bf16.mxu0 %v452_v61 }
  0x1c   :  { %479 = vmatpush3.bf16.msra.mxu1 %v478_v17 }
  0x1d   :  { %455 = vmatpush1.bf16.msra.mxu0 %v454_v6  ;;  %481 = vmatprep.subr.bf16.mxu1 %v480_v18  ;;  %v381_v6 = vld [vmem:[%s800_s4] ss:$0 sm:$0xff] }
  0x1e   :  { %457 = vmatprep.subr.bf16.mxu0 %v456_v9 }
  0x20   :  { %483 = vmatpush3.bf16.msra.mxu1 %v482_v24 }
  0x21   :  { %459 = vmatpush1.bf16.msra.mxu0 %v458_v16  ;;  %485 = vmatprep.subr.bf16.mxu1 %v484_v25 }
  0x24   :  { %139 = vmatmul.mubr.f32.vlgmr.msra.gmra.mrb[0].mxu0 %v720_v23  ;;  %487 = vmatpush3.bf16.msra.mxu1 %v486_v31 }
  0x25   :  { %144 = vmatprep.mubr.f32.mxu0 %v501_v3 }
  0x28   :  { %145 = vmatmul.mubr.f32.gmra.mrb[2].mxu0 %v727_v26 }
  0x29   :  { %150 = vmatprep.mubr.f32.mxu0 %v501_v3 }
  0x2c   :  { %151 = vmatmul.mubr.f32.gmra.mrb[4].mxu0 %v734_v27 }
  0x2d   :  { %156 = vmatprep.mubr.f32.mxu0 %v501_v3  ;;  %v201_v3 = vld [vmem:[%s797_s3 + $0xf0] sm:$0xff] }
  0x2e   :  { %v488_v33 = vpack.c.bf16 %v202_v32, %v201_v3 }
  0x30   :  { %157 = vmatmul.mubr.f32.gmra.mrb[6].mxu0 %v741_v28  ;;  %489 = vmatprep.subr.bf16.mxu1 %v488_v33 }
  0x31   :  { %491 = vmatpush3.bf16.msra.mxu1 %v490_v36 }
  0xf7   :  { %v140_v44 = vpop.f32.mrb[0].mxu0 }
  0xf8   :  { %v141_v45 = vadd.f32 %v140_v44, %v67_v42  ;;  %v142_v46 = vpop.f32.mrb[1].mxu0 }
  0xf9   :  { %v143_v47 = vadd.f32 %v142_v46, %v71_v43 }
  0xfa   :  { %v163_v50 = vmax.f32 %v141_v45, 0.0 }
  0xfb   :  { %v146_v48 = vpop.f32.mrb[2].mxu0  ;;  %v164_v49 = vmax.f32 %v143_v47, 0.0 }
  0xfc   :  { %v147_v51 = vadd.f32 %v146_v48, %v67_v42  ;;  %v148_v52 = vpop.f32.mrb[3].mxu0 }
  0xfd   :  { %v149_v53 = vadd.f32 %v148_v52, %v71_v43  ;;  %274 = vmatprep.mubr.f32.mxu1 %v164_v49 }
  0xfe   :  { %275 = vmatmul.mubr.f32.vlgmr.msra.gmra.mrb[0].mxu1 %v163_v50  ;;  %v165_v56 = vmax.f32 %v147_v51, 0.0 }
  0xff   :  { %v166_v54 = vmax.f32 %v149_v53, 0.0  ;;  %v152_v55 = vpop.f32.mrb[4].mxu0 }
 0x100   :  { %v153_v57 = vadd.f32 %v152_v55, %v67_v42  ;;  %v154_v58 = vpop.f32.mrb[5].mxu0 }
 0x101   :  { %v155_v59 = vadd.f32 %v154_v58, %v71_v43  ;;  %279 = vmatprep.mubr.f32.mxu1 %v166_v54 }
 0x102   :  { %v167_v60 = vmax.f32 %v153_v57, 0.0  ;;  %280 = vmatmul.mubr.f32.gmra.mrb[2].mxu1 %v165_v56  ;;  %v382_v57 = vld [vmem:[%s801_s5] ss:$0 sm:$0xff] }
 0x103   :  { %v168_v61 = vmax.f32 %v155_v59, 0.0  ;;  %v158_v62 = vpop.f32.mrb[6].mxu0 }
 0x104   :  { %v159_v63 = vadd.f32 %v158_v62, %v67_v42  ;;  %v160_v0 = vpop.f32.mrb[7].mxu0 }
 0x105   :  { %v161_v1 = vadd.f32 %v160_v0, %v71_v43  ;;  %284 = vmatprep.mubr.f32.mxu1 %v168_v61 }
 0x106   :  { %v169_v2 = vmax.f32 %v159_v63, 0.0  ;;  %285 = vmatmul.mubr.f32.gmra.mrb[4].mxu1 %v167_v60  ;;  %v383_v60 = vld [vmem:[%s802_s6] ss:$0 sm:$0xff] }
 0x107   :  { %v170_v4 = vmax.f32 %v161_v1, 0.0 }
 0x109   :  { %289 = vmatprep.mubr.f32.mxu1 %v170_v4 }
 0x10a   :  { %290 = vmatmul.mubr.f32.gmra.mrb[6].mxu1 %v169_v2 }
 0x1d1   :  { %v416_v5 = vpop.f32.mrb[0].mxu1 }
 0x1d2   :  { %v417_v7 = vpop.f32.mrb[1].mxu1 }
 0x1d3   :  { %v418_v8 = vadd.f32 %v417_v7, %v416_v5 }
 0x1d5   :  { %v277_v9 = vadd.f32 %v418_v8, %v381_v6  ;;  %v419_v10 = vpop.f32.mrb[2].mxu1 }
 0x1d6   :  { %v420_v11 = vpop.f32.mrb[3].mxu1 }
 0x1d7   :  { %v421_v12 = vadd.f32 %v420_v11, %v419_v10  ;;  %v295_v13 = vadd.f32 %v277_v9, %v720_v23 }
 0x1d9   :  { %v282_v14 = vadd.f32 %v421_v12, %v381_v6  ;;  %v422_v15 = vpop.f32.mrb[4].mxu1  ;;  %299 = vadd.xlane.f32.xlu0 %v295_v13  ;;  %v311_v18 = vmul.f32 %v295_v13, %v295_v13 }
 0x1da   :  { %v423_v16 = vpop.f32.mrb[5].mxu1 }
 0x1db   :  { %v424_v17 = vadd.f32 %v423_v16, %v422_v15  ;;  %v770_v19 = vadd.f32 %v282_v14, %v727_v26 }
 0x1dd   :  { %v287_v20 = vadd.f32 %v424_v17, %v381_v6  ;;  %v425_v21 = vpop.f32.mrb[6].mxu1  ;;  %315 = vadd.xlane.f32.xlu0 %v311_v18  ;;  %v312_v22 = vmul.f32 %v770_v19, %v770_v19 }
 0x1de   :  { %v426_v24 = vpop.f32.mrb[7].mxu1 }
 0x1df   :  { %v427_v25 = vadd.f32 %v426_v24, %v425_v21  ;;  %317 = vadd.xlane.f32.xlu1 %v312_v22  ;;  %v297_v23 = vadd.f32 %v287_v20, %v734_v27 }
 0x1e1   :  { %v292_v29 = vadd.f32 %v427_v25, %v381_v6  ;;  %301 = vadd.xlane.f32.xlu0 %v770_v19  ;;  %v313_v30 = vmul.f32 %v297_v23, %v297_v23 }
 0x1e3   :  { %303 = vadd.xlane.f32.xlu1 %v297_v23  ;;  %v298_v26 = vadd.f32 %v292_v29, %v741_v28 }
 0x1e5   :  { %319 = vadd.xlane.f32.xlu0 %v313_v30  ;;  %v314_v31 = vmul.f32 %v298_v26, %v298_v26 }
 0x1e7   :  { %305 = vadd.xlane.f32.xlu1 %v298_v26 }
 0x1eb   :  { %321 = vadd.xlane.f32.xlu1 %v314_v31 }
 0x266   :  { %v300_v3 = vpop.xlane.xlu0 %299 }
 0x267   :  { %v307_v32 = vmul.f32 0.0078125, %v300_v3 }
 0x269   :  { %v327_v34 = vmul.f32 %v307_v32, %v307_v32  ;;  %v335_v55 = vsub.f32 %v295_v13, %v307_v32 }
 0x26a   :  { %v316_v33 = vpop.xlane.xlu0 %315 }
 0x26b   :  { %v323_v35 = vmul.f32 0.0078125, %v316_v33 }
 0x26c   :  { %v318_v36 = vpop.xlane.xlu1 %317 }
 0x26d   :  { %v331_v37 = vsub.f32 %v323_v35, %v327_v34  ;;  %v324_v41 = vmul.f32 0.0078125, %v318_v36 }
 0x26e   :  { %v302_v38 = vpop.xlane.xlu0 %301 }
 0x26f   :  { %v339_v27 = vadd.f32 1e-05, %v331_v37  ;;  %v308_v39 = vmul.f32 0.0078125, %v302_v38 }
 0x270   :  { %v304_v40 = vpop.xlane.xlu1 %303 }
 0x271   :  { %493 = vrsqrt.f32 %v339_v27  ;;  %v328_v42 = vmul.f32 %v308_v39, %v308_v39  ;;  %v309_v43 = vmul.f32 0.0078125, %v304_v40  ;;  %v336_v0 = vsub.f32 %v770_v19, %v308_v39 }
 0x272   :  { %v320_v44 = vpop.xlane.xlu0 %319 }
 0x273   :  { %v332_v28 = vsub.f32 %v324_v41, %v328_v42  ;;  %v329_v45 = vmul.f32 %v309_v43, %v309_v43  ;;  %v325_v46 = vmul.f32 0.0078125, %v320_v44  ;;  %v337_v4 = vsub.f32 %v297_v23, %v309_v43 }
 0x274   :  { %v306_v47 = vpop.xlane.xlu1 %305 }
 0x275   :  { %v340_v48 = vadd.f32 1e-05, %v332_v28  ;;  %v333_v49 = vsub.f32 %v325_v46, %v329_v45  ;;  %v310_v50 = vmul.f32 0.0078125, %v306_v47 }
 0x277   :  { %495 = vrsqrt.f32 %v340_v48  ;;  %v341_v51 = vadd.f32 1e-05, %v333_v49  ;;  %v330_v53 = vmul.f32 %v310_v50, %v310_v50  ;;  %v338_v11 = vsub.f32 %v298_v26, %v310_v50 }
 0x278   :  { %v322_v52 = vpop.xlane.xlu1 %321 }
 0x279   :  { %497 = vrsqrt.f32 %v341_v51  ;;  %v326_v54 = vmul.f32 0.0078125, %v322_v52 }
 0x27b   :  { %v494_v56 = vpop.eup %493  ;;  %v334_v58 = vsub.f32 %v326_v54, %v330_v53 }
 0x27c   :  { %v347_v59 = vmul.f32 %v494_v56, %v335_v55 }
 0x27d   :  { %v342_v61 = vadd.f32 1e-05, %v334_v58 }
 0x27e   :  { %v358_v62 = vmul.f32 %v382_v57, %v347_v59 }
 0x27f   :  { %499 = vrsqrt.f32 %v342_v61 }
 0x280   :  { %v369_v63 = vadd.f32 %v383_v60, %v358_v62 }
 0x281   :  { %v496_v1 = vpop.eup %495 }
 0x282   :  { %373 = vst [vmem:[%s803_s7] sm:$0xff] %v369_v63  ;;  %v348_v2 = vmul.f32 %v496_v1, %v336_v0 }
 0x283   :  { %v498_v5 = vpop.eup %497 }
 0x284   :  { %v359_v6 = vmul.f32 %v382_v57, %v348_v2  ;;  %v349_v7 = vmul.f32 %v498_v5, %v337_v4 }
 0x286   :  { %v370_v8 = vadd.f32 %v383_v60, %v359_v6  ;;  %v360_v9 = vmul.f32 %v382_v57, %v349_v7 }
 0x288   :  { %374 = vst [vmem:[%s803_s7 + $0x8] sm:$0xff] %v370_v8  ;;  %v371_v10 = vadd.f32 %v383_v60, %v360_v9 }
 0x289   :  { %v500_v12 = vpop.eup %499 }
 0x28a   :  { %375 = vst [vmem:[%s803_s7 + $0x10] sm:$0xff] %v371_v10  ;;  %v350_v13 = vmul.f32 %v500_v12, %v338_v11 }
 0x28c   :  { %v361_v14 = vmul.f32 %v382_v57, %v350_v13 }
 0x28e   :  { %v372_v15 = vadd.f32 %v383_v60, %v361_v14 }
 0x290   :  { %376 = vst [vmem:[%s803_s7 + $0x18] sm:$0xff] %v372_v15 }

// kernel: transformer_monotonic_forward.60
= control target key start
LH: loop header
LB: loop body
LE: loop exit
PB: predicated region body
PF: predicated region fallthrough
CT: control target
= control target key end

     0   :  { %s128_s0 = inlined_call_operand.vmem [shape: f32[16,128], index: 0, kind: input, shape index: {}]   ;;  %s129_s1 = inlined_call_operand.vmem [shape: f32[16,128], index: 1, kind: input, shape index: {}]   ;;  %s130_s2 = inlined_call_operand.vmem [shape: f32[1,128], index: 2, kind: input, shape index: {}]   ;;  %s131_s3 = inlined_call_operand.vmem [shape: f32[1,128], index: 3, kind: input, shape index: {}]   ;;  %s132_s4 = inlined_call_operand.vmem [shape: f32[16,128], index: 4, kind: output, shape index: {}]  }
   0x1   :  { %v17_v0 = vld [vmem:[%s128_s0] sm:$0xff]  ;;  %v18_v2 = vld [vmem:[%s128_s0 + $0x8] sm:$0xff] }
   0x2   :  { %v19_v1 = vld [vmem:[%s129_s1] sm:$0xff]  ;;  %v20_v4 = vld [vmem:[%s129_s1 + $0x8] sm:$0xff] }
   0x3   :  { %v21_v3 = vadd.f32 %v19_v1, %v17_v0  ;;  %v22_v5 = vadd.f32 %v20_v4, %v18_v2  ;;  %v73_v24 = vld [vmem:[%s130_s2] ss:$0 sm:$0xff] }
   0x4   :  { %v74_v26 = vld [vmem:[%s131_s3] ss:$0 sm:$0xff] }
   0x5   :  { %23 = vadd.xlane.f32.xlu0 %v21_v3  ;;  %v29_v6 = vmul.f32 %v21_v3, %v21_v3  ;;  %v30_v7 = vmul.f32 %v22_v5, %v22_v5 }
   0x7   :  { %31 = vadd.xlane.f32.xlu1 %v29_v6 }
   0x9   :  { %25 = vadd.xlane.f32.xlu0 %v22_v5 }
   0xb   :  { %33 = vadd.xlane.f32.xlu1 %v30_v7 }
  0x92   :  { %v24_v8 = vpop.xlane.xlu0 %23 }
  0x93   :  { %v27_v9 = vmul.f32 0.0078125, %v24_v8 }
  0x94   :  { %v32_v10 = vpop.xlane.xlu1 %31 }
  0x95   :  { %v37_v11 = vmul.f32 %v27_v9, %v27_v9  ;;  %v35_v12 = vmul.f32 0.0078125, %v32_v10  ;;  %v41_v22 = vsub.f32 %v21_v3, %v27_v9 }
  0x96   :  { %v26_v13 = vpop.xlane.xlu0 %25 }
  0x97   :  { %v39_v14 = vsub.f32 %v35_v12, %v37_v11  ;;  %v28_v15 = vmul.f32 0.0078125, %v26_v13 }
  0x98   :  { %v34_v16 = vpop.xlane.xlu1 %33 }
  0x99   :  { %v43_v17 = vadd.f32 1e-05, %v39_v14  ;;  %v38_v18 = vmul.f32 %v28_v15, %v28_v15  ;;  %v36_v19 = vmul.f32 0.0078125, %v34_v16  ;;  %v42_v28 = vsub.f32 %v22_v5, %v28_v15 }
  0x9b   :  { %75 = vrsqrt.f32 %v43_v17  ;;  %v40_v20 = vsub.f32 %v36_v19, %v38_v18 }
  0x9d   :  { %v44_v21 = vadd.f32 1e-05, %v40_v20 }
  0x9f   :  { %77 = vrsqrt.f32 %v44_v21 }
  0xa5   :  { %v76_v23 = vpop.eup %75 }
  0xa6   :  { %v47_v25 = vmul.f32 %v76_v23, %v41_v22 }
  0xa8   :  { %v56_v27 = vmul.f32 %v73_v24, %v47_v25 }
  0xa9   :  { %v78_v29 = vpop.eup %77 }
  0xaa   :  { %v65_v30 = vadd.f32 %v74_v26, %v56_v27  ;;  %v48_v31 = vmul.f32 %v78_v29, %v42_v28 }
  0xac   :  { %67 = vst [vmem:[%s132_s4] sm:$0xff] %v65_v30  ;;  %v57_v32 = vmul.f32 %v73_v24, %v48_v31 }
  0xae   :  { %v66_v33 = vadd.f32 %v74_v26, %v57_v32 }
  0xb0   :  { %68 = vst [vmem:[%s132_s4 + $0x8] sm:$0xff] %v66_v33 }

// kernel: transformer_monotonic_forward.58
= control target key start
LH: loop header
LB: loop body
LE: loop exit
PB: predicated region body
PF: predicated region fallthrough
CT: control target
= control target key end

     0   :  { %s1132_s15 = smov 0   ;;  %s1212_s0 = inlined_call_operand.vmem [shape: f32[2,4,8,32], index: 0, kind: input, shape index: {}]   ;;  %s1213_s1 = inlined_call_operand.vmem [shape: f32[2,4,8,32], index: 1, kind: input, shape index: {}]   ;;  %s1214_s2 = inlined_call_operand.vmem [shape: f32[2,4,8,32], index: 2, kind: input, shape index: {}]   ;;  %s1215_s3 = inlined_call_operand.vmem [shape: f32[8,8], index: 3, kind: input, shape index: {}]   ;;  %s1216_s4 = inlined_call_operand.vmem [shape: f32[2,4,8,32], index: 4, kind: output, shape index: {}]  }
   0x1 LB: > { %s984_s16 = sadd.s32 4294967295, %s1103_s15   ;;  %p988_p0 = scmp.ge.s32.totalorder %s1103_s15, 1  ;;  %s1103_s15 = sphi %s1132_s15, %s14_s15  }
   0x2   : > { %p182_p1 = scmp.lt.s32.totalorder %s1103_s15, 3 }
   0x4   : > { %p183_p2 = pnand %p988_p0, %p182_p1 }
   0x5   : > { %p218_p3 = scmp.lt.s32.totalorder (!%p183_p2), %s984_s16, 1  ;;  %v1105_v0 = vmov (!%p183_p2), 0.0   ;;  %vm1106_vm0 = vmmov (!%p183_p2), 0   ;;  %vm250_vm1 = vcmask (!%p183_p2), 261120   ;;  %v559_v11 = vld [vmem:[%s1215_s3] sm:$0xff] (!%p183_p2)  ;;  %vm564_vm2 = vcmask (!%p183_p2), 64512  }
   0x6   : > { %186 = sbr.rel (%p183_p2) target bundleno = 771 (0x303), region = 36  ;;  %1031 = vmatprep.subr.mxu0 (!%p183_p2), %v1105_v0  ;;  %1033 = vmatprep.mubr.msk.f32.mxu0 (!%p183_p2), %vm1106_vm0, %v1105_v0 }
   0x7   : > { %1036 = vmatprep.subr.mxu1 (!%p183_p2), %v1105_v0  ;;  %1038 = vmatprep.mubr.msk.f32.mxu1 (!%p183_p2), %vm1106_vm0, %v1105_v0 }
   0xd   : > { %s1218_s16 = smov (!%p218_p3, %s984_s16), 1 }
   0xe   : > { %s1146_s17 = sshll.u32 %s1218_s16, 5 }
   0xf   : > { %s227_s20 = scalar_lea.vmem %s1213_s1, %s1146_s17  ;;  %s222_s23 = scalar_lea.vmem %s1212_s0, %s1146_s17 }
  0x10   : > { %v242_v1 = vld [vmem:[%s227_s20] sm:$0xff]  ;;  %v243_v2 = vld [vmem:[%s227_s20 + $0x8] sm:$0xff]  ;;  %v244_v5 = vld [vmem:[%s227_s20 + $0x10] sm:$0xff]  ;;  %s232_s28 = scalar_lea.vmem %s1214_s2, %s1146_s17  ;;  %s237_s5 = scalar_lea.vmem %s1216_s4, %s1146_s17 }
  0x11   : > { %1032 = vmatpush3.xpose.msk.msra.mxu0 %vm250_vm1, %v242_v1  ;;  %v238_v3 = vld [vmem:[%s222_s23] sm:$0xff]  ;;  %1037 = vmatpush3.xpose.msk.msra.mxu1 %vm250_vm1, %v243_v2  ;;  %v239_v4 = vld [vmem:[%s222_s23 + $0x8] sm:$0xff]  ;;  %v245_v6 = vld [vmem:[%s227_s20 + $0x18] sm:$0xff] }
  0x12   : > { %1041 = vmatprep.subr.mxu0 %v1105_v0  ;;  %1046 = vmatprep.subr.mxu1 %v1105_v0  ;;  %v240_v7 = vld [vmem:[%s222_s23 + $0x10] sm:$0xff]  ;;  %v241_v8 = vld [vmem:[%s222_s23 + $0x18] sm:$0xff]  ;;  %v246_v50 = vld [vmem:[%s232_s28] sm:$0xff] }
  0x13   : > { %v247_v51 = vld [vmem:[%s232_s28 + $0x8] sm:$0xff]  ;;  %v248_v58 = vld [vmem:[%s232_s28 + $0x10] sm:$0xff]  ;;  %v249_v62 = vld [vmem:[%s232_s28 + $0x18] sm:$0xff] }
  0x14   : > { %1034 = vmatmul.mubr.msk.f32.vlgmr.msra.gmra.mrb[0].mxu0 %vm250_vm1, %v238_v3  ;;  %1039 = vmatmul.mubr.msk.f32.vlgmr.msra.gmra.mrb[0].mxu1 %vm250_vm1, %v239_v4 }
  0x15   : > { %1042 = vmatpush3.xpose.msk.msra.mxu0 %vm250_vm1, %v244_v5  ;;  %1043 = vmatprep.mubr.msk.f32.mxu0 %vm1106_vm0, %v1105_v0 }
  0x16   : > { %1047 = vmatpush3.xpose.msk.msra.mxu1 %vm250_vm1, %v245_v6  ;;  %1048 = vmatprep.mubr.msk.f32.mxu1 %vm1106_vm0, %v1105_v0 }
  0x17   : > { %1051 = vmatprep.subr.mxu0 %v1105_v0  ;;  %1056 = vmatprep.subr.mxu1 %v1105_v0 }
  0x18   : > { %1044 = vmatmul.mubr.msk.f32.vlgmr.msra.gmra.mrb[2].mxu0 %vm250_vm1, %v240_v7 }
  0x19   : > { %1049 = vmatmul.mubr.msk.f32.vlgmr.msra.gmra.mrb[2].mxu1 %vm250_vm1, %v241_v8  ;;  %1053 = vmatprep.mubr.msk.f32.mxu0 %vm1106_vm0, %v1105_v0 }
  0x1a   : > { %1058 = vmatprep.mubr.msk.f32.mxu1 %vm1106_vm0, %v1105_v0  ;;  %1052 = vmatpush3.msra.mxu0 %v246_v50 }
  0x1b   : > { %1061 = vmatprep.subr.mxu0 %v1105_v0  ;;  %1057 = vmatpush3.msra.mxu1 %v247_v51 }
  0x1c   : > { %1066 = vmatprep.subr.mxu1 %v1105_v0 }
  0xe7   : > { %v323_v9 = vpop.f32.mrb[0].mxu0  ;;  %v399_v10 = vpop.f32.mrb[0].mxu1 }
  0xe8   : > { %v555_v12 = vmul.f32 0.17677669, %v323_v9  ;;  %v1035_v13 = vpop.f32.mrb[1].mxu0  ;;  %v556_v14 = vmul.f32 0.17677669, %v399_v10  ;;  %v1040_v15 = vpop.f32.mrb[1].mxu1 }
  0xea   : > { %v560_v16 = vadd.f32 %v559_v11, %v555_v12  ;;  %v561_v17 = vadd.f32 %v559_v11, %v556_v14 }
  0xeb   : > { %v475_v18 = vpop.f32.mrb[2].mxu0 }
  0xec   : > { %v557_v19 = vmul.f32 0.17677669, %v475_v18  ;;  %v1045_v20 = vpop.f32.mrb[3].mxu0  ;;  %v565_v21 = vsel %vm564_vm2, %v560_v16, -inf  ;;  %v551_v22 = vpop.f32.mrb[2].mxu1  ;;  %v568_v25 = vsel %vm564_vm2, %v561_v17, -inf }
  0xed   : > { %566 = vmax.xlane.f32.xlu0 %v565_v21  ;;  %v558_v23 = vmul.f32 0.17677669, %v551_v22  ;;  %v1050_v24 = vpop.f32.mrb[3].mxu1 }
  0xee   : > { %v562_v26 = vadd.f32 %v559_v11, %v557_v19 }
  0xef   : > { %v563_v27 = vadd.f32 %v559_v11, %v558_v23 }
  0xf0   : > { %v571_v28 = vsel %vm564_vm2, %v562_v26, -inf }
  0xf1   : > { %569 = vmax.xlane.f32.xlu0 %v568_v25  ;;  %572 = vmax.xlane.f32.xlu1 %v571_v28  ;;  %v574_v29 = vsel %vm564_vm2, %v563_v27, -inf }
  0xf5   : > { %575 = vmax.xlane.f32.xlu1 %v574_v29 }
 0x17a   : > { %v567_v30 = vpop.xlane.xlu0 %566 }
 0x17b   : > { %v577_v31 = vsub.f32 %v560_v16, %v567_v30 }
 0x17d   : > { %v581_v32 = vmul.f32 1.442695, %v577_v31 }
 0x17e   : > { %v570_v33 = vpop.xlane.xlu0 %569  ;;  %v573_v34 = vpop.xlane.xlu1 %572 }
 0x17f   : > { %1081 = vpow2.f32 %v581_v32  ;;  %v578_v35 = vsub.f32 %v561_v17, %v570_v33  ;;  %v579_v36 = vsub.f32 %v562_v26, %v573_v34 }
 0x181   : > { %v583_v37 = vmul.f32 1.442695, %v578_v35  ;;  %v585_v38 = vmul.f32 1.442695, %v579_v36 }
 0x182   : > { %v576_v39 = vpop.xlane.xlu1 %575 }
 0x183   : > { %1083 = vpow2.f32 %v583_v37  ;;  %v580_v40 = vsub.f32 %v563_v27, %v576_v39 }
 0x184   : > { %1085 = vpow2.f32 %v585_v38 }
 0x185   : > { %v587_v41 = vmul.f32 1.442695, %v580_v40 }
 0x187   : > { %1087 = vpow2.f32 %v587_v41 }
 0x189   : > { %v1082_v42 = vpop.eup %1081 }
 0x18a   : > { %v589_v43 = vsel %vm564_vm2, %v1082_v42, 0.0 }
 0x18b   : > { %590 = vadd.xlane.f32.xlu0 %v589_v43 }
 0x18d   : > { %v1084_v44 = vpop.eup %1083 }
 0x18e   : > { %v1086_v45 = vpop.eup %1085  ;;  %v592_v46 = vsel %vm564_vm2, %v1084_v44, 0.0 }
 0x18f   : > { %593 = vadd.xlane.f32.xlu1 %v592_v46  ;;  %v595_v47 = vsel %vm564_vm2, %v1086_v45, 0.0 }
 0x190   : > { %596 = vadd.xlane.f32.xlu0 %v595_v47 }
 0x191   : > { %v1088_v48 = vpop.eup %1087 }
 0x192   : > { %v598_v49 = vsel %vm564_vm2, %v1088_v48, 0.0 }
 0x193   : > { %599 = vadd.xlane.f32.xlu1 %v598_v49 }
 0x218   : > { %v591_v52 = vpop.xlane.xlu0 %590 }
 0x219   : > { %1089 = vrcp.f32 %v591_v52 }
 0x21c   : > { %v594_v53 = vpop.xlane.xlu1 %593 }
 0x21d   : > { %v597_v54 = vpop.xlane.xlu0 %596  ;;  %1091 = vrcp.f32 %v594_v53 }
 0x21e   : > { %1093 = vrcp.f32 %v597_v54 }
 0x220   : > { %v600_v55 = vpop.xlane.xlu1 %599 }
 0x221   : > { %1095 = vrcp.f32 %v600_v55 }
 0x223   : > { %v1090_v56 = vpop.eup %1089 }
 0x224   : > { %v602_v57 = vmul.f32 %v1090_v56, %v1082_v42 }
 0x226   : > { %1054 = vmatmul.mubr.msk.f32.vlgmr.msra.gmra.mrb[4].mxu0 %vm564_vm2, %v602_v57 }
 0x227   : > { %v1092_v59 = vpop.eup %1091  ;;  %1062 = vmatpush3.msra.mxu0 %v248_v58  ;;  %1063 = vmatprep.mubr.msk.f32.mxu0 %vm1106_vm0, %v1105_v0 }
 0x228   : > { %v1094_v60 = vpop.eup %1093  ;;  %v604_v61 = vmul.f32 %v1092_v59, %v1084_v44 }
 0x229   : > { %v606_v63 = vmul.f32 %v1094_v60, %v1086_v45 }
 0x22a   : > { %1059 = vmatmul.mubr.msk.f32.vlgmr.msra.gmra.mrb[4].mxu1 %vm564_vm2, %v604_v61 }
 0x22b   : > { %v1096_v1 = vpop.eup %1095  ;;  %1064 = vmatmul.mubr.msk.f32.vlgmr.msra.gmra.mrb[6].mxu0 %vm564_vm2, %v606_v63  ;;  %1067 = vmatpush3.msra.mxu1 %v249_v62 }
 0x22c   : > { %v608_v2 = vmul.f32 %v1096_v1, %v1088_v48  ;;  %1068 = vmatprep.mubr.msk.f32.mxu1 %vm1106_vm0, %v1105_v0 }
 0x22e   : > { %1069 = vmatmul.mubr.msk.f32.vlgmr.msra.gmra.mrb[6].mxu1 %vm564_vm2, %v608_v2 }
 0x2f9   : > { %v678_v3 = vpop.f32.mrb[4].mxu0 }
 0x2fa   : > { %901 = vst.msk [vmem:[%s237_s5] sm:$0xff] %vm250_vm1, %v678_v3  ;;  %v1055_v4 = vpop.f32.mrb[5].mxu0 }
 0x2fd   : > { %v751_v5 = vpop.f32.mrb[4].mxu1 }
 0x2fe   : > { %902 = vst.msk [vmem:[%s237_s5 + $0x8] sm:$0xff] %vm250_vm1, %v751_v5  ;;  %v824_v6 = vpop.f32.mrb[6].mxu0  ;;  %v1060_v7 = vpop.f32.mrb[5].mxu1 }
 0x2ff   : > { %903 = vst.msk [vmem:[%s237_s5 + $0x10] sm:$0xff] %vm250_vm1, %v824_v6  ;;  %v1065_v8 = vpop.f32.mrb[7].mxu0 }
 0x301   : > { %v897_v9 = vpop.f32.mrb[6].mxu1 }
 0x302   : > { %904 = vst.msk [vmem:[%s237_s5 + $0x18] sm:$0xff] %vm250_vm1, %v897_v9  ;;  %v1070_v0 = vpop.f32.mrb[7].mxu1 }
 0x303 PF: > { %s14_s15 = sadd.s32 1, %s1103_s15  }
 0x304   : > { %p11_p4 = scmp.ge.s32.totalorder %s14_s15, 4  }
 0x306   :  { %13 = sbr.rel (!%p11_p4) target bundleno = 1 (0x1), region = 72 }

// kernel: transformer_monotonic_forward.67
= control target key start
LH: loop header
LB: loop body
LE: loop exit
PB: predicated region body
PF: predicated region fallthrough
CT: control target
= control target key end

     0   :  { %v429_v3 = vmov 0.0   ;;  %s688_s1 = inlined_call_operand.vmem [shape: f32[128,256], index: 1, kind: input, shape index: {}]   ;;  %s689_s3 = inlined_call_operand.vmem [shape: f32[256,128], index: 3, kind: input, shape index: {}]   ;;  %s690_s0 = inlined_call_operand.vmem [shape: f32[16,128], index: 0, kind: input, shape index: {}]   ;;  %s691_s2 = inlined_call_operand.vmem [shape: f32[1,256], index: 2, kind: input, shape index: {}]   ;;  %s692_s4 = inlined_call_operand.vmem [shape: f32[1,128], index: 4, kind: input, shape index: {}]   ;;  %s693_s5 = inlined_call_operand.vmem [shape: f32[1,128], index: 5, kind: input, shape index: {}]   ;;  %s694_s6 = inlined_call_operand.vmem [shape: f32[1,128], index: 6, kind: input, shape index: {}]   ;;  %s695_s7 = inlined_call_operand.vmem [shape: f32[16,128], index: 7, kind: output, shape index: {}]  }
   0x1   :  { %v29_v0 = vld [vmem:[%s688_s1 + $0x8] sm:$0xff]  ;;  %v31_v1 = vld [vmem:[%s688_s1 + $0x18] sm:$0xff]  ;;  %v28_v2 = vld [vmem:[%s688_s1] sm:$0xff]  ;;  %136 = vmatprep.mubr.f32.mxu0 %v429_v3 }
   0x2   :  { %v360_v4 = vpack.c.bf16 %v31_v1, %v29_v0  ;;  %v30_v5 = vld [vmem:[%s688_s1 + $0x10] sm:$0xff]  ;;  %v33_v6 = vld [vmem:[%s688_s1 + $0x28] sm:$0xff]  ;;  %v35_v7 = vld [vmem:[%s688_s1 + $0x38] sm:$0xff] }
   0x3   :  { %v362_v8 = vpack.c.bf16 %v30_v5, %v28_v2  ;;  %v364_v9 = vpack.c.bf16 %v35_v7, %v33_v6  ;;  %v32_v10 = vld [vmem:[%s688_s1 + $0x20] sm:$0xff]  ;;  %v34_v11 = vld [vmem:[%s688_s1 + $0x30] sm:$0xff]  ;;  %v37_v12 = vld [vmem:[%s688_s1 + $0x48] sm:$0xff] }
   0x4   :  { %361 = vmatprep.subr.bf16.mxu0 %v360_v4  ;;  %v39_v13 = vld [vmem:[%s688_s1 + $0x58] sm:$0xff]  ;;  %v366_v14 = vpack.c.bf16 %v34_v11, %v32_v10  ;;  %v36_v16 = vld [vmem:[%s688_s1 + $0x40] sm:$0xff]  ;;  %v38_v17 = vld [vmem:[%s688_s1 + $0x50] sm:$0xff] }
   0x5   :  { %363 = vmatpush1.bf16.msra.mxu0 %v362_v8  ;;  %v368_v15 = vpack.c.bf16 %v39_v13, %v37_v12  ;;  %v41_v18 = vld [vmem:[%s688_s1 + $0x68] sm:$0xff]  ;;  %v43_v19 = vld [vmem:[%s688_s1 + $0x78] sm:$0xff]  ;;  %v370_v20 = vpack.c.bf16 %v38_v17, %v36_v16  ;;  %v40_v22 = vld [vmem:[%s688_s1 + $0x60] sm:$0xff] }
   0x6   :  { %365 = vmatprep.subr.bf16.mxu0 %v364_v9  ;;  %v372_v21 = vpack.c.bf16 %v43_v19, %v41_v18  ;;  %v42_v23 = vld [vmem:[%s688_s1 + $0x70] sm:$0xff]  ;;  %v45_v24 = vld [vmem:[%s688_s1 + $0x88] sm:$0xff]  ;;  %v47_v25 = vld [vmem:[%s688_s1 + $0x98] sm:$0xff] }
   0x7   :  { %v44_v26 = vld [vmem:[%s688_s1 + $0x80] sm:$0xff]  ;;  %v46_v27 = vld [vmem:[%s688_s1 + $0x90] sm:$0xff]  ;;  %v170_v29 = vld [vmem:[%s689_s3 + $0x88] sm:$0xff]  ;;  %v374_v30 = vpack.c.bf16 %v42_v23, %v40_v22  ;;  %v376_v36 = vpack.c.bf16 %v47_v25, %v45_v24 }
   0x8   :  { %v169_v28 = vld [vmem:[%s689_s3 + $0x80] sm:$0xff]  ;;  %v49_v31 = vld [vmem:[%s688_s1 + $0xa8] sm:$0xff]  ;;  %v171_v35 = vld [vmem:[%s689_s3 + $0x90] sm:$0xff]  ;;  %v378_v46 = vpack.c.bf16 %v46_v27, %v44_v26 }
   0x9   :  { %367 = vmatpush1.bf16.msra.mxu0 %v366_v14  ;;  %v392_v32 = vpack.c.bf16 %v170_v29, %v169_v28  ;;  %v153_v33 = vld [vmem:[%s689_s3] sm:$0xff]  ;;  %v154_v34 = vld [vmem:[%s689_s3 + $0x8] sm:$0xff]  ;;  %v172_v38 = vld [vmem:[%s689_s3 + $0x98] sm:$0xff] }
   0xa   :  { %369 = vmatprep.subr.bf16.mxu0 %v368_v15  ;;  %v394_v37 = vpack.c.bf16 %v154_v34, %v153_v33  ;;  %v155_v39 = vld [vmem:[%s689_s3 + $0x10] sm:$0xff]  ;;  %v156_v40 = vld [vmem:[%s689_s3 + $0x18] sm:$0xff]  ;;  %v396_v42 = vpack.c.bf16 %v172_v38, %v171_v35  ;;  %v173_v43 = vld [vmem:[%s689_s3 + $0xa0] sm:$0xff]  ;;  %v62_v35 = vlaneseq }
   0xb   :  { %v51_v41 = vld [vmem:[%s688_s1 + $0xb8] sm:$0xff]  ;;  %393 = vmatprep.subr.bf16.mxu1 %v392_v32  ;;  %v174_v44 = vld [vmem:[%s689_s3 + $0xa8] sm:$0xff]  ;;  %v398_v45 = vpack.c.bf16 %v156_v40, %v155_v39  ;;  %v48_v47 = vld [vmem:[%s688_s1 + $0xa0] sm:$0xff] }
   0xc   :  { %395 = vmatpush3.bf16.msra.mxu1 %v394_v37  ;;  %v400_v48 = vpack.c.bf16 %v174_v44, %v173_v43  ;;  %v157_v49 = vld [vmem:[%s689_s3 + $0x20] sm:$0xff]  ;;  %v158_v50 = vld [vmem:[%s689_s3 + $0x28] sm:$0xff]  ;;  %v380_v51 = vpack.c.bf16 %v51_v41, %v49_v31  ;;  %v50_v52 = vld [vmem:[%s688_s1 + $0xb0] sm:$0xff] }
   0xd   :  { %371 = vmatpush1.bf16.msra.mxu0 %v370_v20  ;;  %397 = vmatprep.subr.bf16.mxu1 %v396_v42  ;;  %v175_v53 = vld [vmem:[%s689_s3 + $0xb0] sm:$0xff]  ;;  %v176_v54 = vld [vmem:[%s689_s3 + $0xb8] sm:$0xff]  ;;  %v53_v55 = vld [vmem:[%s688_s1 + $0xc8] sm:$0xff]  ;;  %v402_v57 = vpack.c.bf16 %v158_v50, %v157_v49  ;;  %v382_v58 = vpack.c.bf16 %v50_v52, %v48_v47 }
   0xe   :  { %373 = vmatprep.subr.bf16.mxu0 %v372_v21  ;;  %v55_v56 = vld [vmem:[%s688_s1 + $0xd8] sm:$0xff]  ;;  %v52_v59 = vld [vmem:[%s688_s1 + $0xc0] sm:$0xff]  ;;  %v404_v60 = vpack.c.bf16 %v176_v54, %v175_v53  ;;  %v159_v61 = vld [vmem:[%s689_s3 + $0x30] sm:$0xff] }
   0xf   :  { %v160_v62 = vld [vmem:[%s689_s3 + $0x38] sm:$0xff]  ;;  %v384_v63 = vpack.c.bf16 %v55_v56, %v53_v55  ;;  %v54_v0 = vld [vmem:[%s688_s1 + $0xd0] sm:$0xff]  ;;  %v177_v1 = vld [vmem:[%s689_s3 + $0xc0] sm:$0xff] }
  0x10   :  { %399 = vmatpush3.bf16.msra.mxu1 %v398_v45  ;;  %v178_v2 = vld [vmem:[%s689_s3 + $0xc8] sm:$0xff]  ;;  %v59_v5 = vld [vmem:[%s688_s1 + $0xf8] sm:$0xff]  ;;  %v406_v6 = vpack.c.bf16 %v160_v62, %v159_v61  ;;  %v386_v7 = vpack.c.bf16 %v54_v0, %v52_v59  ;;  %v56_v8 = vld [vmem:[%s688_s1 + $0xe0] sm:$0xff] }
  0x11   :  { %375 = vmatpush1.bf16.msra.mxu0 %v374_v30  ;;  %401 = vmatprep.subr.bf16.mxu1 %v400_v48  ;;  %v57_v4 = vld [vmem:[%s688_s1 + $0xe8] sm:$0xff]  ;;  %v408_v9 = vpack.c.bf16 %v178_v2, %v177_v1  ;;  %v161_v10 = vld [vmem:[%s689_s3 + $0x40] sm:$0xff]  ;;  %v58_v13 = vld [vmem:[%s688_s1 + $0xf0] sm:$0xff] }
  0x12   :  { %377 = vmatprep.subr.bf16.mxu0 %v376_v36  ;;  %v162_v11 = vld [vmem:[%s689_s3 + $0x48] sm:$0xff]  ;;  %v388_v12 = vpack.c.bf16 %v59_v5, %v57_v4  ;;  %v179_v14 = vld [vmem:[%s689_s3 + $0xd0] sm:$0xff]  ;;  %v180_v15 = vld [vmem:[%s689_s3 + $0xd8] sm:$0xff]  ;;  %v390_v17 = vpack.c.bf16 %v58_v13, %v56_v8  ;;  %v63_v36 = vshrl.u32 %v62_v35, 7 }
  0x13   :  { %v410_v16 = vpack.c.bf16 %v162_v11, %v161_v10  ;;  %v412_v18 = vpack.c.bf16 %v180_v15, %v179_v14  ;;  %v163_v19 = vld [vmem:[%s689_s3 + $0x50] sm:$0xff]  ;;  %v164_v20 = vld [vmem:[%s689_s3 + $0x58] sm:$0xff]  ;;  %v181_v21 = vld [vmem:[%s689_s3 + $0xe0] sm:$0xff] }
  0x14   :  { %403 = vmatpush3.bf16.msra.mxu1 %v402_v57  ;;  %v182_v22 = vld [vmem:[%s689_s3 + $0xe8] sm:$0xff]  ;;  %v414_v23 = vpack.c.bf16 %v164_v20, %v163_v19  ;;  %v26_v24 = vld [vmem:[%s690_s0] sm:$0xff]  ;;  %v184_v30 = vld [vmem:[%s689_s3 + $0xf8] sm:$0xff]  ;;  %v64_v37 = vsub.s32 0, %v63_v36  ;;  %v68_v39 = vsub.s32 1, %v63_v36 }
  0x15   :  { %379 = vmatpush1.bf16.msra.mxu0 %v378_v46  ;;  %405 = vmatprep.subr.bf16.mxu1 %v404_v60  ;;  %v416_v25 = vpack.c.bf16 %v182_v22, %v181_v21  ;;  %v27_v26 = vld [vmem:[%s690_s0 + $0x8] sm:$0xff]  ;;  %v165_v27 = vld [vmem:[%s689_s3 + $0x60] sm:$0xff]  ;;  %v167_v32 = vld [vmem:[%s689_s3 + $0x70] sm:$0xff] }
  0x16   :  { %381 = vmatprep.subr.bf16.mxu0 %v380_v51  ;;  %v166_v28 = vld [vmem:[%s689_s3 + $0x68] sm:$0xff]  ;;  %v168_v33 = vld [vmem:[%s689_s3 + $0x78] sm:$0xff]  ;;  %v60_v38 = vld [vmem:[%s691_s2] sm:$0x3] }
  0x17   :  { %v418_v29 = vpack.c.bf16 %v166_v28, %v165_v27  ;;  %v422_v34 = vpack.c.bf16 %v168_v33, %v167_v32  ;;  %v65_v40 = vrot.slane %v60_v38, %v64_v37  ;;  %v69_v41 = vrot.slane %v60_v38, %v68_v39  ;;  %v319_v55 = vld [vmem:[%s692_s4] ss:$0 sm:$0xff] }
  0x18   :  { %407 = vmatpush3.bf16.msra.mxu1 %v406_v6  ;;  %v320_v20 = vld [vmem:[%s693_s5] ss:$0 sm:$0xff] }
  0x19   :  { %383 = vmatpush1.bf16.msra.mxu0 %v382_v58  ;;  %409 = vmatprep.subr.bf16.mxu1 %v408_v9  ;;  %v321_v22 = vld [vmem:[%s694_s6] ss:$0 sm:$0xff] }
  0x1a   :  { %385 = vmatprep.subr.bf16.mxu0 %v384_v63 }
  0x1c   :  { %411 = vmatpush3.bf16.msra.mxu1 %v410_v16 }
  0x1d   :  { %387 = vmatpush1.bf16.msra.mxu0 %v386_v7  ;;  %413 = vmatprep.subr.bf16.mxu1 %v412_v18 }
  0x1e   :  { %389 = vmatprep.subr.bf16.mxu0 %v388_v12 }
  0x20   :  { %415 = vmatpush3.bf16.msra.mxu1 %v414_v23 }
  0x21   :  { %391 = vmatpush1.bf16.msra.mxu0 %v390_v17  ;;  %417 = vmatprep.subr.bf16.mxu1 %v416_v25 }
  0x24   :  { %137 = vmatmul.mubr.f32.vlgmr.msra.gmra.mrb[0].mxu0 %v26_v24  ;;  %419 = vmatpush3.bf16.msra.mxu1 %v418_v29 }
  0x25   :  { %142 = vmatprep.mubr.f32.mxu0 %v429_v3  ;;  %v183_v3 = vld [vmem:[%s689_s3 + $0xf0] sm:$0xff] }
  0x26   :  { %v420_v31 = vpack.c.bf16 %v184_v30, %v183_v3 }
  0x28   :  { %143 = vmatmul.mubr.f32.gmra.mrb[2].mxu0 %v27_v26  ;;  %421 = vmatprep.subr.bf16.mxu1 %v420_v31 }
  0x29   :  { %423 = vmatpush3.bf16.msra.mxu1 %v422_v34 }
  0xf7   :  { %v138_v42 = vpop.f32.mrb[0].mxu0 }
  0xf8   :  { %v139_v43 = vadd.f32 %v138_v42, %v65_v40  ;;  %v140_v44 = vpop.f32.mrb[1].mxu0 }
  0xf9   :  { %v141_v45 = vadd.f32 %v140_v44, %v69_v41 }
  0xfa   :  { %v149_v48 = vmax.f32 %v139_v43, 0.0 }
  0xfb   :  { %v144_v46 = vpop.f32.mrb[2].mxu0  ;;  %v150_v47 = vmax.f32 %v141_v45, 0.0 }
  0xfc   :  { %v145_v49 = vadd.f32 %v144_v46, %v65_v40  ;;  %v146_v50 = vpop.f32.mrb[3].mxu0 }
  0xfd   :  { %v147_v51 = vadd.f32 %v146_v50, %v69_v41  ;;  %256 = vmatprep.mubr.f32.mxu1 %v150_v47 }
  0xfe   :  { %257 = vmatmul.mubr.f32.vlgmr.msra.gmra.mrb[0].mxu1 %v149_v48  ;;  %v151_v53 = vmax.f32 %v145_v49, 0.0 }
  0xff   :  { %v152_v52 = vmax.f32 %v147_v51, 0.0 }
 0x101   :  { %261 = vmatprep.mubr.f32.mxu1 %v152_v52 }
 0x102   :  { %262 = vmatmul.mubr.f32.gmra.mrb[2].mxu1 %v151_v53 }
 0x1d1   :  { %v354_v54 = vpop.f32.mrb[0].mxu1 }
 0x1d2   :  { %v355_v56 = vpop.f32.mrb[1].mxu1 }
 0x1d3   :  { %v356_v57 = vadd.f32 %v355_v56, %v354_v54 }
 0x1d5   :  { %v259_v58 = vadd.f32 %v356_v57, %v319_v55  ;;  %v357_v59 = vpop.f32.mrb[2].mxu1 }
 0x1d6   :  { %v358_v60 = vpop.f32.mrb[3].mxu1 }
 0x1d7   :  { %v359_v61 = vadd.f32 %v358_v60, %v357_v59  ;;  %v267_v62 = vadd.f32 %v259_v58, %v26_v24 }
 0x1d9   :  { %v264_v63 = vadd.f32 %v359_v61, %v319_v55  ;;  %269 = vadd.xlane.f32.xlu0 %v267_v62  ;;  %v275_v0 = vmul.f32 %v267_v62, %v267_v62 }
 0x1db   :  { %277 = vadd.xlane.f32.xlu1 %v275_v0  ;;  %v268_v1 = vadd.f32 %v264_v63, %v27_v26 }
 0x1dd   :  { %271 = vadd.xlane.f32.xlu0 %v268_v1  ;;  %v276_v2 = vmul.f32 %v268_v1, %v268_v1 }
 0x1df   :  { %279 = vadd.xlane.f32.xlu1 %v276_v2 }
 0x266   :  { %v270_v4 = vpop.xlane.xlu0 %269 }
 0x267   :  { %v273_v5 = vmul.f32 0.0078125, %v270_v4 }
 0x268   :  { %v278_v6 = vpop.xlane.xlu1 %277 }
 0x269   :  { %v283_v7 = vmul.f32 %v273_v5, %v273_v5  ;;  %v281_v8 = vmul.f32 0.0078125, %v278_v6  ;;  %v287_v18 = vsub.f32 %v267_v62, %v273_v5 }
 0x26a   :  { %v272_v9 = vpop.xlane.xlu0 %271 }
 0x26b   :  { %v285_v10 = vsub.f32 %v281_v8, %v283_v7  ;;  %v274_v11 = vmul.f32 0.0078125, %v272_v9 }
 0x26c   :  { %v280_v12 = vpop.xlane.xlu1 %279 }
 0x26d   :  { %v289_v13 = vadd.f32 1e-05, %v285_v10  ;;  %v284_v14 = vmul.f32 %v274_v11, %v274_v11  ;;  %v282_v15 = vmul.f32 0.0078125, %v280_v12  ;;  %v288_v24 = vsub.f32 %v268_v1, %v274_v11 }
 0x26f   :  { %425 = vrsqrt.f32 %v289_v13  ;;  %v286_v16 = vsub.f32 %v282_v15, %v284_v14 }
 0x271   :  { %v290_v17 = vadd.f32 1e-05, %v286_v16 }
 0x273   :  { %427 = vrsqrt.f32 %v290_v17 }
 0x279   :  { %v426_v19 = vpop.eup %425 }
 0x27a   :  { %v293_v21 = vmul.f32 %v426_v19, %v287_v18 }
 0x27c   :  { %v302_v23 = vmul.f32 %v320_v20, %v293_v21 }
 0x27d   :  { %v428_v25 = vpop.eup %427 }
 0x27e   :  { %v311_v26 = vadd.f32 %v321_v22, %v302_v23  ;;  %v294_v27 = vmul.f32 %v428_v25, %v288_v24 }
 0x280   :  { %313 = vst [vmem:[%s695_s7] sm:$0xff] %v311_v26  ;;  %v303_v28 = vmul.f32 %v320_v20, %v294_v27 }
 0x282   :  { %v312_v29 = vadd.f32 %v321_v22, %v303_v28 }
 0x284   :  { %314 = vst [vmem:[%s695_s7 + $0x8] sm:$0xff] %v312_v29 }

// kernel: transformer_monotonic_forward.64
= control target key start
LH: loop header
LB: loop body
LE: loop exit
PB: predicated region body
PF: predicated region fallthrough
CT: control target
= control target key end

     0   :  { %s1210_s15 = smov 0   ;;  %s1306_s0 = inlined_call_operand.vmem [shape: f32[2,4,8,32], index: 0, kind: input, shape index: {}]   ;;  %s1307_s1 = inlined_call_operand.vmem [shape: f32[2,4,16,32], index: 1, kind: input, shape index: {}]   ;;  %s1308_s2 = inlined_call_operand.vmem [shape: f32[2,4,16,32], index: 2, kind: input, shape index: {}]   ;;  %s1309_s3 = inlined_call_operand.vmem [shape: f32[8,16], index: 3, kind: input, shape index: {}]   ;;  %s1310_s4 = inlined_call_operand.vmem [shape: f32[2,4,8,32], index: 4, kind: output, shape index: {}]  }
   0x1 LB: > { %s1004_s16 = sadd.s32 4294967295, %s1180_s15   ;;  %p1008_p0 = scmp.ge.s32.totalorder %s1180_s15, 1  ;;  %s1180_s15 = sphi %s1210_s15, %s14_s15  }
   0x2   : > { %p182_p1 = scmp.lt.s32.totalorder %s1180_s15, 3 }
   0x4   : > { %p183_p2 = pnand %p1008_p0, %p182_p1 }
   0x5   : > { %p218_p3 = scmp.lt.s32.totalorder (!%p183_p2), %s1004_s16, 1  ;;  %v1182_v0 = vmov (!%p183_p2), 0.0|0.0   ;;  %vm258_vm0 = vcmask (!%p183_p2), 261120   ;;  %vm1183_vm1 = vmmov (!%p183_p2), 0   ;;  %v1184_v1 = vmov (!%p183_p2), 0.0   ;;  %v579_v20 = vld [vmem:[%s1309_s3] sm:$0xff] (!%p183_p2) }
   0x6   : > { %186 = sbr.rel (%p183_p2) target bundleno = 781 (0x30d), region = 36  ;;  %1119 = vmatprep.subr.bf16.mxu0 (!%p183_p2), %v1182_v0  ;;  %1123 = vmatprep.subr.bf16.mxu1 (!%p183_p2), %v1182_v0  ;;  %vm1234_vm2 = vmpackc.low (!%p183_p2), %vm258_vm0, %vm258_vm0  ;;  %vm584_vm3 = vcmask (!%p183_p2), 130048  }
   0x7   : > { %1067 = vmatprep.mubr.msk.f32.mxu0 (!%p183_p2), %vm1183_vm1, %v1184_v1  ;;  %1074 = vmatprep.mubr.msk.f32.mxu1 (!%p183_p2), %vm1183_vm1, %v1184_v1 }
   0xd   : > { %s1314_s16 = smov (!%p218_p3, %s1004_s16), 1 }
   0xe   : > { %s1036_s17 = sshll.u32 %s1314_s16, 6  ;;  %s1035_s21 = sshll.u32 %s1314_s16, 5 }
   0xf   : > { %s227_s20 = scalar_lea.vmem %s1307_s1, %s1036_s17  ;;  %s222_s24 = scalar_lea.vmem %s1306_s0, %s1035_s21 }
  0x10   : > { %v242_v3 = vld [vmem:[%s227_s20] sm:$0xff]  ;;  %v243_v4 = vld [vmem:[%s227_s20 + $0x8] sm:$0xff]  ;;  %v244_v5 = vld [vmem:[%s227_s20 + $0x10] sm:$0xff]  ;;  %s232_s29 = scalar_lea.vmem %s1308_s2, %s1036_s17  ;;  %s237_s6 = scalar_lea.vmem %s1310_s4, %s1035_s21 }
  0x11   : > { %v1120_v6 = vpack.c.bf16 %v243_v4, %v242_v3  ;;  %v245_v7 = vld [vmem:[%s227_s20 + $0x18] sm:$0xff]  ;;  %v246_v9 = vld [vmem:[%s227_s20 + $0x20] sm:$0xff]  ;;  %v247_v10 = vld [vmem:[%s227_s20 + $0x28] sm:$0xff] }
  0x12   : > { %v1124_v8 = vpack.c.bf16 %v245_v7, %v244_v5  ;;  %v248_v11 = vld [vmem:[%s227_s20 + $0x30] sm:$0xff]  ;;  %v249_v12 = vld [vmem:[%s227_s20 + $0x38] sm:$0xff]  ;;  %v238_v13 = vld [vmem:[%s222_s24] sm:$0xff]  ;;  %v1128_v14 = vpack.c.bf16 %v247_v10, %v246_v9 }
  0x13   : > { %1122 = vmatpush3.bf16.xpose.msk.msra.mxu0 %vm1234_vm2, %v1120_v6  ;;  %v239_v15 = vld [vmem:[%s222_s24 + $0x8] sm:$0xff]  ;;  %v1132_v16 = vpack.c.bf16 %v249_v12, %v248_v11  ;;  %v240_v17 = vld [vmem:[%s222_s24 + $0x10] sm:$0xff]  ;;  %v241_v18 = vld [vmem:[%s222_s24 + $0x18] sm:$0xff] }
  0x14   : > { %1126 = vmatpush3.bf16.xpose.msk.msra.mxu1 %vm1234_vm2, %v1124_v8  ;;  %1127 = vmatprep.subr.bf16.mxu0 %v1182_v0  ;;  %v250_v60 = vld [vmem:[%s232_s29] sm:$0xff]  ;;  %v251_v61 = vld [vmem:[%s232_s29 + $0x8] sm:$0xff]  ;;  %v252_v63 = vld [vmem:[%s232_s29 + $0x10] sm:$0xff] }
  0x15   : > { %1131 = vmatprep.subr.bf16.mxu1 %v1182_v0  ;;  %v1136_v62 = vpack.c.bf16 %v251_v61, %v250_v60  ;;  %v253_v2 = vld [vmem:[%s232_s29 + $0x18] sm:$0xff]  ;;  %v254_v7 = vld [vmem:[%s232_s29 + $0x20] sm:$0xff]  ;;  %v255_v8 = vld [vmem:[%s232_s29 + $0x28] sm:$0xff] }
  0x16   : > { %v1139_v3 = vpack.c.bf16 %v253_v2, %v252_v63  ;;  %v1142_v10 = vpack.c.bf16 %v255_v8, %v254_v7 }
  0x1a   : > { %1068 = vmatmul.mubr.msk.f32.vlgmr.msra.gmra.mrb[0].mxu0 %vm258_vm0, %v238_v13  ;;  %v256_v13 = vld [vmem:[%s232_s29 + $0x30] sm:$0xff] }
  0x1b   : > { %1130 = vmatpush3.bf16.xpose.msk.msra.mxu0 %vm1234_vm2, %v1128_v14  ;;  %1075 = vmatmul.mubr.msk.f32.vlgmr.msra.gmra.mrb[0].mxu1 %vm258_vm0, %v239_v15  ;;  %v257_v14 = vld [vmem:[%s232_s29 + $0x38] sm:$0xff] }
  0x1c   : > { %1134 = vmatpush3.bf16.xpose.msk.msra.mxu1 %vm1234_vm2, %v1132_v16  ;;  %1081 = vmatprep.mubr.msk.f32.mxu0 %vm1183_vm1, %v1184_v1 }
  0x1d   : > { %1088 = vmatprep.mubr.msk.f32.mxu1 %vm1183_vm1, %v1184_v1  ;;  %1135 = vmatprep.subr.bf16.mxu0 %v1182_v0 }
  0x1e   : > { %1138 = vmatprep.subr.bf16.mxu1 %v1182_v0 }
  0x22   : > { %1082 = vmatmul.mubr.msk.f32.vlgmr.msra.gmra.mrb[2].mxu0 %vm258_vm0, %v240_v17 }
  0x23   : > { %1089 = vmatmul.mubr.msk.f32.vlgmr.msra.gmra.mrb[2].mxu1 %vm258_vm0, %v241_v18  ;;  %1095 = vmatprep.mubr.msk.f32.mxu0 %vm1183_vm1, %v1184_v1 }
  0x24   : > { %1102 = vmatprep.mubr.msk.f32.mxu1 %vm1183_vm1, %v1184_v1  ;;  %1137 = vmatpush3.bf16.msra.mxu0 %v1136_v62 }
  0x25   : > { %1141 = vmatprep.subr.bf16.mxu0 %v1182_v0  ;;  %1140 = vmatpush3.bf16.msra.mxu1 %v1139_v3 }
  0x26   : > { %1144 = vmatprep.subr.bf16.mxu1 %v1182_v0  ;;  %v1145_v0 = vpack.c.bf16 %v257_v14, %v256_v13 }
  0xed   : > { %v334_v19 = vpop.f32.mrb[0].mxu0 }
  0xee   : > { %v575_v21 = vmul.f32 0.17677669, %v334_v19  ;;  %v1069_v22 = vpop.f32.mrb[1].mxu0  ;;  %v413_v23 = vpop.f32.mrb[0].mxu1 }
  0xef   : > { %v576_v24 = vmul.f32 0.17677669, %v413_v23  ;;  %v1076_v25 = vpop.f32.mrb[1].mxu1 }
  0xf0   : > { %v580_v26 = vadd.f32 %v579_v20, %v575_v21 }
  0xf1   : > { %v581_v27 = vadd.f32 %v579_v20, %v576_v24 }
  0xf2   : > { %v585_v28 = vsel %vm584_vm3, %v580_v26, -inf }
  0xf3   : > { %586 = vmax.xlane.f32.xlu0 %v585_v28  ;;  %v588_v29 = vsel %vm584_vm3, %v581_v27, -inf }
  0xf5   : > { %v492_v30 = vpop.f32.mrb[2].mxu0 }
  0xf6   : > { %v577_v31 = vmul.f32 0.17677669, %v492_v30  ;;  %v1083_v32 = vpop.f32.mrb[3].mxu0  ;;  %v571_v33 = vpop.f32.mrb[2].mxu1 }
  0xf7   : > { %589 = vmax.xlane.f32.xlu0 %v588_v29  ;;  %v578_v34 = vmul.f32 0.17677669, %v571_v33  ;;  %v1090_v35 = vpop.f32.mrb[3].mxu1 }
  0xf8   : > { %v582_v36 = vadd.f32 %v579_v20, %v577_v31 }
  0xf9   : > { %v583_v37 = vadd.f32 %v579_v20, %v578_v34 }
  0xfa   : > { %v591_v38 = vsel %vm584_vm3, %v582_v36, -inf }
  0xfb   : > { %592 = vmax.xlane.f32.xlu1 %v591_v38  ;;  %v594_v39 = vsel %vm584_vm3, %v583_v37, -inf }
  0xff   : > { %595 = vmax.xlane.f32.xlu1 %v594_v39 }
 0x180   : > { %v587_v40 = vpop.xlane.xlu0 %586 }
 0x181   : > { %v597_v41 = vsub.f32 %v580_v26, %v587_v40 }
 0x183   : > { %v601_v42 = vmul.f32 1.442695, %v597_v41 }
 0x184   : > { %v590_v43 = vpop.xlane.xlu0 %589 }
 0x185   : > { %1158 = vpow2.f32 %v601_v42  ;;  %v598_v44 = vsub.f32 %v581_v27, %v590_v43 }
 0x187   : > { %v603_v45 = vmul.f32 1.442695, %v598_v44 }
 0x188   : > { %v593_v46 = vpop.xlane.xlu1 %592 }
 0x189   : > { %1160 = vpow2.f32 %v603_v45  ;;  %v599_v47 = vsub.f32 %v582_v36, %v593_v46 }
 0x18b   : > { %v605_v48 = vmul.f32 1.442695, %v599_v47 }
 0x18c   : > { %v596_v49 = vpop.xlane.xlu1 %595 }
 0x18d   : > { %1162 = vpow2.f32 %v605_v48  ;;  %v600_v50 = vsub.f32 %v583_v37, %v596_v49 }
 0x18f   : > { %v1159_v51 = vpop.eup %1158  ;;  %v607_v52 = vmul.f32 1.442695, %v600_v50 }
 0x190   : > { %v609_v53 = vsel %vm584_vm3, %v1159_v51, 0.0 }
 0x191   : > { %1164 = vpow2.f32 %v607_v52  ;;  %610 = vadd.xlane.f32.xlu0 %v609_v53 }
 0x193   : > { %v1161_v54 = vpop.eup %1160 }
 0x194   : > { %v612_v55 = vsel %vm584_vm3, %v1161_v54, 0.0 }
 0x195   : > { %613 = vadd.xlane.f32.xlu1 %v612_v55 }
 0x197   : > { %v1163_v56 = vpop.eup %1162 }
 0x198   : > { %v615_v57 = vsel %vm584_vm3, %v1163_v56, 0.0 }
 0x199   : > { %616 = vadd.xlane.f32.xlu0 %v615_v57 }
 0x19b   : > { %v1165_v58 = vpop.eup %1164 }
 0x19c   : > { %v618_v59 = vsel %vm584_vm3, %v1165_v58, 0.0 }
 0x19d   : > { %619 = vadd.xlane.f32.xlu1 %v618_v59 }
 0x21e   : > { %v611_v4 = vpop.xlane.xlu0 %610 }
 0x21f   : > { %1166 = vrcp.f32 %v611_v4 }
 0x222   : > { %v614_v5 = vpop.xlane.xlu1 %613 }
 0x223   : > { %1168 = vrcp.f32 %v614_v5 }
 0x226   : > { %v617_v6 = vpop.xlane.xlu0 %616 }
 0x227   : > { %1170 = vrcp.f32 %v617_v6 }
 0x229   : > { %v1167_v9 = vpop.eup %1166 }
 0x22a   : > { %v622_v11 = vmul.f32 %v1167_v9, %v1159_v51  ;;  %v620_v12 = vpop.xlane.xlu1 %619 }
 0x22b   : > { %1172 = vrcp.f32 %v620_v12 }
 0x22c   : > { %1096 = vmatmul.mubr.msk.f32.vlgmr.msra.gmra.mrb[4].mxu0 %vm584_vm3, %v622_v11 }
 0x22d   : > { %v1169_v15 = vpop.eup %1168  ;;  %1143 = vmatpush3.bf16.msra.mxu0 %v1142_v10  ;;  %1109 = vmatprep.mubr.msk.f32.mxu0 %vm1183_vm1, %v1184_v1 }
 0x22e   : > { %v624_v16 = vmul.f32 %v1169_v15, %v1161_v54 }
 0x230   : > { %1103 = vmatmul.mubr.msk.f32.vlgmr.msra.gmra.mrb[4].mxu1 %vm584_vm3, %v624_v16 }
 0x231   : > { %v1171_v17 = vpop.eup %1170  ;;  %1146 = vmatpush3.bf16.msra.mxu1 %v1145_v0  ;;  %1116 = vmatprep.mubr.msk.f32.mxu1 %vm1183_vm1, %v1184_v1 }
 0x232   : > { %v626_v18 = vmul.f32 %v1171_v17, %v1163_v56 }
 0x234   : > { %1110 = vmatmul.mubr.msk.f32.vlgmr.msra.gmra.mrb[6].mxu0 %vm584_vm3, %v626_v18 }
 0x235   : > { %v1173_v19 = vpop.eup %1172 }
 0x236   : > { %v628_v20 = vmul.f32 %v1173_v19, %v1165_v58 }
 0x238   : > { %1117 = vmatmul.mubr.msk.f32.vlgmr.msra.gmra.mrb[6].mxu1 %vm584_vm3, %v628_v20 }
 0x2ff   : > { %v698_v21 = vpop.f32.mrb[4].mxu0 }
 0x300   : > { %921 = vst.msk [vmem:[%s237_s6] sm:$0xff] %vm258_vm0, %v698_v21  ;;  %v1097_v22 = vpop.f32.mrb[5].mxu0 }
 0x303   : > { %v771_v23 = vpop.f32.mrb[4].mxu1 }
 0x304   : > { %922 = vst.msk [vmem:[%s237_s6 + $0x8] sm:$0xff] %vm258_vm0, %v771_v23  ;;  %v1104_v1 = vpop.f32.mrb[5].mxu1 }
 0x307   : > { %v844_v24 = vpop.f32.mrb[6].mxu0 }
 0x308   : > { %923 = vst.msk [vmem:[%s237_s6 + $0x10] sm:$0xff] %vm258_vm0, %v844_v24  ;;  %v1111_v25 = vpop.f32.mrb[7].mxu0 }
 0x30b   : > { %v917_v26 = vpop.f32.mrb[6].mxu1 }
 0x30c   : > { %924 = vst.msk [vmem:[%s237_s6 + $0x18] sm:$0xff] %vm258_vm0, %v917_v26  ;;  %v1118_v27 = vpop.f32.mrb[7].mxu1 }
 0x30d PF: > { %s14_s15 = sadd.s32 1, %s1180_s15  }
 0x30e   : > { %p11_p4 = scmp.ge.s32.totalorder %s14_s15, 4  }
 0x310   :  { %13 = sbr.rel (!%p11_p4) target bundleno = 1 (0x1), region = 72 }

// kernel: transformer_monotonic_forward.81
= control target key start
LH: loop header
LB: loop body
LE: loop exit
PB: predicated region body
PF: predicated region fallthrough
CT: control target
= control target key end

     0   :  { %s177_s0 = inlined_call_operand.vmem [shape: f32[16,128], index: 0, kind: input, shape index: {}]   ;;  %s178_s1 = inlined_call_operand.vmem [shape: f32[16,128], index: 1, kind: input, shape index: {}]   ;;  %s179_s2 = inlined_call_operand.vmem [shape: f32[1,128], index: 2, kind: input, shape index: {}]   ;;  %s180_s3 = inlined_call_operand.vmem [shape: f32[1,128], index: 3, kind: input, shape index: {}]   ;;  %s181_s4 = inlined_call_operand.hbm [shape: f32[16,128], index: 4, kind: output, shape index: {}]  }
   0x1   :  { %v18_v0 = vld [vmem:[%s177_s0] sm:$0xff]  ;;  %v19_v2 = vld [vmem:[%s177_s0 + $0x8] sm:$0xff] }
   0x2   :  { %v20_v1 = vld [vmem:[%s178_s1] sm:$0xff]  ;;  %v21_v4 = vld [vmem:[%s178_s1 + $0x8] sm:$0xff] }
   0x3   :  { %v22_v3 = vadd.f32 %v20_v1, %v18_v0 }
   0x4   :  { %9 = vsyncpa [#allocation3], 0  ;;  %v23_v5 = vadd.f32 %v21_v4, %v19_v2  ;;  %v86_v24 = vld [vmem:[%s179_s2] ss:$0 sm:$0xff]  ;;  %s119_s25 = smov [#allocation2]  }
   0x5   :  { %24 = vadd.xlane.f32.xlu0 %v22_v3  ;;  %v30_v6 = vmul.f32 %v22_v3, %v22_v3  ;;  %v87_v26 = vld [vmem:[%s180_s3] ss:$0 sm:$0xff]  ;;  %s75_s26 = sshll.u32 %s119_s25, 4  ;;  %s76_s26 = int_to_ptr.vmem [resolvable:$true] %s75_s26 }
   0x6   :  { %v31_v7 = vmul.f32 %v23_v5, %v23_v5  ;;  %s95_s27 = scalar_lea.vmem %s76_s26, 256  ;;  %p100_p1 = scmp.lt.s32.totalorder %s76_s26, %s76_s26 }
   0x7   :  { %32 = vadd.xlane.f32.xlu1 %v30_v6  ;;  %p96_p0 = scmp.ne.s32.totalorder %s76_s26, %s95_s27  ;;  %p101_p2 = scmp.lt.s32.totalorder %s95_s27, %s95_s27 }
   0x9   :  { %26 = vadd.xlane.f32.xlu0 %v23_v5  ;;  %p102_p3 = por %p101_p2, %p100_p1 }
   0xb   :  { %34 = vadd.xlane.f32.xlu1 %v31_v7  ;;  %p103_p4 = pnand %p102_p3, %p96_p0 }
  0x92   :  { %v25_v8 = vpop.xlane.xlu0 %24 }
  0x93   :  { %v28_v9 = vmul.f32 0.0078125, %v25_v8 }
  0x94   :  { %v33_v10 = vpop.xlane.xlu1 %32 }
  0x95   :  { %v38_v11 = vmul.f32 %v28_v9, %v28_v9  ;;  %v36_v12 = vmul.f32 0.0078125, %v33_v10  ;;  %v42_v22 = vsub.f32 %v22_v3, %v28_v9 }
  0x96   :  { %v27_v13 = vpop.xlane.xlu0 %26 }
  0x97   :  { %v40_v14 = vsub.f32 %v36_v12, %v38_v11  ;;  %v29_v15 = vmul.f32 0.0078125, %v27_v13 }
  0x98   :  { %v35_v16 = vpop.xlane.xlu1 %34 }
  0x99   :  { %v44_v17 = vadd.f32 1e-05, %v40_v14  ;;  %v39_v18 = vmul.f32 %v29_v15, %v29_v15  ;;  %v37_v19 = vmul.f32 0.0078125, %v35_v16  ;;  %v43_v27 = vsub.f32 %v23_v5, %v29_v15 }
  0x9b   :  { %91 = vrsqrt.f32 %v44_v17  ;;  %v41_v20 = vsub.f32 %v37_v19, %v39_v18 }
  0x9d   :  { %v45_v21 = vadd.f32 1e-05, %v41_v20 }
  0x9f   :  { %93 = vrsqrt.f32 %v45_v21 }
  0xa5   :  { %v92_v23 = vpop.eup %91 }
  0xa6   :  { %v48_v25 = vmul.f32 %v92_v23, %v42_v22 }
  0xa8   :  { %v57_v28 = vmul.f32 %v86_v24, %v48_v25 }
  0xa9   :  { %v94_v29 = vpop.eup %93 }
  0xaa   :  { %v49_v30 = vmul.f32 %v94_v29, %v43_v27  ;;  %v66_v31 = vadd.f32 %v87_v26, %v57_v28 }
  0xac   :  { %v58_v32 = vmul.f32 %v86_v24, %v49_v30  ;;  %68 = vst [vmem:[#allocation2] sm:$0xff] %v66_v31 }
  0xae   :  { %v67_v33 = vadd.f32 %v87_v26, %v58_v32 }
  0xb0   :  { %69 = vst [vmem:[#allocation2 + $0x8] sm:$0xff] %v67_v33 }
  0xb1   :  { %106 = shalt.err (!%p103_p4)
}
  0xb2   :  { %s107_s28 = scalar_lea.hbm %s181_s4, 256 }
  0xb3   :  { %p108_p5 = scmp.ne.s32.totalorder %s181_s4, %s107_s28  ;;  %p111_p6 = scmp.lt.u32.totalorder %s107_s28, %s181_s4 }
  0xb5   :  { %p113_p7 = pnand %p111_p6, %p108_p5 }
  0xb7   :  { %116 = shalt.err (!%p113_p7)
}
  0xb8   :  { %s120_s7 = smov 128   ;;  %s121_s8 = smov 8  }
  0xb9   :  { %81 = dma.vmem_to_hbm [thread:$0]  %s76_s26, 256, %s181_s4, [#allocation3], %s120_s7, %s120_s7, %s121_s8  }
  0xba   :  { %117 = dma.done.wait [#allocation3], 256  }
  0xbb   :  { %118 = vsyncadd [#allocation3], 4294967040 }
  0xbc   :  { %85 = vsyncpa [#allocation3], 1 }

</bundles_post_ra>
